<compile_context>
chip_gen: v6e
topology: v6e:2x2x1
jax: 0.10.0
libtpu: 0.0.40
codegen_flags: <defaults>
</compile_context>

<pallas_src>
import functools
import numpy as np

import jax
import jax.numpy as jnp
from jax.experimental import pallas as pl
from jax.experimental.pallas import tpu as pltpu

_BF16 = jnp.bfloat16
_F32 = jnp.float32
_VMEM_LIMIT = 32 * 1024 * 1024


def _relu(x):
    return jnp.maximum(x, 0.0)


# ------------------------- fused cycle-group kernel -------------------------

def _cycle_group_kernel(cr_ref, me_ref, er_ref,
                        c2w1_ref, c2b1_ref, c2w2_ref, c2b2_ref,
                        waut_ref,
                        cmw1_ref, cmb1_ref, cmw2_ref, cmb2_ref, cmw3_ref, cmb3_ref,
                        out_ref, *, s, s_pad):
    rows = cr_ref.shape[0]                     # whole cycles per tile * s_pad

    cr = cr_ref[...]                           # [rows, r]  bf16
    er = er_ref[...]                           # [E, r]     bf16

    # edge -> cycle gather (0th->1st): dense incidence matmul on the MXU.
    # TODO(synk): scalar-prefetch sparse gather for large graphs.
    e2c = jnp.dot(me_ref[...], er, preferred_element_type=_F32)          # [rows, r]

    # cycle_mlp_2 — channel concat folded into ONE wide-K (=2r) matmul.
    x0 = jnp.concatenate([cr, e2c.astype(_BF16)], axis=-1)               # [rows, 2r]
    h = _relu(jnp.dot(x0, c2w1_ref[...], preferred_element_type=_F32) + c2b1_ref[...])
    cn = _relu(jnp.dot(h.astype(_BF16), c2w2_ref[...], preferred_element_type=_F32)
               + c2b2_ref[...])                                          # [rows, r] f32

    # Autobahn cyclic shifts: XLU sublane rolls + wrap fix-up (no permutation
    # matmuls, no [s, R, R] tensors).  Rows are n_cyc blocks of s_pad sublanes.
    pos = jax.lax.broadcasted_iota(jnp.int32, (rows, 1), 0) % s_pad
    shifts = [cn]
    for j in range(1, s):
        ra = pltpu.roll(cn, rows - j, axis=0)      # ra[i] = cn[(i + j) % rows]
        rb = pltpu.roll(cn, s - j, axis=0)         # rb[i] = cn[(i + j - s) % rows]
        shifts.append(jnp.where(pos >= (s - j), rb, ra))

    # 1st->1st gather (min_overlaps=cycle size): within-cycle sum == sum of the
    # s cyclic shifts (each member counted exactly once) — replaces the dense S.
    lin = shifts[0]
    for t in shifts[1:]:
        lin = lin + t

    # Autobahn contraction: shifts staged lane-wise, ONE wide matmul (K = s*r).
    z = jnp.concatenate(shifts, axis=-1).astype(_BF16)                   # [rows, s*r]
    aut = jnp.dot(z, waut_ref[...], preferred_element_type=_F32)         # [rows, c*r]

    # cycle_mlp — [within-cycle sum | local | autobahn] as one wide-K matmul.
    x1 = jnp.concatenate([lin.astype(_BF16), cn.astype(_BF16), aut.astype(_BF16)],
                         axis=-1)                                        # [rows, (c+2)r]
    h1 = _relu(jnp.dot(x1, cmw1_ref[...], preferred_element_type=_F32) + cmb1_ref[...])
    h2 = _relu(jnp.dot(h1.astype(_BF16), cmw2_ref[...], preferred_element_type=_F32)
               + cmb2_ref[...])
    out = _relu(jnp.dot(h2.astype(_BF16), cmw3_ref[...], preferred_element_type=_F32)
                + cmb3_ref[...])
    out_ref[...] = out.astype(out_ref.dtype)


def _pick_cycles_per_tile(n_cyc, s_pad, max_rows=512):
    # Largest whole-cycle tile that still gives a >=2-step ("parallel") grid.
    for ct in range(n_cyc, 0, -1):
        if n_cyc % ct == 0 and ct * s_pad <= max_rows and n_cyc // ct >= 2:
            return ct
    return n_cyc


def _cycle_group_call(cr_pad, edge_rep_b, me_pad, w_aut, params, *, s, s_pad):
    r_rows, r = cr_pad.shape
    n_cyc = r_rows // s_pad
    E = edge_rep_b.shape[0]
    c_lanes = w_aut.shape[1]                   # num_channels * rep_dim

    ct = _pick_cycles_per_tile(n_cyc, s_pad)
    rows_t = ct * s_pad
    grid = (n_cyc // ct,)

    def rows_map(i):
        return (i, 0)

    def full_map(i):
        return (0, 0)

    weights = [params["c2_w1"], params["c2_b1"], params["c2_w2"], params["c2_b2"],
               w_aut,
               params["cm_w1"], params["cm_b1"], params["cm_w2"], params["cm_b2"],
               params["cm_w3"], params["cm_b3"]]

    in_specs = [pl.BlockSpec((rows_t, r), rows_map),
                pl.BlockSpec((rows_t, E), rows_map),
                pl.BlockSpec((E, r), full_map)]
    in_specs += [pl.BlockSpec(w.shape, full_map) for w in weights]

    flops = 2 * r_rows * (E * r + (2 * r) * (2 * r) + (2 * r) * r
                          + (s * r) * c_lanes + (c_lanes + 2 * r) * (2 * r)
                          + (2 * r) * (2 * r) + (2 * r) * r)
    bytes_accessed = int(cr_pad.size * cr_pad.dtype.itemsize
                         + me_pad.size * me_pad.dtype.itemsize
                         + edge_rep_b.size * edge_rep_b.dtype.itemsize
                         + sum(int(w.size) * w.dtype.itemsize for w in weights)
                         + r_rows * r * 2)

    kernel = functools.partial(_cycle_group_kernel, s=s, s_pad=s_pad)
    return pl.pallas_call(
        kernel,
        grid=grid,
        in_specs=in_specs,
        out_specs=pl.BlockSpec((rows_t, r), rows_map),
        out_shape=jax.ShapeDtypeStruct((r_rows, r), _BF16),
        compiler_params=pltpu.CompilerParams(
            dimension_semantics=("parallel",),
            vmem_limit_bytes=_VMEM_LIMIT),
        cost_estimate=pl.CostEstimate(flops=int(flops), transcendentals=0,
                                      bytes_accessed=bytes_accessed),
    )(cr_pad, me_pad, edge_rep_b, *weights)


# ------------------------- fused edge kernel -------------------------

def _edge_kernel(*refs, n_groups):
    er_ref = refs[0]
    a_ref = refs[1]
    c_refs = refs[2:2 + n_groups]
    w1_ref, b1_ref, w2_ref, b2_ref, out_ref = refs[2 + n_groups:]

    # cycle -> edge gather (1st->0th): one incidence matmul over the
    # row-concatenated per-group cycle outputs (concat stays in VMEM).
    c_all = jnp.concatenate([c[...] for c in c_refs], axis=0)            # [Rtot, r]
    c2e = jnp.dot(a_ref[...], c_all, preferred_element_type=_F32)        # [TE, r]

    # edge_mlp — channel concat folded into one wide-K (=2r) matmul.
    x = jnp.concatenate([er_ref[...], c2e.astype(_BF16)], axis=-1)
    h = _relu(jnp.dot(x, w1_ref[...], preferred_element_type=_F32) + b1_ref[...])
    out = _relu(jnp.dot(h.astype(_BF16), w2_ref[...], preferred_element_type=_F32)
                + b2_ref[...])
    out_ref[...] = out.astype(out_ref.dtype)


def _pick_row_tile(n):
    for t in (128, 64, 32, 16):
        if n >= 2 * t:
            return t
    return 8


def _edge_call(edge_rep_b, a_all, cycle_outs_pad, params):
    E, r = edge_rep_b.shape
    n_groups = len(cycle_outs_pad)
    r_tot = a_all.shape[1]

    TE = _pick_row_tile(E)
    E_pad = -(-E // TE) * TE
    if E_pad != E:                              # handle arbitrary E with zero rows
        edge_rep_b = jnp.pad(edge_rep_b, ((0, E_pad - E), (0, 0)))
        a_all = jnp.pad(a_all, ((0, E_pad - E), (0, 0)))
    grid = (E_pad // TE,)

    def rows_map(i):
        return (i, 0)

    def full_map(i):
        return (0, 0)

    weights = [params["em_w1"], params["em_b1"], params["em_w2"], params["em_b2"]]
    in_specs = [pl.BlockSpec((TE, r), rows_map),
                pl.BlockSpec((TE, r_tot), rows_map)]
    in_specs += [pl.BlockSpec(c.shape, full_map) for c in cycle_outs_pad]
    in_specs += [pl.BlockSpec(w.shape, full_map) for w in weights]

    flops = 2 * E_pad * (r_tot * r + (2 * r) * (2 * r) + (2 * r) * r)
    bytes_accessed = int(edge_rep_b.size * edge_rep_b.dtype.itemsize
                         + a_all.size * a_all.dtype.itemsize
                         + sum(int(c.size) * c.dtype.itemsize for c in cycle_outs_pad)
                         + sum(int(w.size) * w.dtype.itemsize for w in weights)
                         + E_pad * r * 2)

    kernel = functools.partial(_edge_kernel, n_groups=n_groups)
    out = pl.pallas_call(
        kernel,
        grid=grid,
        in_specs=in_specs,
        out_specs=pl.BlockSpec((TE, r), rows_map),
        out_shape=jax.ShapeDtypeStruct((E_pad, r), _BF16),
        compiler_params=pltpu.CompilerParams(
            dimension_semantics=("parallel",),
            vmem_limit_bytes=_VMEM_LIMIT),
        cost_estimate=pl.CostEstimate(flops=int(flops), transcendentals=0,
                                      bytes_accessed=bytes_accessed),
    )(edge_rep_b, a_all, *cycle_outs_pad, *weights)
    return out[:E] if E_pad != E else out


# ------------------------- parameters -------------------------

def init_edge_cycle_params(key, r, c, cycle_sizes):
    keys = iter(jax.random.split(key, 32))
    nk = lambda: next(keys)

    def W(shape, fan_in):
        return (jax.random.normal(nk(), shape, _F32) / np.sqrt(float(fan_in))).astype(_BF16)

    def B(shape):
        return 0.1 * jax.random.normal(nk(), shape, _F32)

    p = {}
    # cycle_mlp_2: Linear(2r,2r)+ReLU, Linear(2r,r)+ReLU ; concat pre-folded into W1.
    p["c2_w1"] = W((2 * r, 2 * r), 2 * r)       # input = [cycle_rep | edge2cycle]
    p["c2_b1"] = B((1, 2 * r))
    p["c2_w2"] = W((2 * r, r), 2 * r)
    p["c2_b2"] = B((1, r))
    # Autobahn(r, c*r) per cycle size: per-offset weights stacked on the contraction.
    p["aut_w"] = [W((s * r, c * r), r) for s in cycle_sizes]
    # cycle_mlp: get_mlp((c+2)r, 2r, r, 3) ; input = [within-cycle sum | local | aut].
    p["cm_w1"] = W(((c + 2) * r, 2 * r), (c + 2) * r)
    p["cm_b1"] = B((1, 2 * r))
    p["cm_w2"] = W((2 * r, 2 * r), 2 * r)
    p["cm_b2"] = B((1, 2 * r))
    p["cm_w3"] = W((2 * r, r), 2 * r)
    p["cm_b3"] = B((1, r))
    # edge_mlp: get_mlp(2r, 2r, r, 2) ; input = [edge_rep | cycle2edge].
    p["em_w1"] = W((2 * r, 2 * r), 2 * r)
    p["em_b1"] = B((1, 2 * r))
    p["em_w2"] = W((2 * r, r), 2 * r)
    p["em_b2"] = B((1, r))
    return p


# ------------------------- synthetic deterministic graph -------------------------

def build_graph(num_graphs, nodes_per_graph, edges_per_graph, cycle_sizes, cycles_per_size):
    E = num_graphs * edges_per_graph
    src = np.zeros(E, np.int64)
    dst = np.zeros(E, np.int64)
    for g in range(num_graphs):
        for i in range(edges_per_graph):
            s_n = i % nodes_per_graph
            d_n = (i * 5 + 3) % nodes_per_graph
            if d_n == s_n:
                d_n = (d_n + 1) % nodes_per_graph
            e = g * edges_per_graph + i
            src[e] = g * nodes_per_graph + s_n
            dst[e] = g * nodes_per_graph + d_n

    groups = []
    a_blocks = []
    for si, s in enumerate(cycle_sizes):
        s_pad = 8 * ((s + 7) // 8)              # pad each cycle to 8 sublanes
        n_cyc = num_graphs * cycles_per_size[si]
        me = np.zeros((n_cyc * s_pad, E), np.float32)      # edge->cycle incidence
        for g in range(num_graphs):
            for ci in range(cycles_per_size[si]):
                cyc = g * cycles_per_size[si] + ci
                base = (3 * ci + 2 * si) % nodes_per_graph
                step = 1 + si
                for j in range(s):
                    node = g * nodes_per_graph + (base + step * j) % nodes_per_graph
                    me[cyc * s_pad + j, :] = ((src == node) | (dst == node)).astype(np.float32)
        groups.append({"me": jnp.asarray(me, _BF16),
                       "s": s, "s_pad": s_pad, "n_cyc": n_cyc})
        a_blocks.append(me.T.copy())            # cycle->edge incidence (1st->0th)
    a_all = np.concatenate(a_blocks, axis=1)    # [E, sum_g n_cyc_g * s_pad_g]
    return {"groups": groups, "a_all": jnp.asarray(a_all, _BF16)}


# ------------------------- Edge_cycle forward -------------------------

def edge_cycle_forward(params, graph, edge_rep, cycles_rep):
    """Returns (edge_out, cycles_out), matching the PyTorch module's forward."""
    r = edge_rep.shape[1]
    edge_rep_b = edge_rep.astype(_BF16)         # cast activations once (bf16 I/O)

    cycles_out = []
    cycles_out_pad = []
    for gi, (cr, gd) in enumerate(zip(cycles_rep, graph["groups"])):
        s, s_pad, n_cyc = gd["s"], gd["s_pad"], gd["n_cyc"]
        cr_pad = jnp.zeros((n_cyc, s_pad, r), _BF16)
        cr_pad = cr_pad.at[:, :s, :].set(cr.reshape(n_cyc, s, r).astype(_BF16))
        cr_pad = cr_pad.reshape(n_cyc * s_pad, r)
        out_pad = _cycle_group_call(cr_pad, edge_rep_b, gd["me"],
                                    params["aut_w"][gi], params, s=s, s_pad=s_pad)
        cycles_out_pad.append(out_pad)          # stays padded for the edge kernel
        cycles_out.append(
            out_pad.reshape(n_cyc, s_pad, r)[:, :s, :].reshape(n_cyc * s, r))

    edge_out = _edge_call(edge_rep_b, graph["a_all"], cycles_out_pad, params)
    return edge_out, cycles_out


# ------------------------- main -------------------------

if __name__ == "__main__":
    rep_dim = 128                 # lane-dense channel axis (multiple of 128)
    num_channels = 4
    cycle_sizes = [5, 6]
    cycles_per_size = [4, 2]      # per graph
    num_graphs = 2
    nodes_per_graph = 16
    edges_per_graph = 24

    key = jax.random.PRNGKey(0)
    kp, ke, kc0, kc1 = jax.random.split(key, 4)

    params = init_edge_cycle_params(kp, rep_dim, num_channels, cycle_sizes)
    graph = build_graph(num_graphs, nodes_per_graph, edges_per_graph,
                        cycle_sizes, cycles_per_size)

    E = num_graphs * edges_per_graph
    edge_rep = jax.random.normal(ke, (E, rep_dim), jnp.float32)
    cycles_rep = []
    for gd, kcyc in zip(graph["groups"], (kc0, kc1)):
        R = gd["n_cyc"] * gd["s"]
        cycles_rep.append(jax.random.normal(kcyc, (R, rep_dim), jnp.float32))

    fwd = jax.jit(functools.partial(edge_cycle_forward, params, graph))
    edge_out, cycles_out = jax.block_until_ready(fwd(edge_rep, cycles_rep))

    assert edge_out.shape == (E, rep_dim)
    assert bool(jnp.all(jnp.isfinite(edge_out.astype(jnp.float32))))
    for cr_in, cr_out in zip(cycles_rep, cycles_out):
        assert cr_out.shape == cr_in.shape
        assert bool(jnp.all(jnp.isfinite(cr_out.astype(jnp.float32))))
    print("KERNEL_OK")
</pallas_src>

<mosaic_0001>
module attributes {stable_mosaic.version = 11 : i64} {
  func.func @_cycle_group_kernel(%arg0: i32, %arg1: memref<32x128xbf16, #tpu.memory_space<vmem>>, %arg2: memref<32x48xbf16, #tpu.memory_space<vmem>>, %arg3: memref<48x128xbf16, #tpu.memory_space<vmem>>, %arg4: memref<256x256xbf16, #tpu.memory_space<vmem>>, %arg5: memref<1x256xf32, #tpu.memory_space<vmem>>, %arg6: memref<256x128xbf16, #tpu.memory_space<vmem>>, %arg7: memref<1x128xf32, #tpu.memory_space<vmem>>, %arg8: memref<640x512xbf16, #tpu.memory_space<vmem>>, %arg9: memref<768x256xbf16, #tpu.memory_space<vmem>>, %arg10: memref<1x256xf32, #tpu.memory_space<vmem>>, %arg11: memref<256x256xbf16, #tpu.memory_space<vmem>>, %arg12: memref<1x256xf32, #tpu.memory_space<vmem>>, %arg13: memref<256x128xbf16, #tpu.memory_space<vmem>>, %arg14: memref<1x128xf32, #tpu.memory_space<vmem>>, %arg15: memref<32x128xbf16, #tpu.memory_space<vmem>>) attributes {dimension_semantics = [#tpu.dimension_semantics<parallel>], iteration_bounds = array<i64: 2>, scalar_prefetch = 0 : i64, scratch_operands = 0 : i64, tpu.core_type = #tpu.core_type<tc>, window_params = [{transform_indices = @transform_0, window_bounds = array<i64: 32, 128>}, {transform_indices = @transform_1, window_bounds = array<i64: 32, 48>}, {pipeline_mode = #tpu.pipeline_mode<synchronous>, transform_indices = @transform_2, window_bounds = array<i64: 48, 128>}, {pipeline_mode = #tpu.pipeline_mode<synchronous>, transform_indices = @transform_3, window_bounds = array<i64: 256, 256>}, {pipeline_mode = #tpu.pipeline_mode<synchronous>, transform_indices = @transform_4, window_bounds = array<i64: 1, 256>}, {pipeline_mode = #tpu.pipeline_mode<synchronous>, transform_indices = @transform_5, window_bounds = array<i64: 256, 128>}, {pipeline_mode = #tpu.pipeline_mode<synchronous>, transform_indices = @transform_6, window_bounds = array<i64: 1, 128>}, {pipeline_mode = #tpu.pipeline_mode<synchronous>, transform_indices = @transform_7, window_bounds = array<i64: 640, 512>}, {pipeline_mode = #tpu.pipeline_mode<synchronous>, transform_indices = @transform_8, window_bounds = array<i64: 768, 256>}, {pipeline_mode = #tpu.pipeline_mode<synchronous>, transform_indices = @transform_9, window_bounds = array<i64: 1, 256>}, {pipeline_mode = #tpu.pipeline_mode<synchronous>, transform_indices = @transform_10, window_bounds = array<i64: 256, 256>}, {pipeline_mode = #tpu.pipeline_mode<synchronous>, transform_indices = @transform_11, window_bounds = array<i64: 1, 256>}, {pipeline_mode = #tpu.pipeline_mode<synchronous>, transform_indices = @transform_12, window_bounds = array<i64: 256, 128>}, {pipeline_mode = #tpu.pipeline_mode<synchronous>, transform_indices = @transform_13, window_bounds = array<i64: 1, 128>}, {transform_indices = @transform_14, window_bounds = array<i64: 32, 128>}]} {
    %c0 = arith.constant 0 : index
    %c0_0 = arith.constant 0 : index
    %0 = vector.load %arg1[%c0, %c0_0] : memref<32x128xbf16, #tpu.memory_space<vmem>>, vector<32x128xbf16>
    %c0_1 = arith.constant 0 : index
    %c0_2 = arith.constant 0 : index
    %1 = vector.load %arg3[%c0_1, %c0_2] : memref<48x128xbf16, #tpu.memory_space<vmem>>, vector<48x128xbf16>
    %c0_3 = arith.constant 0 : index
    %c0_4 = arith.constant 0 : index
    %2 = vector.load %arg2[%c0_3, %c0_4] : memref<32x48xbf16, #tpu.memory_space<vmem>>, vector<32x48xbf16>
    %cst = arith.constant dense<0.000000e+00> : vector<32x128xf32>
    %3 = tpu.matmul %2, %1, %cst {dimension_numbers = #tpu.dot_dimension_numbers<[1], [0], [0], [1], [0, 0, 1, 1], [], []>} : vector<32x48xbf16>, vector<48x128xbf16>, vector<32x128xf32> -> vector<32x128xf32>
    %4 = arith.truncf %3 : vector<32x128xf32> to vector<32x128xbf16>
    %5 = tpu.concatenate %0, %4 in 1 : vector<32x128xbf16>, vector<32x128xbf16> -> vector<32x256xbf16>
    %c0_5 = arith.constant 0 : index
    %c0_6 = arith.constant 0 : index
    %6 = vector.load %arg4[%c0_5, %c0_6] : memref<256x256xbf16, #tpu.memory_space<vmem>>, vector<256x256xbf16>
    %cst_7 = arith.constant dense<0.000000e+00> : vector<32x256xf32>
    %7 = tpu.matmul %5, %6, %cst_7 {dimension_numbers = #tpu.dot_dimension_numbers<[1], [0], [0], [1], [0, 0, 1, 1], [], []>} : vector<32x256xbf16>, vector<256x256xbf16>, vector<32x256xf32> -> vector<32x256xf32>
    %c0_8 = arith.constant 0 : index
    %c0_9 = arith.constant 0 : index
    %8 = vector.load %arg5[%c0_8, %c0_9] : memref<1x256xf32, #tpu.memory_space<vmem>>, vector<1x256xf32>
    %9 = vector.broadcast %8 : vector<1x256xf32> to vector<32x256xf32>
    %10 = arith.addf %7, %9 : vector<32x256xf32>
    %cst_10 = arith.constant 0.000000e+00 : f32
    %11 = vector.broadcast %cst_10 : f32 to vector<32x256xf32>
    %12 = arith.maximumf %10, %11 : vector<32x256xf32>
    %13 = arith.truncf %12 : vector<32x256xf32> to vector<32x256xbf16>
    %c0_11 = arith.constant 0 : index
    %c0_12 = arith.constant 0 : index
    %14 = vector.load %arg6[%c0_11, %c0_12] : memref<256x128xbf16, #tpu.memory_space<vmem>>, vector<256x128xbf16>
    %cst_13 = arith.constant dense<0.000000e+00> : vector<32x128xf32>
    %15 = tpu.matmul %13, %14, %cst_13 {dimension_numbers = #tpu.dot_dimension_numbers<[1], [0], [0], [1], [0, 0, 1, 1], [], []>} : vector<32x256xbf16>, vector<256x128xbf16>, vector<32x128xf32> -> vector<32x128xf32>
    %c0_14 = arith.constant 0 : index
    %c0_15 = arith.constant 0 : index
    %16 = vector.load %arg7[%c0_14, %c0_15] : memref<1x128xf32, #tpu.memory_space<vmem>>, vector<1x128xf32>
    %17 = vector.broadcast %16 : vector<1x128xf32> to vector<32x128xf32>
    %18 = arith.addf %15, %17 : vector<32x128xf32>
    %cst_16 = arith.constant 0.000000e+00 : f32
    %19 = vector.broadcast %cst_16 : f32 to vector<32x128xf32>
    %20 = arith.maximumf %18, %19 : vector<32x128xf32>
    %21 = tpu.iota {dimensions = array<i32: 0>} : vector<32x1xi32>
    %c8_i32 = arith.constant 8 : i32
    %c0_i32 = arith.constant 0 : i32
    %22 = arith.cmpi eq, %c8_i32, %c0_i32 : i32
    %c1_i32 = arith.constant 1 : i32
    %23 = arith.select %22, %c1_i32, %c8_i32 : i32
    %24 = vector.broadcast %23 : i32 to vector<32x1xi32>
    %25 = arith.remsi %21, %24 : vector<32x1xi32>
    %c0_i32_17 = arith.constant 0 : i32
    %26 = vector.broadcast %c0_i32_17 : i32 to vector<32x1xi32>
    %27 = arith.cmpi ne, %25, %26 : vector<32x1xi32>
    %c0_i32_18 = arith.constant 0 : i32
    %28 = vector.broadcast %c0_i32_18 : i32 to vector<32x1xi32>
    %29 = arith.cmpi slt, %25, %28 : vector<32x1xi32>
    %c0_i32_19 = arith.constant 0 : i32
    %30 = arith.cmpi slt, %23, %c0_i32_19 : i32
    %31 = vector.broadcast %30 : i1 to vector<32x1xi1>
    %32 = vector.broadcast %31 : vector<32x1xi1> to vector<32x1xi1>
    %33 = arith.xori %29, %32 : vector<32x1xi1>
    %34 = arith.andi %33, %27 : vector<32x1xi1>
    %35 = vector.broadcast %23 : i32 to vector<32x1xi32>
    %36 = arith.addi %25, %35 : vector<32x1xi32>
    %37 = arith.select %34, %36, %25 : vector<32x1xi1>, vector<32x1xi32>
    %c31_i32 = arith.constant 31 : i32
    %38 = tpu.dynamic_rotate %20 by %c31_i32 dim 0 : vector<32x128xf32>, i32 -> vector<32x128xf32>
    %c4_i32 = arith.constant 4 : i32
    %39 = tpu.dynamic_rotate %20 by %c4_i32 dim 0 : vector<32x128xf32>, i32 -> vector<32x128xf32>
    %c4_i32_20 = arith.constant 4 : i32
    %40 = vector.broadcast %c4_i32_20 : i32 to vector<32x1xi32>
    %41 = arith.cmpi sge, %37, %40 : vector<32x1xi32>
    %42 = vector.shape_cast %41 : vector<32x1xi1> to vector<32x1xi1>
    %43 = vector.broadcast %42 : vector<32x1xi1> to vector<32x128xi1>
    %44 = arith.select %43, %39, %38 : vector<32x128xi1>, vector<32x128xf32>
    %c30_i32 = arith.constant 30 : i32
    %45 = tpu.dynamic_rotate %20 by %c30_i32 dim 0 : vector<32x128xf32>, i32 -> vector<32x128xf32>
    %c3_i32 = arith.constant 3 : i32
    %46 = tpu.dynamic_rotate %20 by %c3_i32 dim 0 : vector<32x128xf32>, i32 -> vector<32x128xf32>
    %c3_i32_21 = arith.constant 3 : i32
    %47 = vector.broadcast %c3_i32_21 : i32 to vector<32x1xi32>
    %48 = arith.cmpi sge, %37, %47 : vector<32x1xi32>
    %49 = vector.shape_cast %48 : vector<32x1xi1> to vector<32x1xi1>
    %50 = vector.broadcast %49 : vector<32x1xi1> to vector<32x128xi1>
    %51 = arith.select %50, %46, %45 : vector<32x128xi1>, vector<32x128xf32>
    %c29_i32 = arith.constant 29 : i32
    %52 = tpu.dynamic_rotate %20 by %c29_i32 dim 0 : vector<32x128xf32>, i32 -> vector<32x128xf32>
    %c2_i32 = arith.constant 2 : i32
    %53 = tpu.dynamic_rotate %20 by %c2_i32 dim 0 : vector<32x128xf32>, i32 -> vector<32x128xf32>
    %c2_i32_22 = arith.constant 2 : i32
    %54 = vector.broadcast %c2_i32_22 : i32 to vector<32x1xi32>
    %55 = arith.cmpi sge, %37, %54 : vector<32x1xi32>
    %56 = vector.shape_cast %55 : vector<32x1xi1> to vector<32x1xi1>
    %57 = vector.broadcast %56 : vector<32x1xi1> to vector<32x128xi1>
    %58 = arith.select %57, %53, %52 : vector<32x128xi1>, vector<32x128xf32>
    %c28_i32 = arith.constant 28 : i32
    %59 = tpu.dynamic_rotate %20 by %c28_i32 dim 0 : vector<32x128xf32>, i32 -> vector<32x128xf32>
    %c1_i32_23 = arith.constant 1 : i32
    %60 = tpu.dynamic_rotate %20 by %c1_i32_23 dim 0 : vector<32x128xf32>, i32 -> vector<32x128xf32>
    %c1_i32_24 = arith.constant 1 : i32
    %61 = vector.broadcast %c1_i32_24 : i32 to vector<32x1xi32>
    %62 = arith.cmpi sge, %37, %61 : vector<32x1xi32>
    %63 = vector.shape_cast %62 : vector<32x1xi1> to vector<32x1xi1>
    %64 = vector.broadcast %63 : vector<32x1xi1> to vector<32x128xi1>
    %65 = arith.select %64, %60, %59 : vector<32x128xi1>, vector<32x128xf32>
    %66 = arith.addf %20, %44 : vector<32x128xf32>
    %67 = arith.addf %66, %51 : vector<32x128xf32>
    %68 = arith.addf %67, %58 : vector<32x128xf32>
    %69 = arith.addf %68, %65 : vector<32x128xf32>
    %70 = tpu.concatenate %20, %44, %51, %58, %65 in 1 : vector<32x128xf32>, vector<32x128xf32>, vector<32x128xf32>, vector<32x128xf32>, vector<32x128xf32> -> vector<32x640xf32>
    %71 = arith.truncf %70 : vector<32x640xf32> to vector<32x640xbf16>
    %c0_25 = arith.constant 0 : index
    %c0_26 = arith.constant 0 : index
    %72 = vector.load %arg8[%c0_25, %c0_26] : memref<640x512xbf16, #tpu.memory_space<vmem>>, vector<640x512xbf16>
    %cst_27 = arith.constant dense<0.000000e+00> : vector<32x512xf32>
    %73 = tpu.matmul %71, %72, %cst_27 {dimension_numbers = #tpu.dot_dimension_numbers<[1], [0], [0], [1], [0, 0, 1, 1], [], []>} : vector<32x640xbf16>, vector<640x512xbf16>, vector<32x512xf32> -> vector<32x512xf32>
    %74 = arith.truncf %69 : vector<32x128xf32> to vector<32x128xbf16>
    %75 = arith.truncf %20 : vector<32x128xf32> to vector<32x128xbf16>
    %76 = arith.truncf %73 : vector<32x512xf32> to vector<32x512xbf16>
    %77 = tpu.concatenate %74, %75, %76 in 1 : vector<32x128xbf16>, vector<32x128xbf16>, vector<32x512xbf16> -> vector<32x768xbf16>
    %c0_28 = arith.constant 0 : index
    %c0_29 = arith.constant 0 : index
    %78 = vector.load %arg9[%c0_28, %c0_29] : memref<768x256xbf16, #tpu.memory_space<vmem>>, vector<768x256xbf16>
    %cst_30 = arith.constant dense<0.000000e+00> : vector<32x256xf32>
    %79 = tpu.matmul %77, %78, %cst_30 {dimension_numbers = #tpu.dot_dimension_numbers<[1], [0], [0], [1], [0, 0, 1, 1], [], []>} : vector<32x768xbf16>, vector<768x256xbf16>, vector<32x256xf32> -> vector<32x256xf32>
    %c0_31 = arith.constant 0 : index
    %c0_32 = arith.constant 0 : index
    %80 = vector.load %arg10[%c0_31, %c0_32] : memref<1x256xf32, #tpu.memory_space<vmem>>, vector<1x256xf32>
    %81 = vector.broadcast %80 : vector<1x256xf32> to vector<32x256xf32>
    %82 = arith.addf %79, %81 : vector<32x256xf32>
    %cst_33 = arith.constant 0.000000e+00 : f32
    %83 = vector.broadcast %cst_33 : f32 to vector<32x256xf32>
    %84 = arith.maximumf %82, %83 : vector<32x256xf32>
    %85 = arith.truncf %84 : vector<32x256xf32> to vector<32x256xbf16>
    %c0_34 = arith.constant 0 : index
    %c0_35 = arith.constant 0 : index
    %86 = vector.load %arg11[%c0_34, %c0_35] : memref<256x256xbf16, #tpu.memory_space<vmem>>, vector<256x256xbf16>
    %cst_36 = arith.constant dense<0.000000e+00> : vector<32x256xf32>
    %87 = tpu.matmul %85, %86, %cst_36 {dimension_numbers = #tpu.dot_dimension_numbers<[1], [0], [0], [1], [0, 0, 1, 1], [], []>} : vector<32x256xbf16>, vector<256x256xbf16>, vector<32x256xf32> -> vector<32x256xf32>
    %c0_37 = arith.constant 0 : index
    %c0_38 = arith.constant 0 : index
    %88 = vector.load %arg12[%c0_37, %c0_38] : memref<1x256xf32, #tpu.memory_space<vmem>>, vector<1x256xf32>
    %89 = vector.broadcast %88 : vector<1x256xf32> to vector<32x256xf32>
    %90 = arith.addf %87, %89 : vector<32x256xf32>
    %cst_39 = arith.constant 0.000000e+00 : f32
    %91 = vector.broadcast %cst_39 : f32 to vector<32x256xf32>
    %92 = arith.maximumf %90, %91 : vector<32x256xf32>
    %93 = arith.truncf %92 : vector<32x256xf32> to vector<32x256xbf16>
    %c0_40 = arith.constant 0 : index
    %c0_41 = arith.constant 0 : index
    %94 = vector.load %arg13[%c0_40, %c0_41] : memref<256x128xbf16, #tpu.memory_space<vmem>>, vector<256x128xbf16>
    %cst_42 = arith.constant dense<0.000000e+00> : vector<32x128xf32>
    %95 = tpu.matmul %93, %94, %cst_42 {dimension_numbers = #tpu.dot_dimension_numbers<[1], [0], [0], [1], [0, 0, 1, 1], [], []>} : vector<32x256xbf16>, vector<256x128xbf16>, vector<32x128xf32> -> vector<32x128xf32>
    %c0_43 = arith.constant 0 : index
    %c0_44 = arith.constant 0 : index
    %96 = vector.load %arg14[%c0_43, %c0_44] : memref<1x128xf32, #tpu.memory_space<vmem>>, vector<1x128xf32>
    %97 = vector.broadcast %96 : vector<1x128xf32> to vector<32x128xf32>
    %98 = arith.addf %95, %97 : vector<32x128xf32>
    %cst_45 = arith.constant 0.000000e+00 : f32
    %99 = vector.broadcast %cst_45 : f32 to vector<32x128xf32>
    %100 = arith.maximumf %98, %99 : vector<32x128xf32>
    %101 = arith.truncf %100 : vector<32x128xf32> to vector<32x128xbf16>
    %c0_46 = arith.constant 0 : index
    %c0_47 = arith.constant 0 : index
    %102 = vector.load %arg15[%c0_46, %c0_47] : memref<32x128xbf16, #tpu.memory_space<vmem>>, vector<32x128xbf16>
    tpu.vector_store %arg15[%c0_46, %c0_47], %101 {strides = array<i32>} : memref<32x128xbf16, #tpu.memory_space<vmem>>, vector<32x128xbf16>,
    return
  }
  func.func @transform_0(%arg0: i32) -> (i32, i32) {
    %c0_i32 = arith.constant 0 : i32
    %c0_i32_0 = arith.constant 0 : i32
    return %arg0, %c0_i32 : i32, i32
  }
  func.func @transform_1(%arg0: i32) -> (i32, i32) {
    %c0_i32 = arith.constant 0 : i32
    %c0_i32_0 = arith.constant 0 : i32
    return %arg0, %c0_i32 : i32, i32
  }
  func.func @transform_2(%arg0: i32) -> (i32, i32) {
    %c0_i32 = arith.constant 0 : i32
    %c0_i32_0 = arith.constant 0 : i32
    %c0_i32_1 = arith.constant 0 : i32
    return %c0_i32, %c0_i32_0 : i32, i32
  }
  func.func @transform_3(%arg0: i32) -> (i32, i32) {
    %c0_i32 = arith.constant 0 : i32
    %c0_i32_0 = arith.constant 0 : i32
    %c0_i32_1 = arith.constant 0 : i32
    return %c0_i32, %c0_i32_0 : i32, i32
  }
  func.func @transform_4(%arg0: i32) -> (i32, i32) {
    %c0_i32 = arith.constant 0 : i32
    %c0_i32_0 = arith.constant 0 : i32
    %c0_i32_1 = arith.constant 0 : i32
    return %c0_i32, %c0_i32_0 : i32, i32
  }
  func.func @transform_5(%arg0: i32) -> (i32, i32) {
    %c0_i32 = arith.constant 0 : i32
    %c0_i32_0 = arith.constant 0 : i32
    %c0_i32_1 = arith.constant 0 : i32
    return %c0_i32, %c0_i32_0 : i32, i32
  }
  func.func @transform_6(%arg0: i32) -> (i32, i32) {
    %c0_i32 = arith.constant 0 : i32
    %c0_i32_0 = arith.constant 0 : i32
    %c0_i32_1 = arith.constant 0 : i32
    return %c0_i32, %c0_i32_0 : i32, i32
  }
  func.func @transform_7(%arg0: i32) -> (i32, i32) {
    %c0_i32 = arith.constant 0 : i32
    %c0_i32_0 = arith.constant 0 : i32
    %c0_i32_1 = arith.constant 0 : i32
    return %c0_i32, %c0_i32_0 : i32, i32
  }
  func.func @transform_8(%arg0: i32) -> (i32, i32) {
    %c0_i32 = arith.constant 0 : i32
    %c0_i32_0 = arith.constant 0 : i32
    %c0_i32_1 = arith.constant 0 : i32
    return %c0_i32, %c0_i32_0 : i32, i32
  }
  func.func @transform_9(%arg0: i32) -> (i32, i32) {
    %c0_i32 = arith.constant 0 : i32
    %c0_i32_0 = arith.constant 0 : i32
    %c0_i32_1 = arith.constant 0 : i32
    return %c0_i32, %c0_i32_0 : i32, i32
  }
  func.func @transform_10(%arg0: i32) -> (i32, i32) {
    %c0_i32 = arith.constant 0 : i32
    %c0_i32_0 = arith.constant 0 : i32
    %c0_i32_1 = arith.constant 0 : i32
    return %c0_i32, %c0_i32_0 : i32, i32
  }
  func.func @transform_11(%arg0: i32) -> (i32, i32) {
    %c0_i32 = arith.constant 0 : i32
    %c0_i32_0 = arith.constant 0 : i32
    %c0_i32_1 = arith.constant 0 : i32
    return %c0_i32, %c0_i32_0 : i32, i32
  }
  func.func @transform_12(%arg0: i32) -> (i32, i32) {
    %c0_i32 = arith.constant 0 : i32
    %c0_i32_0 = arith.constant 0 : i32
    %c0_i32_1 = arith.constant 0 : i32
    return %c0_i32, %c0_i32_0 : i32, i32
  }
  func.func @transform_13(%arg0: i32) -> (i32, i32) {
    %c0_i32 = arith.constant 0 : i32
    %c0_i32_0 = arith.constant 0 : i32
    %c0_i32_1 = arith.constant 0 : i32
    return %c0_i32, %c0_i32_0 : i32, i32
  }
  func.func @transform_14(%arg0: i32) -> (i32, i32) {
    %c0_i32 = arith.constant 0 : i32
    %c0_i32_0 = arith.constant 0 : i32
    return %arg0, %c0_i32 : i32, i32
  }
}

module attributes {stable_mosaic.version = 11 : i64} {
  func.func @_edge_kernel(%arg0: i32, %arg1: memref<16x128xbf16, #tpu.memory_space<vmem>>, %arg2: memref<16x96xbf16, #tpu.memory_space<vmem>>, %arg3: memref<64x128xbf16, #tpu.memory_space<vmem>>, %arg4: memref<32x128xbf16, #tpu.memory_space<vmem>>, %arg5: memref<256x256xbf16, #tpu.memory_space<vmem>>, %arg6: memref<1x256xf32, #tpu.memory_space<vmem>>, %arg7: memref<256x128xbf16, #tpu.memory_space<vmem>>, %arg8: memref<1x128xf32, #tpu.memory_space<vmem>>, %arg9: memref<16x128xbf16, #tpu.memory_space<vmem>>) attributes {dimension_semantics = [#tpu.dimension_semantics<parallel>], iteration_bounds = array<i64: 3>, scalar_prefetch = 0 : i64, scratch_operands = 0 : i64, tpu.core_type = #tpu.core_type<tc>, window_params = [{transform_indices = @transform_0, window_bounds = array<i64: 16, 128>}, {transform_indices = @transform_1, window_bounds = array<i64: 16, 96>}, {pipeline_mode = #tpu.pipeline_mode<synchronous>, transform_indices = @transform_2, window_bounds = array<i64: 64, 128>}, {pipeline_mode = #tpu.pipeline_mode<synchronous>, transform_indices = @transform_3, window_bounds = array<i64: 32, 128>}, {pipeline_mode = #tpu.pipeline_mode<synchronous>, transform_indices = @transform_4, window_bounds = array<i64: 256, 256>}, {pipeline_mode = #tpu.pipeline_mode<synchronous>, transform_indices = @transform_5, window_bounds = array<i64: 1, 256>}, {pipeline_mode = #tpu.pipeline_mode<synchronous>, transform_indices = @transform_6, window_bounds = array<i64: 256, 128>}, {pipeline_mode = #tpu.pipeline_mode<synchronous>, transform_indices = @transform_7, window_bounds = array<i64: 1, 128>}, {transform_indices = @transform_8, window_bounds = array<i64: 16, 128>}]} {
    %c0 = arith.constant 0 : index
    %c0_0 = arith.constant 0 : index
    %0 = vector.load %arg3[%c0, %c0_0] : memref<64x128xbf16, #tpu.memory_space<vmem>>, vector<64x128xbf16>
    %c0_1 = arith.constant 0 : index
    %c0_2 = arith.constant 0 : index
    %1 = vector.load %arg4[%c0_1, %c0_2] : memref<32x128xbf16, #tpu.memory_space<vmem>>, vector<32x128xbf16>
    %2 = tpu.concatenate %0, %1 in 0 : vector<64x128xbf16>, vector<32x128xbf16> -> vector<96x128xbf16>
    %c0_3 = arith.constant 0 : index
    %c0_4 = arith.constant 0 : index
    %3 = vector.load %arg2[%c0_3, %c0_4] : memref<16x96xbf16, #tpu.memory_space<vmem>>, vector<16x96xbf16>
    %cst = arith.constant dense<0.000000e+00> : vector<16x128xf32>
    %4 = tpu.matmul %3, %2, %cst {dimension_numbers = #tpu.dot_dimension_numbers<[1], [0], [0], [1], [0, 0, 1, 1], [], []>} : vector<16x96xbf16>, vector<96x128xbf16>, vector<16x128xf32> -> vector<16x128xf32>
    %c0_5 = arith.constant 0 : index
    %c0_6 = arith.constant 0 : index
    %5 = vector.load %arg1[%c0_5, %c0_6] : memref<16x128xbf16, #tpu.memory_space<vmem>>, vector<16x128xbf16>
    %6 = arith.truncf %4 : vector<16x128xf32> to vector<16x128xbf16>
    %7 = tpu.concatenate %5, %6 in 1 : vector<16x128xbf16>, vector<16x128xbf16> -> vector<16x256xbf16>
    %c0_7 = arith.constant 0 : index
    %c0_8 = arith.constant 0 : index
    %8 = vector.load %arg5[%c0_7, %c0_8] : memref<256x256xbf16, #tpu.memory_space<vmem>>, vector<256x256xbf16>
    %cst_9 = arith.constant dense<0.000000e+00> : vector<16x256xf32>
    %9 = tpu.matmul %7, %8, %cst_9 {dimension_numbers = #tpu.dot_dimension_numbers<[1], [0], [0], [1], [0, 0, 1, 1], [], []>} : vector<16x256xbf16>, vector<256x256xbf16>, vector<16x256xf32> -> vector<16x256xf32>
    %c0_10 = arith.constant 0 : index
    %c0_11 = arith.constant 0 : index
    %10 = vector.load %arg6[%c0_10, %c0_11] : memref<1x256xf32, #tpu.memory_space<vmem>>, vector<1x256xf32>
    %11 = vector.broadcast %10 : vector<1x256xf32> to vector<16x256xf32>
    %12 = arith.addf %9, %11 : vector<16x256xf32>
    %cst_12 = arith.constant 0.000000e+00 : f32
    %13 = vector.broadcast %cst_12 : f32 to vector<16x256xf32>
    %14 = arith.maximumf %12, %13 : vector<16x256xf32>
    %15 = arith.truncf %14 : vector<16x256xf32> to vector<16x256xbf16>
    %c0_13 = arith.constant 0 : index
    %c0_14 = arith.constant 0 : index
    %16 = vector.load %arg7[%c0_13, %c0_14] : memref<256x128xbf16, #tpu.memory_space<vmem>>, vector<256x128xbf16>
    %cst_15 = arith.constant dense<0.000000e+00> : vector<16x128xf32>
    %17 = tpu.matmul %15, %16, %cst_15 {dimension_numbers = #tpu.dot_dimension_numbers<[1], [0], [0], [1], [0, 0, 1, 1], [], []>} : vector<16x256xbf16>, vector<256x128xbf16>, vector<16x128xf32> -> vector<16x128xf32>
    %c0_16 = arith.constant 0 : index
    %c0_17 = arith.constant 0 : index
    %18 = vector.load %arg8[%c0_16, %c0_17] : memref<1x128xf32, #tpu.memory_space<vmem>>, vector<1x128xf32>
    %19 = vector.broadcast %18 : vector<1x128xf32> to vector<16x128xf32>
    %20 = arith.addf %17, %19 : vector<16x128xf32>
    %cst_18 = arith.constant 0.000000e+00 : f32
    %21 = vector.broadcast %cst_18 : f32 to vector<16x128xf32>
    %22 = arith.maximumf %20, %21 : vector<16x128xf32>
    %23 = arith.truncf %22 : vector<16x128xf32> to vector<16x128xbf16>
    %c0_19 = arith.constant 0 : index
    %c0_20 = arith.constant 0 : index
    %24 = vector.load %arg9[%c0_19, %c0_20] : memref<16x128xbf16, #tpu.memory_space<vmem>>, vector<16x128xbf16>
    tpu.vector_store %arg9[%c0_19, %c0_20], %23 {strides = array<i32>} : memref<16x128xbf16, #tpu.memory_space<vmem>>, vector<16x128xbf16>,
    return
  }
  func.func @transform_0(%arg0: i32) -> (i32, i32) {
    %c0_i32 = arith.constant 0 : i32
    %c0_i32_0 = arith.constant 0 : i32
    return %arg0, %c0_i32 : i32, i32
  }
  func.func @transform_1(%arg0: i32) -> (i32, i32) {
    %c0_i32 = arith.constant 0 : i32
    %c0_i32_0 = arith.constant 0 : i32
    return %arg0, %c0_i32 : i32, i32
  }
  func.func @transform_2(%arg0: i32) -> (i32, i32) {
    %c0_i32 = arith.constant 0 : i32
    %c0_i32_0 = arith.constant 0 : i32
    %c0_i32_1 = arith.constant 0 : i32
    return %c0_i32, %c0_i32_0 : i32, i32
  }
  func.func @transform_3(%arg0: i32) -> (i32, i32) {
    %c0_i32 = arith.constant 0 : i32
    %c0_i32_0 = arith.constant 0 : i32
    %c0_i32_1 = arith.constant 0 : i32
    return %c0_i32, %c0_i32_0 : i32, i32
  }
  func.func @transform_4(%arg0: i32) -> (i32, i32) {
    %c0_i32 = arith.constant 0 : i32
    %c0_i32_0 = arith.constant 0 : i32
    %c0_i32_1 = arith.constant 0 : i32
    return %c0_i32, %c0_i32_0 : i32, i32
  }
  func.func @transform_5(%arg0: i32) -> (i32, i32) {
    %c0_i32 = arith.constant 0 : i32
    %c0_i32_0 = arith.constant 0 : i32
    %c0_i32_1 = arith.constant 0 : i32
    return %c0_i32, %c0_i32_0 : i32, i32
  }
  func.func @transform_6(%arg0: i32) -> (i32, i32) {
    %c0_i32 = arith.constant 0 : i32
    %c0_i32_0 = arith.constant 0 : i32
    %c0_i32_1 = arith.constant 0 : i32
    return %c0_i32, %c0_i32_0 : i32, i32
  }
  func.func @transform_7(%arg0: i32) -> (i32, i32) {
    %c0_i32 = arith.constant 0 : i32
    %c0_i32_0 = arith.constant 0 : i32
    %c0_i32_1 = arith.constant 0 : i32
    return %c0_i32, %c0_i32_0 : i32, i32
  }
  func.func @transform_8(%arg0: i32) -> (i32, i32) {
    %c0_i32 = arith.constant 0 : i32
    %c0_i32_0 = arith.constant 0 : i32
    return %arg0, %c0_i32 : i32, i32
  }
}

module attributes {stable_mosaic.version = 11 : i64} {
  func.func @_cycle_group_kernel(%arg0: i32, %arg1: memref<16x128xbf16, #tpu.memory_space<vmem>>, %arg2: memref<16x48xbf16, #tpu.memory_space<vmem>>, %arg3: memref<48x128xbf16, #tpu.memory_space<vmem>>, %arg4: memref<256x256xbf16, #tpu.memory_space<vmem>>, %arg5: memref<1x256xf32, #tpu.memory_space<vmem>>, %arg6: memref<256x128xbf16, #tpu.memory_space<vmem>>, %arg7: memref<1x128xf32, #tpu.memory_space<vmem>>, %arg8: memref<768x512xbf16, #tpu.memory_space<vmem>>, %arg9: memref<768x256xbf16, #tpu.memory_space<vmem>>, %arg10: memref<1x256xf32, #tpu.memory_space<vmem>>, %arg11: memref<256x256xbf16, #tpu.memory_space<vmem>>, %arg12: memref<1x256xf32, #tpu.memory_space<vmem>>, %arg13: memref<256x128xbf16, #tpu.memory_space<vmem>>, %arg14: memref<1x128xf32, #tpu.memory_space<vmem>>, %arg15: memref<16x128xbf16, #tpu.memory_space<vmem>>) attributes {dimension_semantics = [#tpu.dimension_semantics<parallel>], iteration_bounds = array<i64: 2>, scalar_prefetch = 0 : i64, scratch_operands = 0 : i64, tpu.core_type = #tpu.core_type<tc>, window_params = [{transform_indices = @transform_0, window_bounds = array<i64: 16, 128>}, {transform_indices = @transform_1, window_bounds = array<i64: 16, 48>}, {pipeline_mode = #tpu.pipeline_mode<synchronous>, transform_indices = @transform_2, window_bounds = array<i64: 48, 128>}, {pipeline_mode = #tpu.pipeline_mode<synchronous>, transform_indices = @transform_3, window_bounds = array<i64: 256, 256>}, {pipeline_mode = #tpu.pipeline_mode<synchronous>, transform_indices = @transform_4, window_bounds = array<i64: 1, 256>}, {pipeline_mode = #tpu.pipeline_mode<synchronous>, transform_indices = @transform_5, window_bounds = array<i64: 256, 128>}, {pipeline_mode = #tpu.pipeline_mode<synchronous>, transform_indices = @transform_6, window_bounds = array<i64: 1, 128>}, {pipeline_mode = #tpu.pipeline_mode<synchronous>, transform_indices = @transform_7, window_bounds = array<i64: 768, 512>}, {pipeline_mode = #tpu.pipeline_mode<synchronous>, transform_indices = @transform_8, window_bounds = array<i64: 768, 256>}, {pipeline_mode = #tpu.pipeline_mode<synchronous>, transform_indices = @transform_9, window_bounds = array<i64: 1, 256>}, {pipeline_mode = #tpu.pipeline_mode<synchronous>, transform_indices = @transform_10, window_bounds = array<i64: 256, 256>}, {pipeline_mode = #tpu.pipeline_mode<synchronous>, transform_indices = @transform_11, window_bounds = array<i64: 1, 256>}, {pipeline_mode = #tpu.pipeline_mode<synchronous>, transform_indices = @transform_12, window_bounds = array<i64: 256, 128>}, {pipeline_mode = #tpu.pipeline_mode<synchronous>, transform_indices = @transform_13, window_bounds = array<i64: 1, 128>}, {transform_indices = @transform_14, window_bounds = array<i64: 16, 128>}]} {
    %c0 = arith.constant 0 : index
    %c0_0 = arith.constant 0 : index
    %0 = vector.load %arg1[%c0, %c0_0] : memref<16x128xbf16, #tpu.memory_space<vmem>>, vector<16x128xbf16>
    %c0_1 = arith.constant 0 : index
    %c0_2 = arith.constant 0 : index
    %1 = vector.load %arg3[%c0_1, %c0_2] : memref<48x128xbf16, #tpu.memory_space<vmem>>, vector<48x128xbf16>
    %c0_3 = arith.constant 0 : index
    %c0_4 = arith.constant 0 : index
    %2 = vector.load %arg2[%c0_3, %c0_4] : memref<16x48xbf16, #tpu.memory_space<vmem>>, vector<16x48xbf16>
    %cst = arith.constant dense<0.000000e+00> : vector<16x128xf32>
    %3 = tpu.matmul %2, %1, %cst {dimension_numbers = #tpu.dot_dimension_numbers<[1], [0], [0], [1], [0, 0, 1, 1], [], []>} : vector<16x48xbf16>, vector<48x128xbf16>, vector<16x128xf32> -> vector<16x128xf32>
    %4 = arith.truncf %3 : vector<16x128xf32> to vector<16x128xbf16>
    %5 = tpu.concatenate %0, %4 in 1 : vector<16x128xbf16>, vector<16x128xbf16> -> vector<16x256xbf16>
    %c0_5 = arith.constant 0 : index
    %c0_6 = arith.constant 0 : index
    %6 = vector.load %arg4[%c0_5, %c0_6] : memref<256x256xbf16, #tpu.memory_space<vmem>>, vector<256x256xbf16>
    %cst_7 = arith.constant dense<0.000000e+00> : vector<16x256xf32>
    %7 = tpu.matmul %5, %6, %cst_7 {dimension_numbers = #tpu.dot_dimension_numbers<[1], [0], [0], [1], [0, 0, 1, 1], [], []>} : vector<16x256xbf16>, vector<256x256xbf16>, vector<16x256xf32> -> vector<16x256xf32>
    %c0_8 = arith.constant 0 : index
    %c0_9 = arith.constant 0 : index
    %8 = vector.load %arg5[%c0_8, %c0_9] : memref<1x256xf32, #tpu.memory_space<vmem>>, vector<1x256xf32>
    %9 = vector.broadcast %8 : vector<1x256xf32> to vector<16x256xf32>
    %10 = arith.addf %7, %9 : vector<16x256xf32>
    %cst_10 = arith.constant 0.000000e+00 : f32
    %11 = vector.broadcast %cst_10 : f32 to vector<16x256xf32>
    %12 = arith.maximumf %10, %11 : vector<16x256xf32>
    %13 = arith.truncf %12 : vector<16x256xf32> to vector<16x256xbf16>
    %c0_11 = arith.constant 0 : index
    %c0_12 = arith.constant 0 : index
    %14 = vector.load %arg6[%c0_11, %c0_12] : memref<256x128xbf16, #tpu.memory_space<vmem>>, vector<256x128xbf16>
    %cst_13 = arith.constant dense<0.000000e+00> : vector<16x128xf32>
    %15 = tpu.matmul %13, %14, %cst_13 {dimension_numbers = #tpu.dot_dimension_numbers<[1], [0], [0], [1], [0, 0, 1, 1], [], []>} : vector<16x256xbf16>, vector<256x128xbf16>, vector<16x128xf32> -> vector<16x128xf32>
    %c0_14 = arith.constant 0 : index
    %c0_15 = arith.constant 0 : index
    %16 = vector.load %arg7[%c0_14, %c0_15] : memref<1x128xf32, #tpu.memory_space<vmem>>, vector<1x128xf32>
    %17 = vector.broadcast %16 : vector<1x128xf32> to vector<16x128xf32>
    %18 = arith.addf %15, %17 : vector<16x128xf32>
    %cst_16 = arith.constant 0.000000e+00 : f32
    %19 = vector.broadcast %cst_16 : f32 to vector<16x128xf32>
    %20 = arith.maximumf %18, %19 : vector<16x128xf32>
    %21 = tpu.iota {dimensions = array<i32: 0>} : vector<16x1xi32>
    %c8_i32 = arith.constant 8 : i32
    %c0_i32 = arith.constant 0 : i32
    %22 = arith.cmpi eq, %c8_i32, %c0_i32 : i32
    %c1_i32 = arith.constant 1 : i32
    %23 = arith.select %22, %c1_i32, %c8_i32 : i32
    %24 = vector.broadcast %23 : i32 to vector<16x1xi32>
    %25 = arith.remsi %21, %24 : vector<16x1xi32>
    %c0_i32_17 = arith.constant 0 : i32
    %26 = vector.broadcast %c0_i32_17 : i32 to vector<16x1xi32>
    %27 = arith.cmpi ne, %25, %26 : vector<16x1xi32>
    %c0_i32_18 = arith.constant 0 : i32
    %28 = vector.broadcast %c0_i32_18 : i32 to vector<16x1xi32>
    %29 = arith.cmpi slt, %25, %28 : vector<16x1xi32>
    %c0_i32_19 = arith.constant 0 : i32
    %30 = arith.cmpi slt, %23, %c0_i32_19 : i32
    %31 = vector.broadcast %30 : i1 to vector<16x1xi1>
    %32 = vector.broadcast %31 : vector<16x1xi1> to vector<16x1xi1>
    %33 = arith.xori %29, %32 : vector<16x1xi1>
    %34 = arith.andi %33, %27 : vector<16x1xi1>
    %35 = vector.broadcast %23 : i32 to vector<16x1xi32>
    %36 = arith.addi %25, %35 : vector<16x1xi32>
    %37 = arith.select %34, %36, %25 : vector<16x1xi1>, vector<16x1xi32>
    %c15_i32 = arith.constant 15 : i32
    %38 = tpu.dynamic_rotate %20 by %c15_i32 dim 0 : vector<16x128xf32>, i32 -> vector<16x128xf32>
    %c5_i32 = arith.constant 5 : i32
    %39 = tpu.dynamic_rotate %20 by %c5_i32 dim 0 : vector<16x128xf32>, i32 -> vector<16x128xf32>
    %c5_i32_20 = arith.constant 5 : i32
    %40 = vector.broadcast %c5_i32_20 : i32 to vector<16x1xi32>
    %41 = arith.cmpi sge, %37, %40 : vector<16x1xi32>
    %42 = vector.shape_cast %41 : vector<16x1xi1> to vector<16x1xi1>
    %43 = vector.broadcast %42 : vector<16x1xi1> to vector<16x128xi1>
    %44 = arith.select %43, %39, %38 : vector<16x128xi1>, vector<16x128xf32>
    %c14_i32 = arith.constant 14 : i32
    %45 = tpu.dynamic_rotate %20 by %c14_i32 dim 0 : vector<16x128xf32>, i32 -> vector<16x128xf32>
    %c4_i32 = arith.constant 4 : i32
    %46 = tpu.dynamic_rotate %20 by %c4_i32 dim 0 : vector<16x128xf32>, i32 -> vector<16x128xf32>
    %c4_i32_21 = arith.constant 4 : i32
    %47 = vector.broadcast %c4_i32_21 : i32 to vector<16x1xi32>
    %48 = arith.cmpi sge, %37, %47 : vector<16x1xi32>
    %49 = vector.shape_cast %48 : vector<16x1xi1> to vector<16x1xi1>
    %50 = vector.broadcast %49 : vector<16x1xi1> to vector<16x128xi1>
    %51 = arith.select %50, %46, %45 : vector<16x128xi1>, vector<16x128xf32>
    %c13_i32 = arith.constant 13 : i32
    %52 = tpu.dynamic_rotate %20 by %c13_i32 dim 0 : vector<16x128xf32>, i32 -> vector<16x128xf32>
    %c3_i32 = arith.constant 3 : i32
    %53 = tpu.dynamic_rotate %20 by %c3_i32 dim 0 : vector<16x128xf32>, i32 -> vector<16x128xf32>
    %c3_i32_22 = arith.constant 3 : i32
    %54 = vector.broadcast %c3_i32_22 : i32 to vector<16x1xi32>
    %55 = arith.cmpi sge, %37, %54 : vector<16x1xi32>
    %56 = vector.shape_cast %55 : vector<16x1xi1> to vector<16x1xi1>
    %57 = vector.broadcast %56 : vector<16x1xi1> to vector<16x128xi1>
    %58 = arith.select %57, %53, %52 : vector<16x128xi1>, vector<16x128xf32>
    %c12_i32 = arith.constant 12 : i32
    %59 = tpu.dynamic_rotate %20 by %c12_i32 dim 0 : vector<16x128xf32>, i32 -> vector<16x128xf32>
    %c2_i32 = arith.constant 2 : i32
    %60 = tpu.dynamic_rotate %20 by %c2_i32 dim 0 : vector<16x128xf32>, i32 -> vector<16x128xf32>
    %c2_i32_23 = arith.constant 2 : i32
    %61 = vector.broadcast %c2_i32_23 : i32 to vector<16x1xi32>
    %62 = arith.cmpi sge, %37, %61 : vector<16x1xi32>
    %63 = vector.shape_cast %62 : vector<16x1xi1> to vector<16x1xi1>
    %64 = vector.broadcast %63 : vector<16x1xi1> to vector<16x128xi1>
    %65 = arith.select %64, %60, %59 : vector<16x128xi1>, vector<16x128xf32>
    %c11_i32 = arith.constant 11 : i32
    %66 = tpu.dynamic_rotate %20 by %c11_i32 dim 0 : vector<16x128xf32>, i32 -> vector<16x128xf32>
    %c1_i32_24 = arith.constant 1 : i32
    %67 = tpu.dynamic_rotate %20 by %c1_i32_24 dim 0 : vector<16x128xf32>, i32 -> vector<16x128xf32>
    %c1_i32_25 = arith.constant 1 : i32
    %68 = vector.broadcast %c1_i32_25 : i32 to vector<16x1xi32>
    %69 = arith.cmpi sge, %37, %68 : vector<16x1xi32>
    %70 = vector.shape_cast %69 : vector<16x1xi1> to vector<16x1xi1>
    %71 = vector.broadcast %70 : vector<16x1xi1> to vector<16x128xi1>
    %72 = arith.select %71, %67, %66 : vector<16x128xi1>, vector<16x128xf32>
    %73 = arith.addf %20, %44 : vector<16x128xf32>
    %74 = arith.addf %73, %51 : vector<16x128xf32>
    %75 = arith.addf %74, %58 : vector<16x128xf32>
    %76 = arith.addf %75, %65 : vector<16x128xf32>
    %77 = arith.addf %76, %72 : vector<16x128xf32>
    %78 = tpu.concatenate %20, %44, %51, %58, %65, %72 in 1 : vector<16x128xf32>, vector<16x128xf32>, vector<16x128xf32>, vector<16x128xf32>, vector<16x128xf32>, vector<16x128xf32> -> vector<16x768xf32>
    %79 = arith.truncf %78 : vector<16x768xf32> to vector<16x768xbf16>
    %c0_26 = arith.constant 0 : index
    %c0_27 = arith.constant 0 : index
    %80 = vector.load %arg8[%c0_26, %c0_27] : memref<768x512xbf16, #tpu.memory_space<vmem>>, vector<768x512xbf16>
    %cst_28 = arith.constant dense<0.000000e+00> : vector<16x512xf32>
    %81 = tpu.matmul %79, %80, %cst_28 {dimension_numbers = #tpu.dot_dimension_numbers<[1], [0], [0], [1], [0, 0, 1, 1], [], []>} : vector<16x768xbf16>, vector<768x512xbf16>, vector<16x512xf32> -> vector<16x512xf32>
    %82 = arith.truncf %77 : vector<16x128xf32> to vector<16x128xbf16>
    %83 = arith.truncf %20 : vector<16x128xf32> to vector<16x128xbf16>
    %84 = arith.truncf %81 : vector<16x512xf32> to vector<16x512xbf16>
    %85 = tpu.concatenate %82, %83, %84 in 1 : vector<16x128xbf16>, vector<16x128xbf16>, vector<16x512xbf16> -> vector<16x768xbf16>
    %c0_29 = arith.constant 0 : index
    %c0_30 = arith.constant 0 : index
    %86 = vector.load %arg9[%c0_29, %c0_30] : memref<768x256xbf16, #tpu.memory_space<vmem>>, vector<768x256xbf16>
    %cst_31 = arith.constant dense<0.000000e+00> : vector<16x256xf32>
    %87 = tpu.matmul %85, %86, %cst_31 {dimension_numbers = #tpu.dot_dimension_numbers<[1], [0], [0], [1], [0, 0, 1, 1], [], []>} : vector<16x768xbf16>, vector<768x256xbf16>, vector<16x256xf32> -> vector<16x256xf32>
    %c0_32 = arith.constant 0 : index
    %c0_33 = arith.constant 0 : index
    %88 = vector.load %arg10[%c0_32, %c0_33] : memref<1x256xf32, #tpu.memory_space<vmem>>, vector<1x256xf32>
    %89 = vector.broadcast %88 : vector<1x256xf32> to vector<16x256xf32>
    %90 = arith.addf %87, %89 : vector<16x256xf32>
    %cst_34 = arith.constant 0.000000e+00 : f32
    %91 = vector.broadcast %cst_34 : f32 to vector<16x256xf32>
    %92 = arith.maximumf %90, %91 : vector<16x256xf32>
    %93 = arith.truncf %92 : vector<16x256xf32> to vector<16x256xbf16>
    %c0_35 = arith.constant 0 : index
    %c0_36 = arith.constant 0 : index
    %94 = vector.load %arg11[%c0_35, %c0_36] : memref<256x256xbf16, #tpu.memory_space<vmem>>, vector<256x256xbf16>
    %cst_37 = arith.constant dense<0.000000e+00> : vector<16x256xf32>
    %95 = tpu.matmul %93, %94, %cst_37 {dimension_numbers = #tpu.dot_dimension_numbers<[1], [0], [0], [1], [0, 0, 1, 1], [], []>} : vector<16x256xbf16>, vector<256x256xbf16>, vector<16x256xf32> -> vector<16x256xf32>
    %c0_38 = arith.constant 0 : index
    %c0_39 = arith.constant 0 : index
    %96 = vector.load %arg12[%c0_38, %c0_39] : memref<1x256xf32, #tpu.memory_space<vmem>>, vector<1x256xf32>
    %97 = vector.broadcast %96 : vector<1x256xf32> to vector<16x256xf32>
    %98 = arith.addf %95, %97 : vector<16x256xf32>
    %cst_40 = arith.constant 0.000000e+00 : f32
    %99 = vector.broadcast %cst_40 : f32 to vector<16x256xf32>
    %100 = arith.maximumf %98, %99 : vector<16x256xf32>
    %101 = arith.truncf %100 : vector<16x256xf32> to vector<16x256xbf16>
    %c0_41 = arith.constant 0 : index
    %c0_42 = arith.constant 0 : index
    %102 = vector.load %arg13[%c0_41, %c0_42] : memref<256x128xbf16, #tpu.memory_space<vmem>>, vector<256x128xbf16>
    %cst_43 = arith.constant dense<0.000000e+00> : vector<16x128xf32>
    %103 = tpu.matmul %101, %102, %cst_43 {dimension_numbers = #tpu.dot_dimension_numbers<[1], [0], [0], [1], [0, 0, 1, 1], [], []>} : vector<16x256xbf16>, vector<256x128xbf16>, vector<16x128xf32> -> vector<16x128xf32>
    %c0_44 = arith.constant 0 : index
    %c0_45 = arith.constant 0 : index
    %104 = vector.load %arg14[%c0_44, %c0_45] : memref<1x128xf32, #tpu.memory_space<vmem>>, vector<1x128xf32>
    %105 = vector.broadcast %104 : vector<1x128xf32> to vector<16x128xf32>
    %106 = arith.addf %103, %105 : vector<16x128xf32>
    %cst_46 = arith.constant 0.000000e+00 : f32
    %107 = vector.broadcast %cst_46 : f32 to vector<16x128xf32>
    %108 = arith.maximumf %106, %107 : vector<16x128xf32>
    %109 = arith.truncf %108 : vector<16x128xf32> to vector<16x128xbf16>
    %c0_47 = arith.constant 0 : index
    %c0_48 = arith.constant 0 : index
    %110 = vector.load %arg15[%c0_47, %c0_48] : memref<16x128xbf16, #tpu.memory_space<vmem>>, vector<16x128xbf16>
    tpu.vector_store %arg15[%c0_47, %c0_48], %109 {strides = array<i32>} : memref<16x128xbf16, #tpu.memory_space<vmem>>, vector<16x128xbf16>,
    return
  }
  func.func @transform_0(%arg0: i32) -> (i32, i32) {
    %c0_i32 = arith.constant 0 : i32
    %c0_i32_0 = arith.constant 0 : i32
    return %arg0, %c0_i32 : i32, i32
  }
  func.func @transform_1(%arg0: i32) -> (i32, i32) {
    %c0_i32 = arith.constant 0 : i32
    %c0_i32_0 = arith.constant 0 : i32
    return %arg0, %c0_i32 : i32, i32
  }
  func.func @transform_2(%arg0: i32) -> (i32, i32) {
    %c0_i32 = arith.constant 0 : i32
    %c0_i32_0 = arith.constant 0 : i32
    %c0_i32_1 = arith.constant 0 : i32
    return %c0_i32, %c0_i32_0 : i32, i32
  }
  func.func @transform_3(%arg0: i32) -> (i32, i32) {
    %c0_i32 = arith.constant 0 : i32
    %c0_i32_0 = arith.constant 0 : i32
    %c0_i32_1 = arith.constant 0 : i32
    return %c0_i32, %c0_i32_0 : i32, i32
  }
  func.func @transform_4(%arg0: i32) -> (i32, i32) {
    %c0_i32 = arith.constant 0 : i32
    %c0_i32_0 = arith.constant 0 : i32
    %c0_i32_1 = arith.constant 0 : i32
    return %c0_i32, %c0_i32_0 : i32, i32
  }
  func.func @transform_5(%arg0: i32) -> (i32, i32) {
    %c0_i32 = arith.constant 0 : i32
    %c0_i32_0 = arith.constant 0 : i32
    %c0_i32_1 = arith.constant 0 : i32
    return %c0_i32, %c0_i32_0 : i32, i32
  }
  func.func @transform_6(%arg0: i32) -> (i32, i32) {
    %c0_i32 = arith.constant 0 : i32
    %c0_i32_0 = arith.constant 0 : i32
    %c0_i32_1 = arith.constant 0 : i32
    return %c0_i32, %c0_i32_0 : i32, i32
  }
  func.func @transform_7(%arg0: i32) -> (i32, i32) {
    %c0_i32 = arith.constant 0 : i32
    %c0_i32_0 = arith.constant 0 : i32
    %c0_i32_1 = arith.constant 0 : i32
    return %c0_i32, %c0_i32_0 : i32, i32
  }
  func.func @transform_8(%arg0: i32) -> (i32, i32) {
    %c0_i32 = arith.constant 0 : i32
    %c0_i32_0 = arith.constant 0 : i32
    %c0_i32_1 = arith.constant 0 : i32
    return %c0_i32, %c0_i32_0 : i32, i32
  }
  func.func @transform_9(%arg0: i32) -> (i32, i32) {
    %c0_i32 = arith.constant 0 : i32
    %c0_i32_0 = arith.constant 0 : i32
    %c0_i32_1 = arith.constant 0 : i32
    return %c0_i32, %c0_i32_0 : i32, i32
  }
  func.func @transform_10(%arg0: i32) -> (i32, i32) {
    %c0_i32 = arith.constant 0 : i32
    %c0_i32_0 = arith.constant 0 : i32
    %c0_i32_1 = arith.constant 0 : i32
    return %c0_i32, %c0_i32_0 : i32, i32
  }
  func.func @transform_11(%arg0: i32) -> (i32, i32) {
    %c0_i32 = arith.constant 0 : i32
    %c0_i32_0 = arith.constant 0 : i32
    %c0_i32_1 = arith.constant 0 : i32
    return %c0_i32, %c0_i32_0 : i32, i32
  }
  func.func @transform_12(%arg0: i32) -> (i32, i32) {
    %c0_i32 = arith.constant 0 : i32
    %c0_i32_0 = arith.constant 0 : i32
    %c0_i32_1 = arith.constant 0 : i32
    return %c0_i32, %c0_i32_0 : i32, i32
  }
  func.func @transform_13(%arg0: i32) -> (i32, i32) {
    %c0_i32 = arith.constant 0 : i32
    %c0_i32_0 = arith.constant 0 : i32
    %c0_i32_1 = arith.constant 0 : i32
    return %c0_i32, %c0_i32_0 : i32, i32
  }
  func.func @transform_14(%arg0: i32) -> (i32, i32) {
    %c0_i32 = arith.constant 0 : i32
    %c0_i32_0 = arith.constant 0 : i32
    return %arg0, %c0_i32 : i32, i32
  }
}

</mosaic_0001>

<bundles_post_ra>
// kernel: edge_cycle_forward.5
= control target key start
LH: loop header
LB: loop body
LE: loop exit
PB: predicated region body
PF: predicated region fallthrough
CT: control target
= control target key end

     0   :  { %13 = vsyncpa [#allocation3], 0  ;;  %s1601_s0 = inlined_call_operand.vmem [shape: bf16[48,128], index: 0, kind: input, shape index: {}]   ;;  %s1602_s1 = inlined_call_operand.vmem [shape: bf16[48,96], index: 1, kind: input, shape index: {}]   ;;  %s1603_s2 = inlined_call_operand.vmem [shape: bf16[64,128], index: 2, kind: input, shape index: {}]   ;;  %s1604_s3 = inlined_call_operand.vmem [shape: bf16[32,128], index: 3, kind: input, shape index: {}]   ;;  %s1605_s4 = inlined_call_operand.vmem [shape: bf16[256,256], index: 4, kind: input, shape index: {}]   ;;  %s1606_s5 = inlined_call_operand.vmem [shape: f32[1,256], index: 5, kind: input, shape index: {}]   ;;  %s1607_s6 = inlined_call_operand.vmem [shape: bf16[256,128], index: 6, kind: input, shape index: {}]   ;;  %s1608_s7 = inlined_call_operand.vmem [shape: f32[1,128], index: 7, kind: input, shape index: {}]   ;;  %s1609_s8 = inlined_call_operand.hbm [shape: bf16[48,128], index: 8, kind: output, shape index: {}]  }
   0x1   :  { %15 = vsyncpa [#allocation3 + $0x1], 0  ;;  %s1322_s27 = smov 0   ;;  %s1324_s28 = smov 0  }
   0x2   :  { %s1326_s29 = smov 0   ;;  %s1328_s30 = smov 0  }
   0x3 LB: > { %s1343_s9 = sadd.s32 4294967295, %s1270_s30   ;;  %s968_s10 = sadd.s32 4294967294, %s1270_s30   ;;  %s1270_s30 = sphi %s1328_s30, %s1615_s30   ;;  %s1266_s29 = sphi %s1326_s29, %s1614_s29   ;;  %s1262_s28 = sphi %s1324_s28, %s1613_s28   ;;  %s1258_s27 = sphi %s1322_s27, %s1612_s27  }
   0x4   : > { %s1347_s11 = sadd.s32 1, %s1270_s30   ;;  %s206_s12 = sadd.s32 1, %s1266_s29 }
   0x5   : > { %s203_s13 = ssub.s32 %s1270_s30, %s1347_s11  ;;  %p216_p0 = scmp.ne.s32.totalorder %s1266_s29, %s1262_s28 }
   0x6   : > { %p204_p1 = scmp.eq.s32.totalorder %s203_s13, 0  ;;  %p217_p2 = scmp.eq.s32.totalorder %s1343_s9, 2 }
   0x7   : > { %p222_p3 = scmp.ne.s32.totalorder %s1262_s28, %s1258_s27  ;;  %p223_p4 = scmp.eq.s32.totalorder %s968_s10, 2 }
   0x8   : > { %s1358_s14 = scalar_select %p204_p1, %s1266_s29, %s206_s12  }
   0x9   : > { %p1360_p5 = por %p217_p2, %p216_p0  ;;  %p1364_p6 = por %p223_p4, %p222_p3 }
   0xa   : > { %p971_p7 = scmp.ge.s32.totalorder %s1270_s30, 1  ;;  %p277_p8 = scmp.lt.s32.totalorder %s1270_s30, 4 }
   0xc   : > { %p278_p9 = pnand %p971_p7, %p277_p8 }
   0xd   : > { %s973_s21 = sshll.u32 (!%p278_p9), %s1343_s9, 1  ;;  %s313_s20 = sand.u32 (!%p278_p9), 1, %s1262_s28  }
   0xe   : > { %281 = sbr.rel (%p278_p9) target bundleno = 671 (0x29f), region = 52  ;;  %p317_p10 = scmp.lt.s32.totalorder (!%p278_p9), %s973_s21, 5 }
   0xf   : > { %s972_s22 = sshll.u32 (!%p278_p9), %s313_s20, 3  ;;  %s1044_s10 = sshll.u32 (!%p278_p9), %s1343_s9, 7 }
  0x10   : > { %s1557_s17 = scalar_lea.hbm (!%p278_p9), %s1609_s8, %s1044_s10  ;;  %s1561_s19 = scalar_lea.sflag (!%p278_p9), [#allocation3], %s313_s20 }
  0x11   : > { %s1274_s9 = smov (!%p278_p9), [#allocation2]  }
  0x13   : > { %v1138_v0 = vld [vmem:[%s1604_s3 + $0x8] sm:$0xff]   ;;  %v1272_v1 = vmov 0.0   ;;  %v1139_v2 = vld [vmem:[%s1604_s3] sm:$0xff]   ;;  %vm1273_vm0 = vmmov 0   ;;  %v1140_v3 = vld [vmem:[%s1603_s2 + $0x18] sm:$0xff]   ;;  %s1617_s21 = smov (!%p317_p10, %s973_s21), 5  ;;  %v473_v62 = vlaneseq }
  0x14   : > { %1079 = vmatprep.subr.bf16.mxu0 %v1272_v1  ;;  %1091 = vmatprep.mubr.msk.bf16.mxu0 %vm1273_vm0, %v1272_v1  ;;  %v1145_v4 = vld [vmem:[%s1605_s4 + $0x74] ss:$8 sps:$4 sm:$0xff]   ;;  %s974_s26 = sshll.u32 %s1617_s21, 2  ;;  %v1147_v5 = vld [vmem:[%s1605_s4 + $0x70] ss:$8 sps:$4 sm:$0xff]   ;;  %v1142_v11 = vld [vmem:[%s1603_s2 + $0x8] sm:$0xff]  }
  0x15   : > { %1080 = vmatpush3.bf16.msra.mxu0 %v1138_v0  ;;  %s326_s18 = scalar_lea.vmem %s1602_s1, %s974_s26  ;;  %643 = vmatprep.subr.bf16.mxu1 %v1145_v4  ;;  %v1148_v6 = vld [vmem:[%s1605_s4 + $0x64] ss:$8 sps:$4 sm:$0xff]   ;;  %v1150_v7 = vld [vmem:[%s1605_s4 + $0x60] ss:$8 sps:$4 sm:$0xff]   ;;  %v1141_v8 = vld [vmem:[%s1603_s2 + $0x10] sm:$0xff]   ;;  %vm385_vm1 = vcmask 785408   ;;  %s320_s24 = scalar_lea.vmem %s1601_s0, %s974_s26 }
  0x16   : > { %1081 = vmatprep.subr.bf16.mxu0 %v1272_v1  ;;  %644 = vmatpush1.bf16.msra.mxu1 %v1147_v5  ;;  %v1151_v9 = vld [vmem:[%s1605_s4 + $0x54] ss:$8 sps:$4 sm:$0xff]   ;;  %v1153_v10 = vld [vmem:[%s1605_s4 + $0x50] ss:$8 sps:$4 sm:$0xff]   ;;  %v1154_v12 = vld [vmem:[%s1605_s4 + $0x44] ss:$8 sps:$4 sm:$0xff]  }
  0x17   : > { %645 = vmatprep.subr.bf16.mxu1 %v1148_v6  ;;  %v1156_v13 = vld [vmem:[%s1605_s4 + $0x40] ss:$8 sps:$4 sm:$0xff]   ;;  %v1157_v15 = vld [vmem:[%s1605_s4 + $0x34] ss:$8 sps:$4 sm:$0xff]   ;;  %v1159_v17 = vld [vmem:[%s1605_s4 + $0x30] ss:$8 sps:$4 sm:$0xff]  }
  0x18   : > { %v1143_v14 = vld [vmem:[%s1603_s2] sm:$0xff]   ;;  %v1163_v20 = vld [vmem:[%s1605_s4 + $0x14] ss:$8 sps:$4 sm:$0xff]   ;;  %v1165_v21 = vld [vmem:[%s1605_s4 + $0x10] ss:$8 sps:$4 sm:$0xff]   ;;  %v474_v63 = vshrl.u32 %v473_v62, 7 }
  0x19   : > { %1082 = vmatpush3.bf16.msra.mxu0 %v1139_v2  ;;  %v1144_v16 = vld [vmem:[%s326_s18] sm:$0xff]   ;;  %v1169_v24 = vld [vmem:[%s1605_s4 + $0xf4] ss:$8 sps:$4 sm:$0xff]   ;;  %v1171_v25 = vld [vmem:[%s1605_s4 + $0xf0] ss:$8 sps:$4 sm:$0xff]   ;;  %s315_s18 = scalar_lea.vmem [#allocation2], %s972_s22 }
  0x1a   : > { %1083 = vmatprep.subr.bf16.mxu0 %v1272_v1  ;;  %646 = vmatpush1.bf16.msra.mxu1 %v1150_v7  ;;  %v1160_v18 = vld [vmem:[%s1605_s4 + $0x24] ss:$8 sps:$4 sm:$0xff]   ;;  %v1162_v19 = vld [vmem:[%s1605_s4 + $0x20] ss:$8 sps:$4 sm:$0xff]   ;;  %v1175_v28 = vld [vmem:[%s1605_s4 + $0xd4] ss:$8 sps:$4 sm:$0xff]  }
  0x1b   : > { %647 = vmatprep.subr.bf16.mxu1 %v1151_v9  ;;  %v1166_v22 = vld [vmem:[%s1605_s4 + $0x4] ss:$8 sps:$4 sm:$0xff]   ;;  %v1168_v23 = vld [vmem:[%s1605_s4] ss:$8 sps:$4 sm:$0xff]   ;;  %v1177_v29 = vld [vmem:[%s1605_s4 + $0xd0] ss:$8 sps:$4 sm:$0xff]  }
  0x1c   : > { %v1172_v26 = vld [vmem:[%s1605_s4 + $0xe4] ss:$8 sps:$4 sm:$0xff]   ;;  %v1174_v27 = vld [vmem:[%s1605_s4 + $0xe0] ss:$8 sps:$4 sm:$0xff]   ;;  %v1181_v32 = vld [vmem:[%s1605_s4 + $0xb4] ss:$8 sps:$4 sm:$0xff]  }
  0x1d   : > { %1084 = vmatpush3.bf16.msra.mxu0 %v1140_v3  ;;  %v1178_v30 = vld [vmem:[%s1605_s4 + $0xc4] ss:$8 sps:$4 sm:$0xff]   ;;  %v1180_v31 = vld [vmem:[%s1605_s4 + $0xc0] ss:$8 sps:$4 sm:$0xff]   ;;  %v1183_v33 = vld [vmem:[%s1605_s4 + $0xb0] ss:$8 sps:$4 sm:$0xff]  }
  0x1e   : > { %1085 = vmatprep.subr.bf16.mxu0 %v1272_v1  ;;  %648 = vmatpush1.bf16.msra.mxu1 %v1153_v10  ;;  %v1184_v34 = vld [vmem:[%s1605_s4 + $0xa4] ss:$8 sps:$4 sm:$0xff]   ;;  %v1186_v35 = vld [vmem:[%s1605_s4 + $0xa0] ss:$8 sps:$4 sm:$0xff]   ;;  %v1187_v36 = vld [vmem:[%s1605_s4 + $0x94] ss:$8 sps:$4 sm:$0xff]  }
  0x1f   : > { %649 = vmatprep.subr.bf16.mxu1 %v1154_v12  ;;  %v1189_v37 = vld [vmem:[%s1605_s4 + $0x90] ss:$8 sps:$4 sm:$0xff]   ;;  %v1190_v38 = vld [vmem:[%s1605_s4 + $0x84] ss:$8 sps:$4 sm:$0xff]   ;;  %v1192_v39 = vld [vmem:[%s1605_s4 + $0x80] ss:$8 sps:$4 sm:$0xff]  }
  0x20   : > { %v1194_v40 = vld [vmem:[%s1607_s6 + $0x78] sm:$0xff]   ;;  %v1196_v42 = vld [vmem:[%s1607_s6 + $0x70] sm:$0xff]   ;;  %v1198_v44 = vld [vmem:[%s1607_s6 + $0x68] sm:$0xff]   ;;  %v479_v0 = vsub.s32 1, %v474_v63  ;;  %s1214_s26 = sshll.u32 %s1274_s9, 4  ;;  %s1215_s26 = int_to_ptr.vmem [resolvable:$false] %s1214_s26 }
  0x21   : > { %1086 = vmatpush3.bf16.msra.mxu0 %v1141_v8  ;;  %v1195_v41 = vld [vmem:[%s1607_s6 + $0x38] sm:$0xff]   ;;  %v1197_v43 = vld [vmem:[%s1607_s6 + $0x30] sm:$0xff]   ;;  %v1199_v45 = vld [vmem:[%s1607_s6 + $0x28] sm:$0xff]   ;;  %s1216_s22 = scalar_lea.vmem %s1215_s26, 256 }
  0x22   : > { %1087 = vmatprep.subr.bf16.mxu0 %v1272_v1  ;;  %650 = vmatpush1.bf16.msra.mxu1 %v1156_v13  ;;  %v1200_v46 = vld [vmem:[%s1607_s6 + $0x60] sm:$0xff]   ;;  %v1202_v48 = vld [vmem:[%s1607_s6 + $0x58] sm:$0xff]   ;;  %v1204_v56 = vld [vmem:[%s1607_s6 + $0x50] sm:$0xff]  }
  0x23   : > { %651 = vmatprep.subr.bf16.mxu1 %v1157_v15  ;;  %v1201_v47 = vld [vmem:[%s1607_s6 + $0x20] sm:$0xff]   ;;  %v1203_v49 = vld [vmem:[%s1607_s6 + $0x18] sm:$0xff]   ;;  %v1205_v57 = vld [vmem:[%s1607_s6 + $0x10] sm:$0xff]  }
  0x24   : > { %v1193_v53 = vld [vmem:[%s320_s24] sm:$0xff]   ;;  %v1206_v58 = vld [vmem:[%s1607_s6 + $0x48] sm:$0xff]   ;;  %s894_s24 = sshll.u32 %s315_s18, 4  ;;  %s1559_s24 = int_to_ptr.vmem [resolvable:$true] %s894_s24 }
  0x25   : > { %1088 = vmatpush3.bf16.msra.mxu0 %v1142_v11  ;;  %v1207_v59 = vld [vmem:[%s1607_s6 + $0x8] sm:$0xff]   ;;  %v1208_v60 = vld [vmem:[%s1607_s6 + $0x40] sm:$0xff]   ;;  %s1210_s21 = scalar_lea.vmem %s1559_s24, 128  ;;  %p1217_p0 = scmp.lt.s32.totalorder %s1559_s24, %s1215_s26 }
  0x26   : > { %1089 = vmatprep.subr.bf16.mxu0 %v1272_v1  ;;  %652 = vmatpush1.bf16.msra.mxu1 %v1159_v17  ;;  %v1209_v61 = vld [vmem:[%s1607_s6] sm:$0xff]   ;;  %v475_v1 = vsub.s32 0, %v474_v63  ;;  %p1211_p11 = scmp.ne.s32.totalorder %s1559_s24, %s1210_s21  ;;  %p1218_p1 = scmp.lt.s32.totalorder %s1216_s22, %s1210_s21 }
  0x27   : > { %653 = vmatprep.subr.bf16.mxu1 %v1160_v18  ;;  %v471_v2 = vld [vmem:[%s1606_s5] sm:$0x3] }
  0x28   : > { %v480_v4 = vrot.slane %v471_v2, %v479_v0  ;;  %v476_v5 = vrot.slane %v471_v2, %v475_v1  ;;  %p1212_p12 = pnand %p1211_p11, %p1360_p5  ;;  %p1219_p2 = por %p1218_p1, %p1217_p0 }
  0x29   : > { %1090 = vmatpush3.bf16.msra.mxu0 %v1143_v14 }
  0x2a   : > { %654 = vmatpush1.bf16.msra.mxu1 %v1162_v19  ;;  %1057 = vmatprep.subr.bf16.mxu0 %v1194_v40  ;;  %p1213_p13 = pneg %p1212_p12 }
  0x2b   : > { %655 = vmatprep.subr.bf16.mxu1 %v1163_v20 }
  0x2c   : > { %1092 = vmatmul.mubr.msk.bf16.vlgmr.msra.gmra.mxu0 %vm385_vm1, %v1144_v16  ;;  %p1220_p3 = pnand %p1219_p2, %p1213_p13 }
  0x2d   : > { %1058 = vmatpush3.bf16.msra.mxu0 %v1195_v41 }
  0x2e   : > { %656 = vmatpush1.bf16.msra.mxu1 %v1165_v21  ;;  %1059 = vmatprep.subr.bf16.mxu0 %v1196_v42 }
  0x2f   : > { %657 = vmatprep.subr.bf16.mxu1 %v1166_v22  ;;  %v1018_v22 = vld [vmem:[%s1608_s7] ss:$0 sm:$0xff] }
  0x31   : > { %1060 = vmatpush3.bf16.msra.mxu0 %v1197_v43 }
  0x32   : > { %658 = vmatpush1.bf16.msra.mxu1 %v1168_v23  ;;  %1061 = vmatprep.subr.bf16.mxu0 %v1198_v44 }
  0x33   : > { %659 = vmatprep.subr.bf16.mxu1 %v1169_v24 }
  0x35   : > { %1062 = vmatpush3.bf16.msra.mxu0 %v1199_v45 }
  0x36   : > { %660 = vmatpush2.bf16.msra.mxu1 %v1171_v25  ;;  %1063 = vmatprep.subr.bf16.mxu0 %v1200_v46 }
  0x37   : > { %661 = vmatprep.subr.bf16.mxu1 %v1172_v26 }
  0x39   : > { %1064 = vmatpush3.bf16.msra.mxu0 %v1201_v47 }
  0x3a   : > { %662 = vmatpush2.bf16.msra.mxu1 %v1174_v27  ;;  %1065 = vmatprep.subr.bf16.mxu0 %v1202_v48 }
  0x3b   : > { %663 = vmatprep.subr.bf16.mxu1 %v1175_v28 }
  0x3d   : > { %1066 = vmatpush3.bf16.msra.mxu0 %v1203_v49 }
  0x3e   : > { %664 = vmatpush2.bf16.msra.mxu1 %v1177_v29  ;;  %1067 = vmatprep.subr.bf16.mxu0 %v1204_v56 }
  0x3f   : > { %665 = vmatprep.subr.bf16.mxu1 %v1178_v30 }
  0x41   : > { %1068 = vmatpush3.bf16.msra.mxu0 %v1205_v57 }
  0x42   : > { %666 = vmatpush2.bf16.msra.mxu1 %v1180_v31  ;;  %1069 = vmatprep.subr.bf16.mxu0 %v1206_v58 }
  0x43   : > { %667 = vmatprep.subr.bf16.mxu1 %v1181_v32 }
  0x45   : > { %1070 = vmatpush3.bf16.msra.mxu0 %v1207_v59 }
  0x46   : > { %668 = vmatpush2.bf16.msra.mxu1 %v1183_v33  ;;  %1071 = vmatprep.subr.bf16.mxu0 %v1208_v60 }
  0x47   : > { %669 = vmatprep.subr.bf16.mxu1 %v1184_v34 }
  0x49   : > { %1072 = vmatpush3.bf16.msra.mxu0 %v1209_v61 }
  0x4a   : > { %670 = vmatpush2.bf16.msra.mxu1 %v1186_v35 }
  0x4b   : > { %671 = vmatprep.subr.bf16.mxu1 %v1187_v36 }
  0x4e   : > { %672 = vmatpush2.bf16.msra.mxu1 %v1189_v37 }
  0x4f   : > { %673 = vmatprep.subr.bf16.mxu1 %v1190_v38 }
  0x52   : > { %674 = vmatpush2.bf16.msra.mxu1 %v1192_v39 }
  0xec   : > { %v423_v50 = vpop.f32.mrf.mxu0 }
  0xee   : > { %v1093_v51 = vpop.f32.mrf.mxu0 }
  0xf0   : > { %v426_v52 = vpop.f32.mrf.mxu0 }
  0xf1   : > { %v432_v54 = vpack.c.bf16 %v426_v52, %v423_v50 }
  0xf2   : > { %v1094_v55 = vpop.f32.mrf.mxu0 }
  0xf3   : > { %675 = vmatprep.mubr.bf16.mxu1 %v432_v54 }
  0xf4   : > { %676 = vmatmul.mubr.bf16.vlgmr.msra.gmra.mxu1 %v1193_v53 }
 0x1b4   : > { %v677_v3 = vpop.f32.mrf.mxu1 }
 0x1b5   : > { %v678_v10 = vadd.f32 %v677_v3, %v476_v5 }
 0x1b6   : > { %v679_v6 = vpop.f32.mrf.mxu1 }
 0x1b7   : > { %v680_v8 = vadd.f32 %v679_v6, %v480_v4  ;;  %v686_v16 = vmax.f32 %v678_v10, 0.0 }
 0x1b8   : > { %v681_v7 = vpop.f32.mrf.mxu1 }
 0x1b9   : > { %v682_v9 = vadd.f32 %v681_v7, %v476_v5  ;;  %v687_v14 = vmax.f32 %v680_v8, 0.0 }
 0x1ba   : > { %v683_v11 = vpop.f32.mrf.mxu1 }
 0x1bb   : > { %v684_v12 = vadd.f32 %v683_v11, %v480_v4  ;;  %v688_v13 = vmax.f32 %v682_v9, 0.0 }
 0x1bd   : > { %v689_v15 = vmax.f32 %v684_v12, 0.0  ;;  %v690_v18 = vpack.c.bf16 %v688_v13, %v686_v16 }
 0x1bf   : > { %v691_v17 = vpack.c.bf16 %v689_v15, %v687_v14 }
 0x1c1   : > { %859 = vmatprep.mubr.bf16.mxu0 %v691_v17 }
 0x1c2   : > { %860 = vmatmul.mubr.bf16.vlgmr.msra.gmra.mxu0 %v690_v18 }
 0x282   : > { %v1073_v19 = vpop.f32.mrf.mxu0 }
 0x284   : > { %v1074_v20 = vpop.f32.mrf.mxu0 }
 0x285   : > { %v1075_v21 = vadd.f32 %v1074_v20, %v1073_v19 }
 0x286   : > { %v1076_v23 = vpop.f32.mrf.mxu0 }
 0x287   : > { %v862_v25 = vadd.f32 %v1075_v21, %v1018_v22 }
 0x288   : > { %v1077_v24 = vpop.f32.mrf.mxu0 }
 0x289   : > { %v1078_v26 = vadd.f32 %v1077_v24, %v1076_v23  ;;  %v868_v28 = vmax.f32 %v862_v25, 0.0 }
 0x28b   : > { %v865_v27 = vadd.f32 %v1078_v26, %v1018_v22 }
 0x28d   : > { %v869_v29 = vmax.f32 %v865_v27, 0.0 }
 0x28f   : > { %v1048_v30 = vpack.c.bf16 %v869_v29, %v868_v28 }
 0x291   : > { %1049 = vst [vmem:[%s315_s18] sm:$0xff] %v1048_v30  }
 0x292   : > { %1223 = shalt.err (!%p1220_p3)
}
 0x293   : > { %s1224_s20 = scalar_lea.hbm %s1557_s17, 128  ;;  %s1228_s10 = scalar_lea.hbm %s1609_s8, 384 }
 0x294   : > { %p1225_p4 = scmp.ne.s32.totalorder %s1557_s17, %s1224_s20  ;;  %p1229_p9 = scmp.lt.s32.totalorder %s1557_s17, %s1609_s8 }
 0x295   : > { %p1230_p10 = scmp.lt.s32.totalorder %s1228_s10, %s1224_s20 }
 0x296   : > { %p1226_p7 = pnand %p1225_p4, %p1360_p5 }
 0x297   : > { %p1231_p11 = por %p1230_p10, %p1229_p9 }
 0x298   : > { %p1227_p8 = pneg %p1226_p7 }
 0x29a   : > { %p1232_p12 = pnand %p1231_p11, %p1227_p8 }
 0x29c   : > { %1235 = shalt.err (!%p1232_p12)
}
 0x29d   : > { %s1275_s13 = smov 64   ;;  %s1276_s21 = smov 4  }
 0x29e   : > { %1095 = dma.vmem_to_hbm [thread:$0]  (%p1360_p5), %s1559_s24, 128, %s1557_s17, %s1561_s19, %s1275_s13, %s1275_s13, %s1276_s21  }
 0x29f PF: > { %p1101_p13 = scmp.ge.s32.totalorder %s1270_s30, 2  ;;  %s909_s9 = sand.u32 1, %s1258_s27  }
 0x2a0   : > { %s910_s26 = scalar_lea.sflag [#allocation3], %s909_s9 }
 0x2a1   : > { %p1098_p0 = pnand %p1101_p13, %p1364_p6 }
 0x2a3   : > { %p1099_p1 = pneg %p1098_p0 }
 0x2a5   : > { %1253 = dma.done.wait (%p1099_p1), %s910_s26, 128  }
 0x2a6   : > { %1255 = vsyncadd (%p1099_p1), %s910_s26, 4294967168  ;;  %p18_p2 = scmp.ge.s32.totalorder %s1347_s11, 5   ;;  %s1612_s27 = smov %s1262_s28 }
 0x2a7   : > { %s1613_s28 = smov %s1266_s29  ;;  %s1614_s29 = smov %s1358_s14 }
 0x2a8   : > { %s1615_s30 = smov %s1347_s11  ;;  %20 = sbr.rel (!%p18_p2) target bundleno = 3 (0x3), region = 90 }
 0x2ad   :  { %915 = vsyncpa [#allocation3], 1 }
 0x2ae   :  { %917 = vsyncpa [#allocation3 + $0x1], 1 }

// kernel: edge_cycle_forward.4
= control target key start
LH: loop header
LB: loop body
LE: loop exit
PB: predicated region body
PF: predicated region fallthrough
CT: control target
= control target key end

     0   :  { %s4907_s29 = smov 0   ;;  %s6234_s0 = inlined_call_operand.vmem [shape: bf16[32,128], index: 0, kind: input, shape index: {}]   ;;  %s6235_s1 = inlined_call_operand.vmem [shape: bf16[32,48], index: 1, kind: input, shape index: {}]   ;;  %s6236_s2 = inlined_call_operand.vmem [shape: bf16[48,128], index: 2, kind: input, shape index: {}]   ;;  %s6237_s3 = inlined_call_operand.vmem [shape: bf16[256,256], index: 3, kind: input, shape index: {}]   ;;  %s6238_s4 = inlined_call_operand.vmem [shape: f32[1,256], index: 4, kind: input, shape index: {}]   ;;  %s6239_s5 = inlined_call_operand.vmem [shape: bf16[256,128], index: 5, kind: input, shape index: {}]   ;;  %s6240_s6 = inlined_call_operand.vmem [shape: f32[1,128], index: 6, kind: input, shape index: {}]   ;;  %s6241_s7 = inlined_call_operand.vmem [shape: bf16[768,512], index: 7, kind: input, shape index: {}]   ;;  %s6242_s8 = inlined_call_operand.vmem [shape: bf16[768,256], index: 8, kind: input, shape index: {}]   ;;  %s6243_s9 = inlined_call_operand.vmem [shape: f32[1,256], index: 9, kind: input, shape index: {}]   ;;  %s6244_s10 = inlined_call_operand.vmem [shape: bf16[256,256], index: 10, kind: input, shape index: {}]   ;;  %s6245_s11 = inlined_call_operand.vmem [shape: f32[1,256], index: 11, kind: input, shape index: {}]   ;;  %s6246_s12 = inlined_call_operand.vmem [shape: bf16[256,128], index: 12, kind: input, shape index: {}]   ;;  %s6247_s13 = inlined_call_operand.vmem [shape: f32[1,128], index: 13, kind: input, shape index: {}]   ;;  %s6248_s14 = inlined_call_operand.vmem [shape: bf16[32,128], index: 14, kind: output, shape index: {}]  }
   0x1 LB: > { %s3775_s30 = sadd.s32 4294967295, %s4828_s29   ;;  %p3779_p0 = scmp.ge.s32.totalorder %s4828_s29, 1  ;;  %s4828_s29 = sphi %s4907_s29, %s24_s29  }
   0x2   : > { %p424_p1 = scmp.lt.s32.totalorder %s4828_s29, 3 }
   0x4   : > { %p425_p2 = pnand %p3779_p0, %p424_p1 }
   0x5   : > { %s3780_s19 = sshll.u32 (!%p425_p2), %s3775_s30, 1 }
   0x6   : > { %428 = sbr.rel (%p425_p2) target bundleno = 1597 (0x63d), region = 76  ;;  %p476_p3 = scmp.lt.s32.totalorder (!%p425_p2), %s3780_s19, 3 }
   0xb   : > { %v4257_v0 = vld [vmem:[%s6236_s2 + $0x10] sm:$0xff]   ;;  %v4830_v1 = vmov 0.0   ;;  %v4258_v2 = vld [vmem:[%s6236_s2 + $0x8] sm:$0xff]   ;;  %vm4831_vm0 = vmmov 0   ;;  %s6252_s19 = smov (!%p476_p3, %s3780_s19), 3  ;;  %v4259_v6 = vld [vmem:[%s6236_s2] sm:$0xff]  }
   0xc   : > { %4237 = vmatprep.subr.bf16.mxu0 %v4830_v1  ;;  %4243 = vmatprep.mubr.msk.bf16.mxu0 %vm4831_vm0, %v4830_v1  ;;  %v4261_v3 = vld [vmem:[%s6237_s3 + $0x74] ss:$8 sps:$4 sm:$0xff]   ;;  %v4263_v4 = vld [vmem:[%s6237_s3 + $0x70] ss:$8 sps:$4 sm:$0xff]   ;;  %v4264_v5 = vld [vmem:[%s6237_s3 + $0x64] ss:$8 sps:$4 sm:$0xff]  }
   0xd   : > { %4238 = vmatpush3.bf16.msra.mxu0 %v4257_v0  ;;  %783 = vmatprep.subr.bf16.mxu1 %v4261_v3  ;;  %v4266_v7 = vld [vmem:[%s6237_s3 + $0x60] ss:$8 sps:$4 sm:$0xff]   ;;  %s4936_s15 = sshll.u32 %s6252_s19, 2  ;;  %v4267_v8 = vld [vmem:[%s6237_s3 + $0x54] ss:$8 sps:$4 sm:$0xff]   ;;  %vm527_vm1 = vcmask 392192  }
   0xe   : > { %4239 = vmatprep.subr.bf16.mxu0 %v4830_v1  ;;  %784 = vmatpush1.bf16.msra.mxu1 %v4263_v4  ;;  %s485_s21 = scalar_lea.vmem %s6235_s1, %s4936_s15  ;;  %v4269_v10 = vld [vmem:[%s6237_s3 + $0x50] ss:$8 sps:$4 sm:$0xff]   ;;  %v4270_v11 = vld [vmem:[%s6237_s3 + $0x44] ss:$8 sps:$4 sm:$0xff]   ;;  %v4272_v12 = vld [vmem:[%s6237_s3 + $0x40] ss:$8 sps:$4 sm:$0xff]   ;;  %s479_s22 = scalar_lea.vmem %s6234_s0, %s4936_s15 }
   0xf   : > { %785 = vmatprep.subr.bf16.mxu1 %v4264_v5  ;;  %v4260_v9 = vld [vmem:[%s485_s21] sm:$0xff]   ;;  %v4273_v13 = vld [vmem:[%s6237_s3 + $0x34] ss:$8 sps:$4 sm:$0xff]   ;;  %v4275_v14 = vld [vmem:[%s6237_s3 + $0x30] ss:$8 sps:$4 sm:$0xff]   ;;  %s491_s25 = scalar_lea.vmem %s6248_s14, %s4936_s15 }
  0x10   : > { %v4276_v15 = vld [vmem:[%s6237_s3 + $0x24] ss:$8 sps:$4 sm:$0xff]   ;;  %v4278_v16 = vld [vmem:[%s6237_s3 + $0x20] ss:$8 sps:$4 sm:$0xff]   ;;  %v4279_v17 = vld [vmem:[%s6237_s3 + $0x14] ss:$8 sps:$4 sm:$0xff]  }
  0x11   : > { %4240 = vmatpush3.bf16.msra.mxu0 %v4258_v2  ;;  %v4281_v18 = vld [vmem:[%s6237_s3 + $0x10] ss:$8 sps:$4 sm:$0xff]   ;;  %v4282_v19 = vld [vmem:[%s6237_s3 + $0x4] ss:$8 sps:$4 sm:$0xff]   ;;  %v4284_v20 = vld [vmem:[%s6237_s3] ss:$8 sps:$4 sm:$0xff]  }
  0x12   : > { %4241 = vmatprep.subr.bf16.mxu0 %v4830_v1  ;;  %786 = vmatpush1.bf16.msra.mxu1 %v4266_v7  ;;  %v4285_v21 = vld [vmem:[%s6237_s3 + $0xf4] ss:$8 sps:$4 sm:$0xff]   ;;  %v4287_v22 = vld [vmem:[%s6237_s3 + $0xf0] ss:$8 sps:$4 sm:$0xff]   ;;  %v4288_v23 = vld [vmem:[%s6237_s3 + $0xe4] ss:$8 sps:$4 sm:$0xff]  }
  0x13   : > { %787 = vmatprep.subr.bf16.mxu1 %v4267_v8  ;;  %v4290_v24 = vld [vmem:[%s6237_s3 + $0xe0] ss:$8 sps:$4 sm:$0xff]   ;;  %v4291_v25 = vld [vmem:[%s6237_s3 + $0xd4] ss:$8 sps:$4 sm:$0xff]   ;;  %v4293_v26 = vld [vmem:[%s6237_s3 + $0xd0] ss:$8 sps:$4 sm:$0xff]  }
  0x14   : > { %v4294_v27 = vld [vmem:[%s6237_s3 + $0xc4] ss:$8 sps:$4 sm:$0xff]   ;;  %v4296_v28 = vld [vmem:[%s6237_s3 + $0xc0] ss:$8 sps:$4 sm:$0xff]   ;;  %v4297_v29 = vld [vmem:[%s6237_s3 + $0xb4] ss:$8 sps:$4 sm:$0xff]  }
  0x15   : > { %4242 = vmatpush3.bf16.msra.mxu0 %v4259_v6  ;;  %v4299_v30 = vld [vmem:[%s6237_s3 + $0xb0] ss:$8 sps:$4 sm:$0xff]   ;;  %v4300_v31 = vld [vmem:[%s6237_s3 + $0xa4] ss:$8 sps:$4 sm:$0xff]   ;;  %v4302_v32 = vld [vmem:[%s6237_s3 + $0xa0] ss:$8 sps:$4 sm:$0xff]  }
  0x16   : > { %788 = vmatpush1.bf16.msra.mxu1 %v4269_v10  ;;  %v4303_v33 = vld [vmem:[%s6237_s3 + $0x94] ss:$8 sps:$4 sm:$0xff]   ;;  %v4305_v34 = vld [vmem:[%s6237_s3 + $0x90] ss:$8 sps:$4 sm:$0xff]   ;;  %v4306_v35 = vld [vmem:[%s6237_s3 + $0x84] ss:$8 sps:$4 sm:$0xff]  }
  0x17   : > { %789 = vmatprep.subr.bf16.mxu1 %v4270_v11  ;;  %v4308_v36 = vld [vmem:[%s6237_s3 + $0x80] ss:$8 sps:$4 sm:$0xff]   ;;  %v4310_v37 = vld [vmem:[%s6239_s5 + $0x78] sm:$0xff]   ;;  %v4312_v39 = vld [vmem:[%s6239_s5 + $0x70] sm:$0xff]  }
  0x18   : > { %4244 = vmatmul.mubr.msk.bf16.vlgmr.msra.gmra.mxu0 %vm527_vm1, %v4260_v9  ;;  %v4311_v38 = vld [vmem:[%s6239_s5 + $0x38] sm:$0xff]   ;;  %4193 = vmatprep.subr.bf16.mxu0 %v4310_v37  ;;  %v4313_v40 = vld [vmem:[%s6239_s5 + $0x30] sm:$0xff]   ;;  %v4314_v41 = vld [vmem:[%s6239_s5 + $0x68] sm:$0xff]  }
  0x19   : > { %4194 = vmatpush3.bf16.msra.mxu0 %v4311_v38  ;;  %v4315_v42 = vld [vmem:[%s6239_s5 + $0x28] sm:$0xff]   ;;  %v4316_v43 = vld [vmem:[%s6239_s5 + $0x60] sm:$0xff]   ;;  %v4318_v45 = vld [vmem:[%s6239_s5 + $0x58] sm:$0xff]  }
  0x1a   : > { %790 = vmatpush1.bf16.msra.mxu1 %v4272_v12  ;;  %4195 = vmatprep.subr.bf16.mxu0 %v4312_v39  ;;  %v4317_v44 = vld [vmem:[%s6239_s5 + $0x20] sm:$0xff]   ;;  %v4319_v46 = vld [vmem:[%s6239_s5 + $0x18] sm:$0xff]   ;;  %v4320_v53 = vld [vmem:[%s6239_s5 + $0x50] sm:$0xff]  }
  0x1b   : > { %791 = vmatprep.subr.bf16.mxu1 %v4273_v13  ;;  %v4309_v50 = vld [vmem:[%s479_s22] sm:$0xff]   ;;  %v4321_v54 = vld [vmem:[%s6239_s5 + $0x10] sm:$0xff]   ;;  %v4322_v55 = vld [vmem:[%s6239_s5 + $0x48] sm:$0xff]  }
  0x1c   : > { %v4323_v56 = vld [vmem:[%s6239_s5 + $0x8] sm:$0xff]   ;;  %v4324_v57 = vld [vmem:[%s6239_s5 + $0x40] sm:$0xff]  }
  0x1d   : > { %4196 = vmatpush3.bf16.msra.mxu0 %v4313_v40  ;;  %v4325_v58 = vld [vmem:[%s6239_s5] sm:$0xff]  }
  0x1e   : > { %792 = vmatpush1.bf16.msra.mxu1 %v4275_v14  ;;  %4197 = vmatprep.subr.bf16.mxu0 %v4314_v41  ;;  %v4328_v59 = vld [vmem:[%s6241_s7 + $0xe4] ss:$16 sps:$4 sm:$0xff]   ;;  %v4329_v60 = vld [vmem:[%s6241_s7 + $0x2e0] ss:$16 sps:$4 sm:$0xff]  }
  0x1f   : > { %793 = vmatprep.subr.bf16.mxu1 %v4276_v15  ;;  %v4331_v61 = vld [vmem:[%s6241_s7 + $0x2e4] ss:$16 sps:$4 sm:$0xff]   ;;  %v4335_v63 = vld [vmem:[%s6241_s7 + $0x2c0] ss:$16 sps:$4 sm:$0xff]  }
  0x20   : > { %v4337_v62 = vld [vmem:[%s6241_s7 + $0x2c4] ss:$16 sps:$4 sm:$0xff]   ;;  %v4341_v1 = vld [vmem:[%s6241_s7 + $0x2a0] ss:$16 sps:$4 sm:$0xff]  }
  0x21   : > { %4198 = vmatpush3.bf16.msra.mxu0 %v4315_v42  ;;  %v4343_v0 = vld [vmem:[%s6241_s7 + $0x2a4] ss:$16 sps:$4 sm:$0xff]   ;;  %v4347_v3 = vld [vmem:[%s6241_s7 + $0x280] ss:$16 sps:$4 sm:$0xff]  }
  0x22   : > { %794 = vmatpush1.bf16.msra.mxu1 %v4278_v16  ;;  %4199 = vmatprep.subr.bf16.mxu0 %v4316_v43  ;;  %v4349_v2 = vld [vmem:[%s6241_s7 + $0x284] ss:$16 sps:$4 sm:$0xff]   ;;  %v4353_v5 = vld [vmem:[%s6241_s7 + $0x260] ss:$16 sps:$4 sm:$0xff]  }
  0x23   : > { %795 = vmatprep.subr.bf16.mxu1 %v4279_v17  ;;  %v4355_v4 = vld [vmem:[%s6241_s7 + $0x264] ss:$16 sps:$4 sm:$0xff]   ;;  %v4359_v7 = vld [vmem:[%s6241_s7 + $0x240] ss:$16 sps:$4 sm:$0xff]  }
  0x24   : > { %v4361_v6 = vld [vmem:[%s6241_s7 + $0x244] ss:$16 sps:$4 sm:$0xff]   ;;  %v4365_v9 = vld [vmem:[%s6241_s7 + $0x220] ss:$16 sps:$4 sm:$0xff]  }
  0x25   : > { %4200 = vmatpush3.bf16.msra.mxu0 %v4317_v44  ;;  %v4367_v8 = vld [vmem:[%s6241_s7 + $0x224] ss:$16 sps:$4 sm:$0xff]   ;;  %v4371_v11 = vld [vmem:[%s6241_s7 + $0x200] ss:$16 sps:$4 sm:$0xff]  }
  0x26   : > { %796 = vmatpush1.bf16.msra.mxu1 %v4281_v18  ;;  %4201 = vmatprep.subr.bf16.mxu0 %v4318_v45  ;;  %v4373_v10 = vld [vmem:[%s6241_s7 + $0x204] ss:$16 sps:$4 sm:$0xff]   ;;  %v4377_v13 = vld [vmem:[%s6241_s7 + $0x3e0] ss:$16 sps:$4 sm:$0xff]  }
  0x27   : > { %797 = vmatprep.subr.bf16.mxu1 %v4282_v19  ;;  %v4379_v12 = vld [vmem:[%s6241_s7 + $0x3e4] ss:$16 sps:$4 sm:$0xff]   ;;  %v4383_v15 = vld [vmem:[%s6241_s7 + $0x3c0] ss:$16 sps:$4 sm:$0xff]  }
  0x28   : > { %v4385_v14 = vld [vmem:[%s6241_s7 + $0x3c4] ss:$16 sps:$4 sm:$0xff]   ;;  %v4389_v17 = vld [vmem:[%s6241_s7 + $0x3a0] ss:$16 sps:$4 sm:$0xff]  }
  0x29   : > { %4202 = vmatpush3.bf16.msra.mxu0 %v4319_v46  ;;  %v4391_v16 = vld [vmem:[%s6241_s7 + $0x3a4] ss:$16 sps:$4 sm:$0xff]   ;;  %v4395_v19 = vld [vmem:[%s6241_s7 + $0x380] ss:$16 sps:$4 sm:$0xff]  }
  0x2a   : > { %798 = vmatpush1.bf16.msra.mxu1 %v4284_v20  ;;  %4203 = vmatprep.subr.bf16.mxu0 %v4320_v53  ;;  %v4397_v18 = vld [vmem:[%s6241_s7 + $0x384] ss:$16 sps:$4 sm:$0xff]   ;;  %v613_v20 = vlaneseq  ;;  %v4326_v40 = vld [vmem:[%s6241_s7 + $0xe0] ss:$16 sps:$4 sm:$0xff]  }
  0x2b   : > { %799 = vmatprep.subr.bf16.mxu1 %v4285_v21  ;;  %v4334_v42 = vld [vmem:[%s6241_s7 + $0xc4] ss:$16 sps:$4 sm:$0xff]   ;;  %v4332_v43 = vld [vmem:[%s6241_s7 + $0xc0] ss:$16 sps:$4 sm:$0xff]  }
  0x2c   : > { %v5153_v21 = vshrl.u32 %v613_v20, 7  ;;  %v4340_v44 = vld [vmem:[%s6241_s7 + $0xa4] ss:$16 sps:$4 sm:$0xff]   ;;  %v4338_v45 = vld [vmem:[%s6241_s7 + $0xa0] ss:$16 sps:$4 sm:$0xff]  }
  0x2d   : > { %4204 = vmatpush3.bf16.msra.mxu0 %v4321_v54  ;;  %v4346_v46 = vld [vmem:[%s6241_s7 + $0x84] ss:$16 sps:$4 sm:$0xff]   ;;  %v4362_v53 = vld [vmem:[%s6241_s7 + $0x20] ss:$16 sps:$4 sm:$0xff]  }
  0x2e   : > { %800 = vmatpush2.bf16.msra.mxu1 %v4287_v22  ;;  %4205 = vmatprep.subr.bf16.mxu0 %v4322_v55  ;;  %v5156_v22 = vsub.s32 1, %v5153_v21  ;;  %v4370_v54 = vld [vmem:[%s6241_s7 + $0x4] ss:$16 sps:$4 sm:$0xff]   ;;  %v4368_v55 = vld [vmem:[%s6241_s7] ss:$16 sps:$4 sm:$0xff]   ;;  %vm1039_vm2 = vcmp.lt.s32.totalorder %v5153_v21, 7 }
  0x2f   : > { %801 = vmatprep.subr.bf16.mxu1 %v4288_v23  ;;  %v5159_v23 = vsub.s32 0, %v5153_v21  ;;  %v3824_v20 = vld [vmem:[%s6240_s6] ss:$0 sm:$0xff]  ;;  %vm1044_vm3 = vcmp.lt.s32.totalorder %v5153_v21, 5  ;;  %vm1057_vm4 = vcmp.lt.s32.totalorder %v5153_v21, 6  ;;  %vm1062_vm7 = vcmp.lt.s32.totalorder %v5153_v21, 4 }
  0x30   : > { %vm1075_vm8 = vcmp.lt.s32.totalorder %v5153_v21, 3  ;;  %vm1088_vm13 = vcmp.lt.s32.totalorder %v5153_v21, 2 }
  0x31   : > { %4206 = vmatpush3.bf16.msra.mxu0 %v4323_v56  ;;  %v4376_v56 = vld [vmem:[%s6241_s7 + $0x1e4] ss:$16 sps:$4 sm:$0xff]  }
  0x32   : > { %802 = vmatpush2.bf16.msra.mxu1 %v4290_v24  ;;  %4207 = vmatprep.subr.bf16.mxu0 %v4324_v57  ;;  %v611_v24 = vld [vmem:[%s6238_s4] sm:$0x3] }
  0x33   : > { %803 = vmatprep.subr.bf16.mxu1 %v4291_v25  ;;  %v4374_v57 = vld [vmem:[%s6241_s7 + $0x1e0] ss:$16 sps:$4 sm:$0xff]  }
  0x35   : > { %4208 = vmatpush3.bf16.msra.mxu0 %v4325_v58  ;;  %v4382_v58 = vld [vmem:[%s6241_s7 + $0x1c4] ss:$16 sps:$4 sm:$0xff]  }
  0x36   : > { %804 = vmatpush2.bf16.msra.mxu1 %v4293_v26  ;;  %2280 = vmatprep.subr.bf16.mxu0 %v4328_v59  ;;  %v620_v26 = vrot.slane %v611_v24, %v5156_v22  ;;  %v4380_v59 = vld [vmem:[%s6241_s7 + $0x1c0] ss:$16 sps:$4 sm:$0xff]  }
  0x37   : > { %805 = vmatprep.subr.bf16.mxu1 %v4294_v27  ;;  %v616_v27 = vrot.slane %v611_v24, %v5159_v23 }
  0x3a   : > { %806 = vmatpush2.bf16.msra.mxu1 %v4296_v28 }
  0x3b   : > { %807 = vmatprep.subr.bf16.mxu1 %v4297_v29 }
  0x3e   : > { %808 = vmatpush2.bf16.msra.mxu1 %v4299_v30 }
  0x3f   : > { %809 = vmatprep.subr.bf16.mxu1 %v4300_v31 }
  0x42   : > { %810 = vmatpush2.bf16.msra.mxu1 %v4302_v32 }
  0x43   : > { %811 = vmatprep.subr.bf16.mxu1 %v4303_v33 }
  0x46   : > { %812 = vmatpush2.bf16.msra.mxu1 %v4305_v34 }
  0x47   : > { %813 = vmatprep.subr.bf16.mxu1 %v4306_v35 }
  0x4a   : > { %814 = vmatpush2.bf16.msra.mxu1 %v4308_v36 }
  0x4b   : > { %2323 = vmatprep.subr.bf16.mxu1 %v4331_v61  ;;  %v4386_v61 = vld [vmem:[%s6241_s7 + $0x1a0] ss:$16 sps:$4 sm:$0xff]  }
  0xd8   : > { %v565_v47 = vpop.f32.mrf.mxu0 }
  0xda   : > { %v4245_v48 = vpop.f32.mrf.mxu0 }
  0xdb   : > { %v4352_v48 = vld [vmem:[%s6241_s7 + $0x64] ss:$16 sps:$4 sm:$0xff]  }
  0xdc   : > { %v568_v49 = vpop.f32.mrf.mxu0 }
  0xdd   : > { %v572_v51 = vpack.c.bf16 %v568_v49, %v565_v47  ;;  %v4344_v47 = vld [vmem:[%s6241_s7 + $0x80] ss:$16 sps:$4 sm:$0xff]  }
  0xde   : > { %v4246_v52 = vpop.f32.mrf.mxu0  ;;  %v4350_v49 = vld [vmem:[%s6241_s7 + $0x60] ss:$16 sps:$4 sm:$0xff]  }
  0xdf   : > { %815 = vmatprep.mubr.bf16.mxu1 %v572_v51  ;;  %v4356_v51 = vld [vmem:[%s6241_s7 + $0x40] ss:$16 sps:$4 sm:$0xff]   ;;  %v4364_v52 = vld [vmem:[%s6241_s7 + $0x24] ss:$16 sps:$4 sm:$0xff]  }
  0xe0   : > { %816 = vmatmul.mubr.bf16.vlgmr.msra.gmra.mxu1 %v4309_v50  ;;  %v4358_v50 = vld [vmem:[%s6241_s7 + $0x44] ss:$16 sps:$4 sm:$0xff]  }
  0xe1   : > { %2324 = vmatpush1.bf16.msra.mxu1 %v4329_v60  ;;  %v4388_v60 = vld [vmem:[%s6241_s7 + $0x1a4] ss:$16 sps:$4 sm:$0xff]  }
  0xe2   : > { %2325 = vmatprep.subr.bf16.mxu1 %v4337_v62  ;;  %v4394_v62 = vld [vmem:[%s6241_s7 + $0x184] ss:$16 sps:$4 sm:$0xff]  }
  0xe5   : > { %2326 = vmatpush1.bf16.msra.mxu1 %v4335_v63  ;;  %v4392_v63 = vld [vmem:[%s6241_s7 + $0x180] ss:$16 sps:$4 sm:$0xff]  }
  0xe6   : > { %2327 = vmatprep.subr.bf16.mxu1 %v4343_v0  ;;  %v4400_v0 = vld [vmem:[%s6241_s7 + $0x164] ss:$16 sps:$4 sm:$0xff]  }
  0xe9   : > { %2328 = vmatpush1.bf16.msra.mxu1 %v4341_v1  ;;  %v4403_v1 = vld [vmem:[%s6241_s7 + $0x364] ss:$16 sps:$4 sm:$0xff]  }
  0xea   : > { %2329 = vmatprep.subr.bf16.mxu1 %v4349_v2  ;;  %v4398_v2 = vld [vmem:[%s6241_s7 + $0x160] ss:$16 sps:$4 sm:$0xff]  }
  0xed   : > { %2330 = vmatpush1.bf16.msra.mxu1 %v4347_v3  ;;  %v4401_v3 = vld [vmem:[%s6241_s7 + $0x360] ss:$16 sps:$4 sm:$0xff]  }
  0xee   : > { %2331 = vmatprep.subr.bf16.mxu1 %v4355_v4  ;;  %v4406_v4 = vld [vmem:[%s6241_s7 + $0x144] ss:$16 sps:$4 sm:$0xff]  }
  0xf1   : > { %2332 = vmatpush1.bf16.msra.mxu1 %v4353_v5  ;;  %v4409_v5 = vld [vmem:[%s6241_s7 + $0x344] ss:$16 sps:$4 sm:$0xff]  }
  0xf2   : > { %2333 = vmatprep.subr.bf16.mxu1 %v4361_v6  ;;  %v4404_v6 = vld [vmem:[%s6241_s7 + $0x140] ss:$16 sps:$4 sm:$0xff]  }
  0xf5   : > { %2334 = vmatpush1.bf16.msra.mxu1 %v4359_v7  ;;  %v4407_v7 = vld [vmem:[%s6241_s7 + $0x340] ss:$16 sps:$4 sm:$0xff]  }
  0xf6   : > { %2335 = vmatprep.subr.bf16.mxu1 %v4367_v8  ;;  %v4412_v8 = vld [vmem:[%s6241_s7 + $0x124] ss:$16 sps:$4 sm:$0xff]  }
  0xf9   : > { %2336 = vmatpush1.bf16.msra.mxu1 %v4365_v9  ;;  %v4415_v9 = vld [vmem:[%s6241_s7 + $0x324] ss:$16 sps:$4 sm:$0xff]  }
  0xfa   : > { %2337 = vmatprep.subr.bf16.mxu1 %v4373_v10  ;;  %v4410_v10 = vld [vmem:[%s6241_s7 + $0x120] ss:$16 sps:$4 sm:$0xff]  }
  0xfd   : > { %2338 = vmatpush1.bf16.msra.mxu1 %v4371_v11  ;;  %v4413_v11 = vld [vmem:[%s6241_s7 + $0x320] ss:$16 sps:$4 sm:$0xff]  }
  0xfe   : > { %2339 = vmatprep.subr.bf16.mxu1 %v4379_v12  ;;  %v4418_v12 = vld [vmem:[%s6241_s7 + $0x104] ss:$16 sps:$4 sm:$0xff]  }
 0x101   : > { %2340 = vmatpush2.bf16.msra.mxu1 %v4377_v13  ;;  %v4416_v13 = vld [vmem:[%s6241_s7 + $0x100] ss:$16 sps:$4 sm:$0xff]  }
 0x102   : > { %2341 = vmatprep.subr.bf16.mxu1 %v4385_v14  ;;  %v4419_v14 = vld [vmem:[%s6241_s7 + $0x300] ss:$16 sps:$4 sm:$0xff]  }
 0x105   : > { %2342 = vmatpush2.bf16.msra.mxu1 %v4383_v15  ;;  %v4421_v15 = vld [vmem:[%s6241_s7 + $0x304] ss:$16 sps:$4 sm:$0xff]  }
 0x106   : > { %2343 = vmatprep.subr.bf16.mxu1 %v4391_v16  ;;  %v4424_v16 = vld [vmem:[%s6241_s7 + $0x4e4] ss:$16 sps:$4 sm:$0xff]  }
 0x109   : > { %2344 = vmatpush2.bf16.msra.mxu1 %v4389_v17  ;;  %v4427_v17 = vld [vmem:[%s6241_s7 + $0xec] ss:$16 sps:$4 sm:$0xff]  }
 0x10a   : > { %2345 = vmatprep.subr.bf16.mxu1 %v4397_v18 }
 0x10d   : > { %2346 = vmatpush2.bf16.msra.mxu1 %v4395_v19  ;;  %v1012_v19 = vadd.s32 8, %v5153_v21 }
 0x10e   : > { %2347 = vmatprep.subr.bf16.mxu1 %v4403_v1 }
 0x111   : > { %2348 = vmatpush2.bf16.msra.mxu1 %v4401_v3 }
 0x112   : > { %2349 = vmatprep.subr.bf16.mxu1 %v4409_v5 }
 0x115   : > { %2350 = vmatpush2.bf16.msra.mxu1 %v4407_v7  ;;  %v4430_v7 = vld [vmem:[%s6241_s7 + $0x4c4] ss:$16 sps:$4 sm:$0xff]  }
 0x116   : > { %2351 = vmatprep.subr.bf16.mxu1 %v4415_v9 }
 0x119   : > { %2352 = vmatpush2.bf16.msra.mxu1 %v4413_v11 }
 0x11a   : > { %2353 = vmatprep.subr.bf16.mxu1 %v4421_v15 }
 0x11d   : > { %2354 = vmatpush2.bf16.msra.mxu1 %v4419_v14 }
 0x11e   : > { %2409 = vmatprep.subr.bf16.mxu1 %v4427_v17  ;;  %v4428_v17 = vld [vmem:[%s6241_s7 + $0x4c0] ss:$16 sps:$4 sm:$0xff]  }
 0x1a0   : > { %v817_v25 = vpop.f32.mrf.mxu1 }
 0x1a1   : > { %v818_v32 = vadd.f32 %v817_v25, %v616_v27 }
 0x1a2   : > { %v819_v28 = vpop.f32.mrf.mxu1 }
 0x1a3   : > { %v820_v30 = vadd.f32 %v819_v28, %v620_v26  ;;  %v826_v38 = vmax.f32 %v818_v32, 0.0  ;;  %v5296_v28 = vand.u32 7, %v1012_v19 }
 0x1a4   : > { %v821_v29 = vpop.f32.mrf.mxu1 }
 0x1a5   : > { %v822_v31 = vadd.f32 %v821_v29, %v616_v27  ;;  %v827_v36 = vmax.f32 %v820_v30, 0.0  ;;  %v5294_v27 = vand.u32 7, %v5153_v21  ;;  %vm1048_vm6 = vcmp.ge.s32.totalorder %v5296_v28, 5 }
 0x1a6   : > { %v823_v33 = vpop.f32.mrf.mxu1  ;;  %vm1066_vm10 = vcmp.ge.s32.totalorder %v5296_v28, 4  ;;  %vm1079_vm12 = vcmp.ge.s32.totalorder %v5296_v28, 3  ;;  %vm1092_vm14 = vcmp.ge.s32.totalorder %v5296_v28, 2  ;;  %vm1105_vm1 = vcmp.ge.s32.totalorder %v5296_v28, 1  ;;  %v4431_v28 = vld [vmem:[%s6241_s7 + $0xc8] ss:$16 sps:$4 sm:$0xff]  }
 0x1a7   : > { %v824_v34 = vadd.f32 %v823_v33, %v620_v26  ;;  %v828_v35 = vmax.f32 %v822_v31, 0.0  ;;  %vm1047_vm5 = vcmp.ge.s32.totalorder %v5294_v27, 5  ;;  %vm1065_vm9 = vcmp.ge.s32.totalorder %v5294_v27, 4 }
 0x1a8   : > { %vm1078_vm11 = vcmp.ge.s32.totalorder %v5294_v27, 3  ;;  %vm1091_vm0 = vcmp.ge.s32.totalorder %v5294_v27, 2  ;;  %vm1104_vm15 = vcmp.ge.s32.totalorder %v5294_v27, 1  ;;  %v4434_v27 = vld [vmem:[%s6241_s7 + $0x4a0] ss:$16 sps:$4 sm:$0xff]  }
 0x1a9   : > { %v829_v37 = vmax.f32 %v824_v34, 0.0  ;;  %v830_v41 = vpack.c.bf16 %v828_v35, %v826_v38 }
 0x1ab   : > { %v831_v39 = vpack.c.bf16 %v829_v37, %v827_v36 }
 0x1ad   : > { %999 = vmatprep.mubr.bf16.mxu0 %v831_v39 }
 0x1ae   : > { %1000 = vmatmul.mubr.bf16.vlgmr.msra.gmra.mxu0 %v830_v41 }
 0x1af   : > { %2281 = vmatpush1.bf16.msra.mxu0 %v4326_v40 }
 0x1b0   : > { %2282 = vmatprep.subr.bf16.mxu0 %v4334_v42 }
 0x1b3   : > { %2283 = vmatpush1.bf16.msra.mxu0 %v4332_v43 }
 0x1b4   : > { %2284 = vmatprep.subr.bf16.mxu0 %v4340_v44 }
 0x1b7   : > { %2285 = vmatpush1.bf16.msra.mxu0 %v4338_v45 }
 0x1b8   : > { %2286 = vmatprep.subr.bf16.mxu0 %v4346_v46 }
 0x1bb   : > { %2287 = vmatpush1.bf16.msra.mxu0 %v4344_v47 }
 0x1bc   : > { %2288 = vmatprep.subr.bf16.mxu0 %v4352_v48 }
 0x1bf   : > { %2289 = vmatpush1.bf16.msra.mxu0 %v4350_v49 }
 0x1c0   : > { %2290 = vmatprep.subr.bf16.mxu0 %v4358_v50 }
 0x1c3   : > { %2291 = vmatpush1.bf16.msra.mxu0 %v4356_v51 }
 0x1c4   : > { %2292 = vmatprep.subr.bf16.mxu0 %v4364_v52 }
 0x1c7   : > { %2293 = vmatpush1.bf16.msra.mxu0 %v4362_v53 }
 0x1c8   : > { %2294 = vmatprep.subr.bf16.mxu0 %v4370_v54 }
 0x1cb   : > { %2295 = vmatpush1.bf16.msra.mxu0 %v4368_v55 }
 0x1cc   : > { %2296 = vmatprep.subr.bf16.mxu0 %v4376_v56 }
 0x1cf   : > { %2297 = vmatpush2.bf16.msra.mxu0 %v4374_v57 }
 0x1d0   : > { %2298 = vmatprep.subr.bf16.mxu0 %v4382_v58 }
 0x1d3   : > { %2299 = vmatpush2.bf16.msra.mxu0 %v4380_v59 }
 0x1d4   : > { %2300 = vmatprep.subr.bf16.mxu0 %v4388_v60 }
 0x1d7   : > { %2301 = vmatpush2.bf16.msra.mxu0 %v4386_v61 }
 0x1d8   : > { %2302 = vmatprep.subr.bf16.mxu0 %v4394_v62  ;;  %v4422_v62 = vld [vmem:[%s6241_s7 + $0x4e0] ss:$16 sps:$4 sm:$0xff]  }
 0x1db   : > { %2303 = vmatpush2.bf16.msra.mxu0 %v4392_v63 }
 0x1dc   : > { %2304 = vmatprep.subr.bf16.mxu0 %v4400_v0 }
 0x1df   : > { %2305 = vmatpush2.bf16.msra.mxu0 %v4398_v2 }
 0x1e0   : > { %2306 = vmatprep.subr.bf16.mxu0 %v4406_v4 }
 0x1e3   : > { %2307 = vmatpush2.bf16.msra.mxu0 %v4404_v6 }
 0x1e4   : > { %2308 = vmatprep.subr.bf16.mxu0 %v4412_v8 }
 0x1e7   : > { %2309 = vmatpush2.bf16.msra.mxu0 %v4410_v10  ;;  %v4425_v10 = vld [vmem:[%s6241_s7 + $0xe8] ss:$16 sps:$4 sm:$0xff]  }
 0x1e8   : > { %2310 = vmatprep.subr.bf16.mxu0 %v4418_v12 }
 0x1eb   : > { %2311 = vmatpush2.bf16.msra.mxu0 %v4416_v13 }
 0x1ec   : > { %2366 = vmatprep.subr.bf16.mxu0 %v4424_v16 }
 0x26e   : > { %v4209_v18 = vpop.f32.mrf.mxu0 }
 0x270   : > { %v4210_v24 = vpop.f32.mrf.mxu0 }
 0x271   : > { %v4211_v25 = vadd.f32 %v4210_v24, %v4209_v18  ;;  %v4433_v18 = vld [vmem:[%s6241_s7 + $0xcc] ss:$16 sps:$4 sm:$0xff]  }
 0x272   : > { %v4212_v26 = vpop.f32.mrf.mxu0 }
 0x273   : > { %v1002_v29 = vadd.f32 %v4211_v25, %v3824_v20 }
 0x274   : > { %v4213_v30 = vpop.f32.mrf.mxu0 }
 0x275   : > { %v5299_v31 = vmax.f32 %v1002_v29, 0.0  ;;  %v4214_v32 = vadd.f32 %v4213_v30, %v4212_v26  ;;  %v4436_v26 = vld [vmem:[%s6241_s7 + $0x4a4] ss:$16 sps:$4 sm:$0xff]  }
 0x277   : > { %v1005_v33 = vadd.f32 %v4214_v32, %v3824_v20  ;;  %v1037_v35 = vrot.slane %v5299_v31, 1  ;;  %v1042_v36 = vrot.slane %v5299_v31, 3  ;;  %v1055_v37 = vrot.slane %v5299_v31, 2 }
 0x278   : > { %v1060_v38 = vrot.slane %v5299_v31, 4  ;;  %v1073_v39 = vrot.slane %v5299_v31, 5  ;;  %v1086_v40 = vrot.slane %v5299_v31, 6  ;;  %v1099_v41 = vrot.slane %v5299_v31, 7 }
 0x279   : > { %v1009_v34 = vmax.f32 %v1005_v33, 0.0 }
 0x27b   : > { %v1038_v42 = vrot.slane %v1009_v34, 1  ;;  %v1043_v43 = vrot.slane %v1009_v34, 3  ;;  %v1056_v44 = vrot.slane %v1009_v34, 2  ;;  %v1061_v45 = vrot.slane %v1009_v34, 4 }
 0x27c   : > { %v1074_v46 = vrot.slane %v1009_v34, 5  ;;  %v5325_v47 = vpack.c.bf16 %v1009_v34, %v5299_v31  ;;  %v1087_v48 = vrot.slane %v1009_v34, 6  ;;  %v1100_v49 = vrot.slane %v1009_v34, 7 }
 0x27d   : > { %v1040_v50 = vsel %vm1039_vm2, %v1037_v35, %v1038_v42  ;;  %v1041_v51 = vsel %vm1039_vm2, %v1038_v42, %v1037_v35  ;;  %v1045_v52 = vsel %vm1044_vm3, %v1042_v36, %v1043_v43  ;;  %v1046_v53 = vsel %vm1044_vm3, %v1043_v43, %v1042_v36  ;;  %v4442_v36 = vld [vmem:[%s6241_s7 + $0x484] ss:$16 sps:$4 sm:$0xff]   ;;  %v4443_v42 = vld [vmem:[%s6241_s7 + $0x88] ss:$16 sps:$4 sm:$0xff]   ;;  %v4446_v43 = vld [vmem:[%s6241_s7 + $0x460] ss:$16 sps:$4 sm:$0xff]  }
 0x27e   : > { %v1053_v54 = vsel %vm1047_vm5, %v1046_v53, %v1040_v50  ;;  %v1054_v55 = vsel %vm1048_vm6, %v1045_v52, %v1041_v51  ;;  %v1058_v56 = vsel %vm1057_vm4, %v1055_v37, %v1056_v44  ;;  %v1059_v57 = vsel %vm1057_vm4, %v1056_v44, %v1055_v37  ;;  %v4437_v37 = vld [vmem:[%s6241_s7 + $0xa8] ss:$16 sps:$4 sm:$0xff]   ;;  %v4451_v44 = vld [vmem:[%s6241_s7 + $0x6c] ss:$16 sps:$4 sm:$0xff]   ;;  %v4460_v50 = vld [vmem:[%s6241_s7 + $0x424] ss:$16 sps:$4 sm:$0xff]  }
 0x27f   : > { %v1112_v58 = vadd.f32 %v1053_v54, %v5299_v31  ;;  %v1113_v59 = vadd.f32 %v1054_v55, %v1009_v34  ;;  %v1123_v60 = vpack.c.bf16 %v1054_v55, %v1053_v54  ;;  %v1063_v61 = vsel %vm1062_vm7, %v1060_v38, %v1061_v45  ;;  %v4439_v34 = vld [vmem:[%s6241_s7 + $0xac] ss:$16 sps:$4 sm:$0xff]   ;;  %v4455_v51 = vld [vmem:[%s6241_s7 + $0x48] ss:$16 sps:$4 sm:$0xff]   ;;  %v4466_v54 = vld [vmem:[%s6241_s7 + $0x404] ss:$16 sps:$4 sm:$0xff]  }
 0x280   : > { %v1064_v63 = vsel %vm1062_vm7, %v1061_v45, %v1060_v38  ;;  %v1072_v0 = vsel %vm1066_vm10, %v1063_v61, %v1059_v57  ;;  %v1076_v1 = vsel %vm1075_vm8, %v1073_v39, %v1074_v46  ;;  %v1077_v2 = vsel %vm1075_vm8, %v1074_v46, %v1073_v39  ;;  %v4440_v39 = vld [vmem:[%s6241_s7 + $0x480] ss:$16 sps:$4 sm:$0xff]   ;;  %v4454_v45 = vld [vmem:[%s6241_s7 + $0x444] ss:$16 sps:$4 sm:$0xff]   ;;  %v4449_v46 = vld [vmem:[%s6241_s7 + $0x68] ss:$16 sps:$4 sm:$0xff]  }
 0x281   : > { %2312 = vmatprep.mubr.bf16.mxu0 %v1123_v60  ;;  %v1071_v3 = vsel %vm1065_vm9, %v1064_v63, %v1058_v56  ;;  %v1084_v4 = vsel %vm1078_vm11, %v1077_v2, %v1045_v52  ;;  %v1085_v5 = vsel %vm1079_vm12, %v1076_v1, %v1046_v53  ;;  %v1115_v6 = vadd.f32 %v1113_v59, %v1072_v0  ;;  %v4458_v52 = vld [vmem:[%s6241_s7 + $0x420] ss:$16 sps:$4 sm:$0xff]   ;;  %v4463_v53 = vld [vmem:[%s6241_s7 + $0x2c] ss:$16 sps:$4 sm:$0xff]   ;;  %v4461_v55 = vld [vmem:[%s6241_s7 + $0x28] ss:$16 sps:$4 sm:$0xff]  }
 0x282   : > { %v1114_v8 = vadd.f32 %v1112_v58, %v1071_v3  ;;  %v5366_v9 = vpack.c.bf16 %v1085_v5, %v1084_v4  ;;  %2313 = vmatmul.mubr.bf16.vlgmr.msra.gmra.mxu0 %v5325_v47  ;;  %v5372_v11 = vpack.c.bf16 %v1072_v0, %v1071_v3  ;;  %v1089_v12 = vsel %vm1088_vm13, %v1086_v40, %v1087_v48  ;;  %v4464_v56 = vld [vmem:[%s6241_s7 + $0x400] ss:$16 sps:$4 sm:$0xff]   ;;  %v4469_v57 = vld [vmem:[%s6241_s7 + $0xc] ss:$16 sps:$4 sm:$0xff]   ;;  %v4472_v58 = vld [vmem:[%s6241_s7 + $0x5e4] ss:$16 sps:$4 sm:$0xff]  }
 0x283   : > { %v1117_v13 = vadd.f32 %v1115_v6, %v1085_v5  ;;  %2367 = vmatpush1.bf16.msra.mxu0 %v4422_v62  ;;  %v1090_v14 = vsel %vm1088_vm13, %v1087_v48, %v1086_v40  ;;  %v1098_v15 = vsel %vm1092_vm14, %v1089_v12, %v1064_v63  ;;  %vm6249_vm2 = vcmp.lt.s32.totalorder %v5153_v21, 1  ;;  %v4445_v40 = vld [vmem:[%s6241_s7 + $0x8c] ss:$16 sps:$4 sm:$0xff]   ;;  %v4452_v48 = vld [vmem:[%s6241_s7 + $0x440] ss:$16 sps:$4 sm:$0xff]  }
 0x284   : > { %v1102_v16 = vsel %vm6249_vm2, %v1099_v41, %v1100_v49  ;;  %v1116_v19 = vadd.f32 %v1114_v8, %v1084_v4  ;;  %2355 = vmatprep.mubr.bf16.mxu1 %v5366_v9  ;;  %v1097_v20 = vsel %vm1091_vm0, %v1090_v14, %v1063_v61  ;;  %vm6250_vm3 = vmmov %vm6249_vm2  ;;  %2368 = vmatprep.subr.bf16.mxu0 %v4430_v7  ;;  %v4467_v59 = vld [vmem:[%s6241_s7 + $0x8] ss:$16 sps:$4 sm:$0xff]   ;;  %v4475_v61 = vld [vmem:[%s6241_s7 + $0x1ec] ss:$16 sps:$4 sm:$0xff]  }
 0x285   : > { %v1103_v24 = vsel %vm6250_vm3, %v1100_v49, %v1099_v41  ;;  %v1111_v25 = vsel %vm1105_vm1, %v1102_v16, %v1077_v2  ;;  %2356 = vmatmul.mubr.bf16.vlgmr.msra.gmra.mxu1 %v5372_v11  ;;  %v1119_v30 = vadd.f32 %v1117_v13, %v1098_v15  ;;  %v5401_v31 = vpack.c.bf16 %v1098_v15, %v1097_v20  ;;  %v4448_v41 = vld [vmem:[%s6241_s7 + $0x464] ss:$16 sps:$4 sm:$0xff]   ;;  %v4457_v49 = vld [vmem:[%s6241_s7 + $0x4c] ss:$16 sps:$4 sm:$0xff]   ;;  %v4473_v63 = vld [vmem:[%s6241_s7 + $0x1e8] ss:$16 sps:$4 sm:$0xff]  }
 0x286   : > { %v1110_v29 = vsel %vm1104_vm15, %v1103_v24, %v1076_v1  ;;  %2410 = vmatpush1.bf16.msra.mxu1 %v4425_v10  ;;  %v1118_v32 = vadd.f32 %v1116_v19, %v1097_v20  ;;  %2441 = vmatprep.mubr.bf16.mxu1 %v1123_v60  ;;  %v4470_v60 = vld [vmem:[%s6241_s7 + $0x5e0] ss:$16 sps:$4 sm:$0xff]   ;;  %v4478_v62 = vld [vmem:[%s6241_s7 + $0x5c4] ss:$16 sps:$4 sm:$0xff]   ;;  %v4481_v1 = vld [vmem:[%s6241_s7 + $0x1cc] ss:$16 sps:$4 sm:$0xff]  }
 0x287   : > { %v5403_v21 = vpack.c.bf16 %v1111_v25, %v1110_v29  ;;  %v5408_v33 = vadd.f32 %v1119_v30, %v1111_v25  ;;  %2411 = vmatprep.subr.bf16.mxu1 %v4433_v18  ;;  %2369 = vmatpush1.bf16.msra.mxu0 %v4428_v17  ;;  %v4476_v0 = vld [vmem:[%s6241_s7 + $0x5c0] ss:$16 sps:$4 sm:$0xff]   ;;  %v4484_v2 = vld [vmem:[%s6241_s7 + $0x5a4] ss:$16 sps:$4 sm:$0xff]   ;;  %v4479_v3 = vld [vmem:[%s6241_s7 + $0x1c8] ss:$16 sps:$4 sm:$0xff]  }
 0x288   : > { %v5416_v35 = vadd.f32 %v1118_v32, %v1110_v29  ;;  %2370 = vmatprep.subr.bf16.mxu0 %v4436_v26  ;;  %v4482_v4 = vld [vmem:[%s6241_s7 + $0x5a0] ss:$16 sps:$4 sm:$0xff]   ;;  %v4487_v5 = vld [vmem:[%s6241_s7 + $0x1ac] ss:$16 sps:$4 sm:$0xff]   ;;  %v4490_v6 = vld [vmem:[%s6241_s7 + $0x584] ss:$16 sps:$4 sm:$0xff]  }
 0x289   : > { %2398 = vmatprep.mubr.bf16.mxu0 %v5403_v21  ;;  %v4485_v7 = vld [vmem:[%s6241_s7 + $0x1a8] ss:$16 sps:$4 sm:$0xff]   ;;  %v4488_v8 = vld [vmem:[%s6241_s7 + $0x580] ss:$16 sps:$4 sm:$0xff]   ;;  %v4493_v10 = vld [vmem:[%s6241_s7 + $0x18c] ss:$16 sps:$4 sm:$0xff]  }
 0x28a   : > { %2412 = vmatpush1.bf16.msra.mxu1 %v4431_v28  ;;  %v2538_v38 = vpack.c.bf16 %v5408_v33, %v5416_v35  ;;  %v4496_v12 = vld [vmem:[%s6241_s7 + $0x564] ss:$16 sps:$4 sm:$0xff]   ;;  %v4491_v13 = vld [vmem:[%s6241_s7 + $0x188] ss:$16 sps:$4 sm:$0xff]   ;;  %v4494_v14 = vld [vmem:[%s6241_s7 + $0x560] ss:$16 sps:$4 sm:$0xff]  }
 0x28b   : > { %2413 = vmatprep.subr.bf16.mxu1 %v4439_v34  ;;  %2371 = vmatpush1.bf16.msra.mxu0 %v4434_v27  ;;  %v4499_v15 = vld [vmem:[%s6241_s7 + $0x16c] ss:$16 sps:$4 sm:$0xff]   ;;  %v4502_v16 = vld [vmem:[%s6241_s7 + $0x544] ss:$16 sps:$4 sm:$0xff]   ;;  %v4497_v17 = vld [vmem:[%s6241_s7 + $0x168] ss:$16 sps:$4 sm:$0xff]  }
 0x28c   : > { %2372 = vmatprep.subr.bf16.mxu0 %v4442_v36  ;;  %v4500_v18 = vld [vmem:[%s6241_s7 + $0x540] ss:$16 sps:$4 sm:$0xff]   ;;  %v4505_v19 = vld [vmem:[%s6241_s7 + $0x14c] ss:$16 sps:$4 sm:$0xff]   ;;  %v4508_v20 = vld [vmem:[%s6241_s7 + $0x524] ss:$16 sps:$4 sm:$0xff]  }
 0x28d   : > { %v4503_v24 = vld [vmem:[%s6241_s7 + $0x148] ss:$16 sps:$4 sm:$0xff]   ;;  %v4506_v25 = vld [vmem:[%s6241_s7 + $0x520] ss:$16 sps:$4 sm:$0xff]   ;;  %v4511_v26 = vld [vmem:[%s6241_s7 + $0x12c] ss:$16 sps:$4 sm:$0xff]  }
 0x28e   : > { %2414 = vmatpush1.bf16.msra.mxu1 %v4437_v37  ;;  %v4514_v29 = vld [vmem:[%s6241_s7 + $0x504] ss:$16 sps:$4 sm:$0xff]   ;;  %v4509_v30 = vld [vmem:[%s6241_s7 + $0x128] ss:$16 sps:$4 sm:$0xff]   ;;  %v4512_v32 = vld [vmem:[%s6241_s7 + $0x500] ss:$16 sps:$4 sm:$0xff]  }
 0x28f   : > { %2415 = vmatprep.subr.bf16.mxu1 %v4445_v40  ;;  %2373 = vmatpush1.bf16.msra.mxu0 %v4440_v39  ;;  %v4517_v28 = vld [vmem:[%s6241_s7 + $0x10c] ss:$16 sps:$4 sm:$0xff]   ;;  %v4515_v34 = vld [vmem:[%s6241_s7 + $0x108] ss:$16 sps:$4 sm:$0xff]  }
 0x290   : > { %2374 = vmatprep.subr.bf16.mxu0 %v4448_v41  ;;  %v4520_v27 = vld [vmem:[%s6241_s7 + $0x2ec] ss:$16 sps:$4 sm:$0xff]   ;;  %v4518_v36 = vld [vmem:[%s6241_s7 + $0x2e8] ss:$16 sps:$4 sm:$0xff]  }
 0x291   : > { %v4523_v37 = vld [vmem:[%s6241_s7 + $0x4ec] ss:$16 sps:$4 sm:$0xff]   ;;  %v4521_v40 = vld [vmem:[%s6241_s7 + $0x4e8] ss:$16 sps:$4 sm:$0xff]  }
 0x292   : > { %2416 = vmatpush1.bf16.msra.mxu1 %v4443_v42  ;;  %v4526_v39 = vld [vmem:[%s6241_s7 + $0x2cc] ss:$16 sps:$4 sm:$0xff]   ;;  %v4524_v41 = vld [vmem:[%s6241_s7 + $0x2c8] ss:$16 sps:$4 sm:$0xff]  }
 0x293   : > { %2417 = vmatprep.subr.bf16.mxu1 %v4451_v44  ;;  %2375 = vmatpush1.bf16.msra.mxu0 %v4446_v43  ;;  %v4529_v42 = vld [vmem:[%s6241_s7 + $0x4cc] ss:$16 sps:$4 sm:$0xff]   ;;  %v4527_v44 = vld [vmem:[%s6241_s7 + $0x4c8] ss:$16 sps:$4 sm:$0xff]  }
 0x294   : > { %2376 = vmatprep.subr.bf16.mxu0 %v4454_v45  ;;  %v4532_v43 = vld [vmem:[%s6241_s7 + $0x2ac] ss:$16 sps:$4 sm:$0xff]   ;;  %v4719_v35 = vld [vmem:[%s6242_s8 + $0x240] ss:$8 sps:$4 sm:$0xff]  }
 0x295   : > { %v4535_v45 = vld [vmem:[%s6241_s7 + $0x4ac] ss:$16 sps:$4 sm:$0xff]  }
 0x296   : > { %2418 = vmatpush1.bf16.msra.mxu1 %v4449_v46  ;;  %v4538_v46 = vld [vmem:[%s6241_s7 + $0x28c] ss:$16 sps:$4 sm:$0xff]  }
 0x297   : > { %2419 = vmatprep.subr.bf16.mxu1 %v4457_v49  ;;  %2377 = vmatpush1.bf16.msra.mxu0 %v4452_v48  ;;  %v4536_v48 = vld [vmem:[%s6241_s7 + $0x288] ss:$16 sps:$4 sm:$0xff]   ;;  %v4541_v49 = vld [vmem:[%s6241_s7 + $0x48c] ss:$16 sps:$4 sm:$0xff]  }
 0x298   : > { %2378 = vmatprep.subr.bf16.mxu0 %v4460_v50  ;;  %v4544_v50 = vld [vmem:[%s6241_s7 + $0x26c] ss:$16 sps:$4 sm:$0xff]  }
 0x299   : > { %v4721_v33 = vld [vmem:[%s6242_s8 + $0x244] ss:$8 sps:$4 sm:$0xff]  }
 0x29a   : > { %2420 = vmatpush1.bf16.msra.mxu1 %v4455_v51  ;;  %v4539_v51 = vld [vmem:[%s6241_s7 + $0x488] ss:$16 sps:$4 sm:$0xff]  }
 0x29b   : > { %2421 = vmatprep.subr.bf16.mxu1 %v4463_v53  ;;  %2379 = vmatpush1.bf16.msra.mxu0 %v4458_v52  ;;  %v4542_v52 = vld [vmem:[%s6241_s7 + $0x268] ss:$16 sps:$4 sm:$0xff]   ;;  %v4547_v53 = vld [vmem:[%s6241_s7 + $0x46c] ss:$16 sps:$4 sm:$0xff]  }
 0x29c   : > { %2380 = vmatprep.subr.bf16.mxu0 %v4466_v54  ;;  %v4550_v54 = vld [vmem:[%s6241_s7 + $0x24c] ss:$16 sps:$4 sm:$0xff]  }
 0x29e   : > { %2422 = vmatpush1.bf16.msra.mxu1 %v4461_v55  ;;  %v4545_v55 = vld [vmem:[%s6241_s7 + $0x468] ss:$16 sps:$4 sm:$0xff]  }
 0x29f   : > { %2423 = vmatprep.subr.bf16.mxu1 %v4469_v57  ;;  %2381 = vmatpush1.bf16.msra.mxu0 %v4464_v56  ;;  %v4548_v56 = vld [vmem:[%s6241_s7 + $0x248] ss:$16 sps:$4 sm:$0xff]   ;;  %v4553_v57 = vld [vmem:[%s6241_s7 + $0x44c] ss:$16 sps:$4 sm:$0xff]  }
 0x2a0   : > { %2382 = vmatprep.subr.bf16.mxu0 %v4472_v58  ;;  %v4556_v58 = vld [vmem:[%s6241_s7 + $0x22c] ss:$16 sps:$4 sm:$0xff]  }
 0x2a2   : > { %2424 = vmatpush1.bf16.msra.mxu1 %v4467_v59  ;;  %v4551_v59 = vld [vmem:[%s6241_s7 + $0x448] ss:$16 sps:$4 sm:$0xff]  }
 0x2a3   : > { %2425 = vmatprep.subr.bf16.mxu1 %v4475_v61  ;;  %2383 = vmatpush2.bf16.msra.mxu0 %v4470_v60  ;;  %v4554_v60 = vld [vmem:[%s6241_s7 + $0x228] ss:$16 sps:$4 sm:$0xff]   ;;  %v4559_v61 = vld [vmem:[%s6241_s7 + $0x42c] ss:$16 sps:$4 sm:$0xff]  }
 0x2a4   : > { %2384 = vmatprep.subr.bf16.mxu0 %v4478_v62  ;;  %v4562_v62 = vld [vmem:[%s6241_s7 + $0x20c] ss:$16 sps:$4 sm:$0xff]  }
 0x2a6   : > { %2426 = vmatpush2.bf16.msra.mxu1 %v4473_v63  ;;  %v4557_v63 = vld [vmem:[%s6241_s7 + $0x428] ss:$16 sps:$4 sm:$0xff]  }
 0x2a7   : > { %2427 = vmatprep.subr.bf16.mxu1 %v4481_v1  ;;  %2385 = vmatpush2.bf16.msra.mxu0 %v4476_v0  ;;  %v4560_v0 = vld [vmem:[%s6241_s7 + $0x208] ss:$16 sps:$4 sm:$0xff]   ;;  %v4565_v1 = vld [vmem:[%s6241_s7 + $0x40c] ss:$16 sps:$4 sm:$0xff]  }
 0x2a8   : > { %2386 = vmatprep.subr.bf16.mxu0 %v4484_v2  ;;  %v4568_v2 = vld [vmem:[%s6241_s7 + $0x3ec] ss:$16 sps:$4 sm:$0xff]  }
 0x2aa   : > { %2428 = vmatpush2.bf16.msra.mxu1 %v4479_v3  ;;  %v4563_v3 = vld [vmem:[%s6241_s7 + $0x408] ss:$16 sps:$4 sm:$0xff]  }
 0x2ab   : > { %2429 = vmatprep.subr.bf16.mxu1 %v4487_v5  ;;  %2387 = vmatpush2.bf16.msra.mxu0 %v4482_v4  ;;  %v4566_v4 = vld [vmem:[%s6241_s7 + $0x3e8] ss:$16 sps:$4 sm:$0xff]   ;;  %v4571_v5 = vld [vmem:[%s6241_s7 + $0x5ec] ss:$16 sps:$4 sm:$0xff]  }
 0x2ac   : > { %2388 = vmatprep.subr.bf16.mxu0 %v4490_v6  ;;  %v4574_v6 = vld [vmem:[%s6241_s7 + $0x3cc] ss:$16 sps:$4 sm:$0xff]  }
 0x2ae   : > { %2430 = vmatpush2.bf16.msra.mxu1 %v4485_v7  ;;  %v4569_v7 = vld [vmem:[%s6241_s7 + $0x5e8] ss:$16 sps:$4 sm:$0xff]  }
 0x2af   : > { %2431 = vmatprep.subr.bf16.mxu1 %v4493_v10  ;;  %2389 = vmatpush2.bf16.msra.mxu0 %v4488_v8  ;;  %v4572_v8 = vld [vmem:[%s6241_s7 + $0x3c8] ss:$16 sps:$4 sm:$0xff]   ;;  %v4577_v10 = vld [vmem:[%s6241_s7 + $0x5cc] ss:$16 sps:$4 sm:$0xff]  }
 0x2b0   : > { %2390 = vmatprep.subr.bf16.mxu0 %v4496_v12  ;;  %v4580_v12 = vld [vmem:[%s6241_s7 + $0x3ac] ss:$16 sps:$4 sm:$0xff]  }
 0x2b2   : > { %2432 = vmatpush2.bf16.msra.mxu1 %v4491_v13  ;;  %v4575_v13 = vld [vmem:[%s6241_s7 + $0x5c8] ss:$16 sps:$4 sm:$0xff]  }
 0x2b3   : > { %2433 = vmatprep.subr.bf16.mxu1 %v4499_v15  ;;  %2391 = vmatpush2.bf16.msra.mxu0 %v4494_v14  ;;  %v4578_v14 = vld [vmem:[%s6241_s7 + $0x3a8] ss:$16 sps:$4 sm:$0xff]   ;;  %v4583_v15 = vld [vmem:[%s6241_s7 + $0x5ac] ss:$16 sps:$4 sm:$0xff]  }
 0x2b4   : > { %2392 = vmatprep.subr.bf16.mxu0 %v4502_v16  ;;  %v4586_v16 = vld [vmem:[%s6241_s7 + $0x38c] ss:$16 sps:$4 sm:$0xff]  }
 0x2b6   : > { %2434 = vmatpush2.bf16.msra.mxu1 %v4497_v17  ;;  %v4581_v17 = vld [vmem:[%s6241_s7 + $0x5a8] ss:$16 sps:$4 sm:$0xff]  }
 0x2b7   : > { %2435 = vmatprep.subr.bf16.mxu1 %v4505_v19  ;;  %2393 = vmatpush2.bf16.msra.mxu0 %v4500_v18  ;;  %v4584_v18 = vld [vmem:[%s6241_s7 + $0x388] ss:$16 sps:$4 sm:$0xff]   ;;  %v4589_v19 = vld [vmem:[%s6241_s7 + $0x58c] ss:$16 sps:$4 sm:$0xff]  }
 0x2b8   : > { %2394 = vmatprep.subr.bf16.mxu0 %v4508_v20  ;;  %v4592_v20 = vld [vmem:[%s6241_s7 + $0x36c] ss:$16 sps:$4 sm:$0xff]  }
 0x2ba   : > { %2436 = vmatpush2.bf16.msra.mxu1 %v4503_v24  ;;  %v4587_v24 = vld [vmem:[%s6241_s7 + $0x588] ss:$16 sps:$4 sm:$0xff]  }
 0x2bb   : > { %2437 = vmatprep.subr.bf16.mxu1 %v4511_v26  ;;  %2395 = vmatpush2.bf16.msra.mxu0 %v4506_v25  ;;  %v4590_v25 = vld [vmem:[%s6241_s7 + $0x368] ss:$16 sps:$4 sm:$0xff]   ;;  %v4595_v26 = vld [vmem:[%s6241_s7 + $0x56c] ss:$16 sps:$4 sm:$0xff]  }
 0x2bc   : > { %2396 = vmatprep.subr.bf16.mxu0 %v4514_v29  ;;  %v4598_v29 = vld [vmem:[%s6241_s7 + $0x34c] ss:$16 sps:$4 sm:$0xff]  }
 0x2be   : > { %2438 = vmatpush2.bf16.msra.mxu1 %v4509_v30  ;;  %v4593_v30 = vld [vmem:[%s6241_s7 + $0x568] ss:$16 sps:$4 sm:$0xff]  }
 0x2bf   : > { %2439 = vmatprep.subr.bf16.mxu1 %v4517_v28  ;;  %2397 = vmatpush2.bf16.msra.mxu0 %v4512_v32  ;;  %v4596_v32 = vld [vmem:[%s6241_s7 + $0x348] ss:$16 sps:$4 sm:$0xff]   ;;  %v4601_v28 = vld [vmem:[%s6241_s7 + $0x54c] ss:$16 sps:$4 sm:$0xff]  }
 0x2c0   : > { %2452 = vmatprep.subr.bf16.mxu0 %v4520_v27  ;;  %v4604_v27 = vld [vmem:[%s6241_s7 + $0x32c] ss:$16 sps:$4 sm:$0xff]  }
 0x2c2   : > { %2440 = vmatpush2.bf16.msra.mxu1 %v4515_v34  ;;  %2399 = vmatmul.mubr.bf16.vlgmr.msra.gmra.mxu0 %v5401_v31  ;;  %v4599_v34 = vld [vmem:[%s6241_s7 + $0x548] ss:$16 sps:$4 sm:$0xff]  }
 0x2c3   : > { %2495 = vmatprep.subr.bf16.mxu1 %v4523_v37  ;;  %2453 = vmatpush1.bf16.msra.mxu0 %v4518_v36  ;;  %v4602_v36 = vld [vmem:[%s6241_s7 + $0x328] ss:$16 sps:$4 sm:$0xff]   ;;  %v4607_v37 = vld [vmem:[%s6241_s7 + $0x52c] ss:$16 sps:$4 sm:$0xff]  }
 0x2c4   : > { %2484 = vmatprep.mubr.bf16.mxu0 %v5366_v9  ;;  %2454 = vmatprep.subr.bf16.mxu0 %v4526_v39  ;;  %v4530_v9 = vld [vmem:[%s6241_s7 + $0x2a8] ss:$16 sps:$4 sm:$0xff]   ;;  %v4610_v39 = vld [vmem:[%s6241_s7 + $0x30c] ss:$16 sps:$4 sm:$0xff]  }
 0x2c5   : > { %2442 = vmatmul.mubr.bf16.vlgmr.msra.gmra.mxu1 %v5325_v47 }
 0x2c6   : > { %2496 = vmatpush1.bf16.msra.mxu1 %v4521_v40  ;;  %2527 = vmatprep.mubr.bf16.mxu1 %v5403_v21  ;;  %v4533_v21 = vld [vmem:[%s6241_s7 + $0x4a8] ss:$16 sps:$4 sm:$0xff]  }
 0x2c7   : > { %2497 = vmatprep.subr.bf16.mxu1 %v4529_v42  ;;  %2455 = vmatpush1.bf16.msra.mxu0 %v4524_v41  ;;  %v4605_v40 = vld [vmem:[%s6241_s7 + $0x528] ss:$16 sps:$4 sm:$0xff]   ;;  %v4613_v42 = vld [vmem:[%s6241_s7 + $0x50c] ss:$16 sps:$4 sm:$0xff]  }
 0x2c8   : > { %2456 = vmatprep.subr.bf16.mxu0 %v4532_v43  ;;  %v4608_v41 = vld [vmem:[%s6241_s7 + $0x308] ss:$16 sps:$4 sm:$0xff]   ;;  %v4616_v43 = vld [vmem:[%s6242_s8 + $0x74] ss:$8 sps:$4 sm:$0xff]  }
 0x2ca   : > { %2498 = vmatpush1.bf16.msra.mxu1 %v4527_v44  ;;  %v4611_v44 = vld [vmem:[%s6241_s7 + $0x508] ss:$16 sps:$4 sm:$0xff]  }
 0x2cb   : > { %2499 = vmatprep.subr.bf16.mxu1 %v4535_v45  ;;  %2457 = vmatpush1.bf16.msra.mxu0 %v4530_v9  ;;  %v4614_v9 = vld [vmem:[%s6242_s8 + $0x70] ss:$8 sps:$4 sm:$0xff]   ;;  %v4619_v45 = vld [vmem:[%s6242_s8 + $0x64] ss:$8 sps:$4 sm:$0xff]  }
 0x2cc   : > { %2458 = vmatprep.subr.bf16.mxu0 %v4538_v46  ;;  %v4664_v46 = vld [vmem:[%s6242_s8 + $0x174] ss:$8 sps:$4 sm:$0xff]  }
 0x2ce   : > { %2500 = vmatpush1.bf16.msra.mxu1 %v4533_v21  ;;  %v4662_v21 = vld [vmem:[%s6242_s8 + $0x170] ss:$8 sps:$4 sm:$0xff]  }
 0x2cf   : > { %2501 = vmatprep.subr.bf16.mxu1 %v4541_v49  ;;  %2459 = vmatpush1.bf16.msra.mxu0 %v4536_v48  ;;  %v4617_v48 = vld [vmem:[%s6242_s8 + $0x60] ss:$8 sps:$4 sm:$0xff]   ;;  %v4667_v49 = vld [vmem:[%s6242_s8 + $0x164] ss:$8 sps:$4 sm:$0xff]  }
 0x2d0   : > { %2460 = vmatprep.subr.bf16.mxu0 %v4544_v50  ;;  %v4620_v50 = vld [vmem:[%s6242_s8 + $0x50] ss:$8 sps:$4 sm:$0xff]  }
 0x2d2   : > { %2502 = vmatpush1.bf16.msra.mxu1 %v4539_v51  ;;  %v4670_v51 = vld [vmem:[%s6242_s8 + $0x154] ss:$8 sps:$4 sm:$0xff]  }
 0x2d3   : > { %2503 = vmatprep.subr.bf16.mxu1 %v4547_v53  ;;  %2461 = vmatpush1.bf16.msra.mxu0 %v4542_v52  ;;  %v4668_v52 = vld [vmem:[%s6242_s8 + $0x150] ss:$8 sps:$4 sm:$0xff]   ;;  %v4623_v53 = vld [vmem:[%s6242_s8 + $0x40] ss:$8 sps:$4 sm:$0xff]  }
 0x2d4   : > { %2462 = vmatprep.subr.bf16.mxu0 %v4550_v54  ;;  %v4673_v54 = vld [vmem:[%s6242_s8 + $0x144] ss:$8 sps:$4 sm:$0xff]  }
 0x2d6   : > { %2504 = vmatpush1.bf16.msra.mxu1 %v4545_v55  ;;  %v4628_v55 = vld [vmem:[%s6242_s8 + $0x34] ss:$8 sps:$4 sm:$0xff]  }
 0x2d7   : > { %2505 = vmatprep.subr.bf16.mxu1 %v4553_v57  ;;  %2463 = vmatpush1.bf16.msra.mxu0 %v4548_v56  ;;  %v4671_v56 = vld [vmem:[%s6242_s8 + $0x140] ss:$8 sps:$4 sm:$0xff]   ;;  %v4626_v57 = vld [vmem:[%s6242_s8 + $0x30] ss:$8 sps:$4 sm:$0xff]  }
 0x2d8   : > { %2464 = vmatprep.subr.bf16.mxu0 %v4556_v58  ;;  %v4676_v58 = vld [vmem:[%s6242_s8 + $0x134] ss:$8 sps:$4 sm:$0xff]  }
 0x2da   : > { %2506 = vmatpush1.bf16.msra.mxu1 %v4551_v59  ;;  %v4631_v59 = vld [vmem:[%s6242_s8 + $0x24] ss:$8 sps:$4 sm:$0xff]  }
 0x2db   : > { %2507 = vmatprep.subr.bf16.mxu1 %v4559_v61  ;;  %2465 = vmatpush1.bf16.msra.mxu0 %v4554_v60  ;;  %v4674_v60 = vld [vmem:[%s6242_s8 + $0x130] ss:$8 sps:$4 sm:$0xff]   ;;  %v4629_v61 = vld [vmem:[%s6242_s8 + $0x20] ss:$8 sps:$4 sm:$0xff]  }
 0x2dc   : > { %2466 = vmatprep.subr.bf16.mxu0 %v4562_v62  ;;  %v4679_v62 = vld [vmem:[%s6242_s8 + $0x124] ss:$8 sps:$4 sm:$0xff]  }
 0x2de   : > { %2508 = vmatpush1.bf16.msra.mxu1 %v4557_v63  ;;  %v4634_v63 = vld [vmem:[%s6242_s8 + $0x14] ss:$8 sps:$4 sm:$0xff]  }
 0x2df   : > { %2509 = vmatprep.subr.bf16.mxu1 %v4565_v1  ;;  %2467 = vmatpush1.bf16.msra.mxu0 %v4560_v0  ;;  %v4677_v0 = vld [vmem:[%s6242_s8 + $0x120] ss:$8 sps:$4 sm:$0xff]   ;;  %v4632_v1 = vld [vmem:[%s6242_s8 + $0x10] ss:$8 sps:$4 sm:$0xff]  }
 0x2e0   : > { %2468 = vmatprep.subr.bf16.mxu0 %v4568_v2  ;;  %v4682_v2 = vld [vmem:[%s6242_s8 + $0x114] ss:$8 sps:$4 sm:$0xff]  }
 0x2e2   : > { %2510 = vmatpush1.bf16.msra.mxu1 %v4563_v3  ;;  %v4637_v3 = vld [vmem:[%s6242_s8 + $0x4] ss:$8 sps:$4 sm:$0xff]  }
 0x2e3   : > { %2511 = vmatprep.subr.bf16.mxu1 %v4571_v5  ;;  %2469 = vmatpush2.bf16.msra.mxu0 %v4566_v4  ;;  %v4680_v4 = vld [vmem:[%s6242_s8 + $0x110] ss:$8 sps:$4 sm:$0xff]   ;;  %v4635_v5 = vld [vmem:[%s6242_s8] ss:$8 sps:$4 sm:$0xff]  }
 0x2e4   : > { %2470 = vmatprep.subr.bf16.mxu0 %v4574_v6  ;;  %v4685_v6 = vld [vmem:[%s6242_s8 + $0x104] ss:$8 sps:$4 sm:$0xff]  }
 0x2e6   : > { %2512 = vmatpush2.bf16.msra.mxu1 %v4569_v7  ;;  %v4640_v7 = vld [vmem:[%s6242_s8 + $0xf4] ss:$8 sps:$4 sm:$0xff]  }
 0x2e7   : > { %2513 = vmatprep.subr.bf16.mxu1 %v4577_v10  ;;  %2471 = vmatpush2.bf16.msra.mxu0 %v4572_v8  ;;  %v4683_v8 = vld [vmem:[%s6242_s8 + $0x100] ss:$8 sps:$4 sm:$0xff]   ;;  %v4638_v10 = vld [vmem:[%s6242_s8 + $0xf0] ss:$8 sps:$4 sm:$0xff]  }
 0x2e8   : > { %2472 = vmatprep.subr.bf16.mxu0 %v4580_v12  ;;  %v4688_v12 = vld [vmem:[%s6242_s8 + $0x1f4] ss:$8 sps:$4 sm:$0xff]  }
 0x2ea   : > { %2514 = vmatpush2.bf16.msra.mxu1 %v4575_v13  ;;  %v4643_v13 = vld [vmem:[%s6242_s8 + $0xe4] ss:$8 sps:$4 sm:$0xff]  }
 0x2eb   : > { %2515 = vmatprep.subr.bf16.mxu1 %v4583_v15  ;;  %2473 = vmatpush2.bf16.msra.mxu0 %v4578_v14  ;;  %v4686_v14 = vld [vmem:[%s6242_s8 + $0x1f0] ss:$8 sps:$4 sm:$0xff]   ;;  %v4641_v15 = vld [vmem:[%s6242_s8 + $0xe0] ss:$8 sps:$4 sm:$0xff]  }
 0x2ec   : > { %2474 = vmatprep.subr.bf16.mxu0 %v4586_v16  ;;  %v4691_v16 = vld [vmem:[%s6242_s8 + $0x1e4] ss:$8 sps:$4 sm:$0xff]  }
 0x2ee   : > { %2516 = vmatpush2.bf16.msra.mxu1 %v4581_v17  ;;  %v4646_v17 = vld [vmem:[%s6242_s8 + $0xd4] ss:$8 sps:$4 sm:$0xff]  }
 0x2ef   : > { %2517 = vmatprep.subr.bf16.mxu1 %v4589_v19  ;;  %2475 = vmatpush2.bf16.msra.mxu0 %v4584_v18  ;;  %v4689_v18 = vld [vmem:[%s6242_s8 + $0x1e0] ss:$8 sps:$4 sm:$0xff]   ;;  %v4644_v19 = vld [vmem:[%s6242_s8 + $0xd0] ss:$8 sps:$4 sm:$0xff]  }
 0x2f0   : > { %2476 = vmatprep.subr.bf16.mxu0 %v4592_v20  ;;  %v4694_v20 = vld [vmem:[%s6242_s8 + $0x1d4] ss:$8 sps:$4 sm:$0xff]  }
 0x2f2   : > { %2518 = vmatpush2.bf16.msra.mxu1 %v4587_v24  ;;  %v4649_v24 = vld [vmem:[%s6242_s8 + $0xc4] ss:$8 sps:$4 sm:$0xff]  }
 0x2f3   : > { %2519 = vmatprep.subr.bf16.mxu1 %v4595_v26  ;;  %2477 = vmatpush2.bf16.msra.mxu0 %v4590_v25  ;;  %v4692_v25 = vld [vmem:[%s6242_s8 + $0x1d0] ss:$8 sps:$4 sm:$0xff]   ;;  %v4647_v26 = vld [vmem:[%s6242_s8 + $0xc0] ss:$8 sps:$4 sm:$0xff]  }
 0x2f4   : > { %2478 = vmatprep.subr.bf16.mxu0 %v4598_v29  ;;  %v4697_v29 = vld [vmem:[%s6242_s8 + $0x1c4] ss:$8 sps:$4 sm:$0xff]  }
 0x2f6   : > { %2520 = vmatpush2.bf16.msra.mxu1 %v4593_v30  ;;  %v4652_v30 = vld [vmem:[%s6242_s8 + $0xb4] ss:$8 sps:$4 sm:$0xff]  }
 0x2f7   : > { %2521 = vmatprep.subr.bf16.mxu1 %v4601_v28  ;;  %2479 = vmatpush2.bf16.msra.mxu0 %v4596_v32  ;;  %v4695_v32 = vld [vmem:[%s6242_s8 + $0x1c0] ss:$8 sps:$4 sm:$0xff]   ;;  %v4650_v28 = vld [vmem:[%s6242_s8 + $0xb0] ss:$8 sps:$4 sm:$0xff]  }
 0x2f8   : > { %2480 = vmatprep.subr.bf16.mxu0 %v4604_v27  ;;  %v4700_v27 = vld [vmem:[%s6242_s8 + $0x1b4] ss:$8 sps:$4 sm:$0xff]  }
 0x2fa   : > { %2522 = vmatpush2.bf16.msra.mxu1 %v4599_v34  ;;  %v4655_v34 = vld [vmem:[%s6242_s8 + $0xa4] ss:$8 sps:$4 sm:$0xff]  }
 0x2fb   : > { %2523 = vmatprep.subr.bf16.mxu1 %v4607_v37  ;;  %2481 = vmatpush2.bf16.msra.mxu0 %v4602_v36  ;;  %v4698_v36 = vld [vmem:[%s6242_s8 + $0x1b0] ss:$8 sps:$4 sm:$0xff]   ;;  %v4653_v37 = vld [vmem:[%s6242_s8 + $0xa0] ss:$8 sps:$4 sm:$0xff]  }
 0x2fc   : > { %2482 = vmatprep.subr.bf16.mxu0 %v4610_v39  ;;  %v4703_v39 = vld [vmem:[%s6242_s8 + $0x1a4] ss:$8 sps:$4 sm:$0xff]  }
 0x2fe   : > { %2524 = vmatpush2.bf16.msra.mxu1 %v4605_v40  ;;  %v4658_v40 = vld [vmem:[%s6242_s8 + $0x94] ss:$8 sps:$4 sm:$0xff]  }
 0x2ff   : > { %2525 = vmatprep.subr.bf16.mxu1 %v4613_v42  ;;  %2483 = vmatpush2.bf16.msra.mxu0 %v4608_v41  ;;  %v4701_v41 = vld [vmem:[%s6242_s8 + $0x1a0] ss:$8 sps:$4 sm:$0xff]   ;;  %v4656_v42 = vld [vmem:[%s6242_s8 + $0x90] ss:$8 sps:$4 sm:$0xff]  }
 0x300   : > { %3131 = vmatprep.subr.bf16.mxu0 %v4616_v43  ;;  %v4706_v43 = vld [vmem:[%s6242_s8 + $0x194] ss:$8 sps:$4 sm:$0xff]  }
 0x302   : > { %2526 = vmatpush2.bf16.msra.mxu1 %v4611_v44  ;;  %2485 = vmatmul.mubr.bf16.vlgmr.msra.gmra.mxu0 %v5372_v11  ;;  %v4622_v11 = vld [vmem:[%s6242_s8 + $0x54] ss:$8 sps:$4 sm:$0xff]   ;;  %v4661_v44 = vld [vmem:[%s6242_s8 + $0x84] ss:$8 sps:$4 sm:$0xff]  }
 0x303   : > { %3132 = vmatpush1.bf16.msra.mxu0 %v4614_v9  ;;  %3163 = vmatprep.mubr.bf16.mxu0 %v5325_v47  ;;  %v4665_v47 = vld [vmem:[%s6242_s8 + $0x160] ss:$8 sps:$4 sm:$0xff]   ;;  %v4704_v9 = vld [vmem:[%s6242_s8 + $0x190] ss:$8 sps:$4 sm:$0xff]  }
 0x304   : > { %3133 = vmatprep.subr.bf16.mxu0 %v4619_v45  ;;  %3174 = vmatprep.subr.bf16.mxu1 %v4664_v46  ;;  %v4659_v45 = vld [vmem:[%s6242_s8 + $0x80] ss:$8 sps:$4 sm:$0xff]   ;;  %v4709_v46 = vld [vmem:[%s6242_s8 + $0x184] ss:$8 sps:$4 sm:$0xff]  }
 0x305   : > { %2528 = vmatmul.mubr.bf16.vlgmr.msra.gmra.mxu1 %v5401_v31  ;;  %v4625_v31 = vld [vmem:[%s6242_s8 + $0x44] ss:$8 sps:$4 sm:$0xff]  }
 0x306   : > { %3175 = vmatpush1.bf16.msra.mxu1 %v4662_v21  ;;  %v4712_v21 = vld [vmem:[%s6242_s8 + $0x274] ss:$8 sps:$4 sm:$0xff]  }
 0x307   : > { %3134 = vmatpush1.bf16.msra.mxu0 %v4617_v48  ;;  %3176 = vmatprep.subr.bf16.mxu1 %v4667_v49  ;;  %v4707_v48 = vld [vmem:[%s6242_s8 + $0x180] ss:$8 sps:$4 sm:$0xff]   ;;  %v4710_v49 = vld [vmem:[%s6242_s8 + $0x270] ss:$8 sps:$4 sm:$0xff]  }
 0x308   : > { %3135 = vmatprep.subr.bf16.mxu0 %v4622_v11  ;;  %v4715_v11 = vld [vmem:[%s6242_s8 + $0x264] ss:$8 sps:$4 sm:$0xff]  }
 0x30a   : > { %3177 = vmatpush1.bf16.msra.mxu1 %v4665_v47  ;;  %v4713_v47 = vld [vmem:[%s6242_s8 + $0x260] ss:$8 sps:$4 sm:$0xff]  }
 0x30b   : > { %3136 = vmatpush1.bf16.msra.mxu0 %v4620_v50  ;;  %3178 = vmatprep.subr.bf16.mxu1 %v4670_v51  ;;  %v4718_v50 = vld [vmem:[%s6242_s8 + $0x254] ss:$8 sps:$4 sm:$0xff]   ;;  %v4716_v51 = vld [vmem:[%s6242_s8 + $0x250] ss:$8 sps:$4 sm:$0xff]  }
 0x30c   : > { %3137 = vmatprep.subr.bf16.mxu0 %v4625_v31  ;;  %v4722_v31 = vld [vmem:[%s6242_s8 + $0x230] ss:$8 sps:$4 sm:$0xff]  }
 0x30e   : > { %3179 = vmatpush1.bf16.msra.mxu1 %v4668_v52  ;;  %v4727_v52 = vld [vmem:[%s6242_s8 + $0x224] ss:$8 sps:$4 sm:$0xff]  }
 0x30f   : > { %3138 = vmatpush1.bf16.msra.mxu0 %v4623_v53  ;;  %3180 = vmatprep.subr.bf16.mxu1 %v4673_v54  ;;  %v4725_v53 = vld [vmem:[%s6242_s8 + $0x220] ss:$8 sps:$4 sm:$0xff]   ;;  %v4730_v54 = vld [vmem:[%s6242_s8 + $0x214] ss:$8 sps:$4 sm:$0xff]  }
 0x310   : > { %3139 = vmatprep.subr.bf16.mxu0 %v4628_v55  ;;  %v4728_v55 = vld [vmem:[%s6242_s8 + $0x210] ss:$8 sps:$4 sm:$0xff]  }
 0x312   : > { %3181 = vmatpush1.bf16.msra.mxu1 %v4671_v56  ;;  %v4733_v56 = vld [vmem:[%s6242_s8 + $0x204] ss:$8 sps:$4 sm:$0xff]  }
 0x313   : > { %3140 = vmatpush1.bf16.msra.mxu0 %v4626_v57  ;;  %3182 = vmatprep.subr.bf16.mxu1 %v4676_v58  ;;  %v4731_v57 = vld [vmem:[%s6242_s8 + $0x200] ss:$8 sps:$4 sm:$0xff]   ;;  %v4736_v58 = vld [vmem:[%s6242_s8 + $0x2f4] ss:$8 sps:$4 sm:$0xff]  }
 0x314   : > { %3141 = vmatprep.subr.bf16.mxu0 %v4631_v59  ;;  %v4734_v59 = vld [vmem:[%s6242_s8 + $0x2f0] ss:$8 sps:$4 sm:$0xff]  }
 0x316   : > { %3183 = vmatpush1.bf16.msra.mxu1 %v4674_v60  ;;  %v4739_v60 = vld [vmem:[%s6242_s8 + $0x2e4] ss:$8 sps:$4 sm:$0xff]  }
 0x317   : > { %3142 = vmatpush1.bf16.msra.mxu0 %v4629_v61  ;;  %3184 = vmatprep.subr.bf16.mxu1 %v4679_v62  ;;  %v4737_v61 = vld [vmem:[%s6242_s8 + $0x2e0] ss:$8 sps:$4 sm:$0xff]   ;;  %v4742_v62 = vld [vmem:[%s6242_s8 + $0x2d4] ss:$8 sps:$4 sm:$0xff]  }
 0x318   : > { %3143 = vmatprep.subr.bf16.mxu0 %v4634_v63  ;;  %v4740_v63 = vld [vmem:[%s6242_s8 + $0x2d0] ss:$8 sps:$4 sm:$0xff]  }
 0x31a   : > { %3185 = vmatpush1.bf16.msra.mxu1 %v4677_v0  ;;  %v4745_v0 = vld [vmem:[%s6242_s8 + $0x2c4] ss:$8 sps:$4 sm:$0xff]  }
 0x31b   : > { %3144 = vmatpush1.bf16.msra.mxu0 %v4632_v1  ;;  %3186 = vmatprep.subr.bf16.mxu1 %v4682_v2  ;;  %v4743_v1 = vld [vmem:[%s6242_s8 + $0x2c0] ss:$8 sps:$4 sm:$0xff]   ;;  %v4748_v2 = vld [vmem:[%s6242_s8 + $0x2b4] ss:$8 sps:$4 sm:$0xff]  }
 0x31c   : > { %3145 = vmatprep.subr.bf16.mxu0 %v4637_v3  ;;  %v4746_v3 = vld [vmem:[%s6242_s8 + $0x2b0] ss:$8 sps:$4 sm:$0xff]  }
 0x31e   : > { %3187 = vmatpush1.bf16.msra.mxu1 %v4680_v4  ;;  %v4751_v4 = vld [vmem:[%s6242_s8 + $0x2a4] ss:$8 sps:$4 sm:$0xff]  }
 0x31f   : > { %3146 = vmatpush1.bf16.msra.mxu0 %v4635_v5  ;;  %3188 = vmatprep.subr.bf16.mxu1 %v4685_v6  ;;  %v4749_v5 = vld [vmem:[%s6242_s8 + $0x2a0] ss:$8 sps:$4 sm:$0xff]  }
 0x320   : > { %3147 = vmatprep.subr.bf16.mxu0 %v4640_v7  ;;  %v4754_v7 = vld [vmem:[%s6242_s8 + $0x294] ss:$8 sps:$4 sm:$0xff]  }
 0x322   : > { %3189 = vmatpush1.bf16.msra.mxu1 %v4683_v8  ;;  %v4752_v8 = vld [vmem:[%s6242_s8 + $0x290] ss:$8 sps:$4 sm:$0xff]  }
 0x323   : > { %3148 = vmatpush2.bf16.msra.mxu0 %v4638_v10  ;;  %3190 = vmatprep.subr.bf16.mxu1 %v4688_v12 }
 0x324   : > { %3149 = vmatprep.subr.bf16.mxu0 %v4643_v13  ;;  %v4757_v13 = vld [vmem:[%s6242_s8 + $0x284] ss:$8 sps:$4 sm:$0xff]  }
 0x326   : > { %3191 = vmatpush2.bf16.msra.mxu1 %v4686_v14  ;;  %v4755_v14 = vld [vmem:[%s6242_s8 + $0x280] ss:$8 sps:$4 sm:$0xff]  }
 0x327   : > { %3150 = vmatpush2.bf16.msra.mxu0 %v4641_v15  ;;  %3192 = vmatprep.subr.bf16.mxu1 %v4691_v16 }
 0x328   : > { %3151 = vmatprep.subr.bf16.mxu0 %v4646_v17 }
 0x32a   : > { %3193 = vmatpush2.bf16.msra.mxu1 %v4689_v18 }
 0x32b   : > { %3152 = vmatpush2.bf16.msra.mxu0 %v4644_v19  ;;  %3194 = vmatprep.subr.bf16.mxu1 %v4694_v20 }
 0x32c   : > { %3153 = vmatprep.subr.bf16.mxu0 %v4649_v24 }
 0x32e   : > { %3195 = vmatpush2.bf16.msra.mxu1 %v4692_v25 }
 0x32f   : > { %3154 = vmatpush2.bf16.msra.mxu0 %v4647_v26  ;;  %3196 = vmatprep.subr.bf16.mxu1 %v4697_v29 }
 0x330   : > { %3155 = vmatprep.subr.bf16.mxu0 %v4652_v30 }
 0x332   : > { %3197 = vmatpush2.bf16.msra.mxu1 %v4695_v32 }
 0x333   : > { %3156 = vmatpush2.bf16.msra.mxu0 %v4650_v28  ;;  %3198 = vmatprep.subr.bf16.mxu1 %v4700_v27 }
 0x334   : > { %3157 = vmatprep.subr.bf16.mxu0 %v4655_v34 }
 0x336   : > { %3199 = vmatpush2.bf16.msra.mxu1 %v4698_v36 }
 0x337   : > { %3158 = vmatpush2.bf16.msra.mxu0 %v4653_v37  ;;  %3200 = vmatprep.subr.bf16.mxu1 %v4703_v39 }
 0x338   : > { %3159 = vmatprep.subr.bf16.mxu0 %v4658_v40 }
 0x33a   : > { %3201 = vmatpush2.bf16.msra.mxu1 %v4701_v41 }
 0x33b   : > { %3160 = vmatpush2.bf16.msra.mxu0 %v4656_v42  ;;  %3202 = vmatprep.subr.bf16.mxu1 %v4706_v43 }
 0x33c   : > { %3161 = vmatprep.subr.bf16.mxu0 %v4661_v44 }
 0x33e   : > { %3203 = vmatpush2.bf16.msra.mxu1 %v4704_v9 }
 0x33f   : > { %3162 = vmatpush2.bf16.msra.mxu0 %v4659_v45  ;;  %3204 = vmatprep.subr.bf16.mxu1 %v4709_v46 }
 0x340   : > { %3217 = vmatprep.subr.bf16.mxu0 %v4712_v21 }
 0x342   : > { %3164 = vmatmul.mubr.bf16.vlgmr.msra.gmra.mxu0 %v2538_v38  ;;  %3205 = vmatpush2.bf16.msra.mxu1 %v4707_v48  ;;  %v4724_v38 = vld [vmem:[%s6242_s8 + $0x234] ss:$8 sps:$4 sm:$0xff]   ;;  %v2314_v6 = vpop.f32.mrf.mxu0 }
 0x343   : > { %3218 = vmatpush1.bf16.msra.mxu0 %v4710_v49 }
 0x344   : > { %3219 = vmatprep.subr.bf16.mxu0 %v4715_v11  ;;  %v2316_v12 = vpop.f32.mrf.mxu0 }
 0x345   : > { %v2357_v10 = vpop.f32.mrf.mxu1 }
 0x346   : > { %v2318_v16 = vpop.f32.mrf.mxu0  ;;  %v2358_v32 = vadd.f32 %v2357_v10, %v2314_v6  ;;  %v4781_v6 = vld [vmem:[%s6244_s10 + $0x4] ss:$8 sps:$4 sm:$0xff]   ;;  %v4782_v10 = vld [vmem:[%s6244_s10 + $0xf0] ss:$8 sps:$4 sm:$0xff]  }
 0x347   : > { %3220 = vmatpush1.bf16.msra.mxu0 %v4713_v47  ;;  %v2359_v15 = vpop.f32.mrf.mxu1 }
 0x348   : > { %3221 = vmatprep.subr.bf16.mxu0 %v4718_v50  ;;  %v2320_v18 = vpop.f32.mrf.mxu0  ;;  %v2360_v29 = vadd.f32 %v2359_v15, %v2316_v12  ;;  %v4787_v12 = vld [vmem:[%s6244_s10 + $0xe4] ss:$8 sps:$4 sm:$0xff]   ;;  %v4788_v15 = vld [vmem:[%s6244_s10 + $0xd0] ss:$8 sps:$4 sm:$0xff]  }
 0x349   : > { %v2361_v17 = vpop.f32.mrf.mxu1 }
 0x34a   : > { %v2362_v25 = vadd.f32 %v2361_v17, %v2318_v16  ;;  %v4793_v16 = vld [vmem:[%s6244_s10 + $0xc4] ss:$8 sps:$4 sm:$0xff]   ;;  %v4791_v17 = vld [vmem:[%s6244_s10 + $0xc0] ss:$8 sps:$4 sm:$0xff]  }
 0x34b   : > { %3222 = vmatpush1.bf16.msra.mxu0 %v4716_v51  ;;  %v2363_v20 = vpop.f32.mrf.mxu1 }
 0x34c   : > { %3223 = vmatprep.subr.bf16.mxu0 %v4721_v33  ;;  %v2364_v30 = vadd.f32 %v2363_v20, %v2320_v18  ;;  %v4796_v18 = vld [vmem:[%s6244_s10 + $0xb4] ss:$8 sps:$4 sm:$0xff]   ;;  %v4797_v20 = vld [vmem:[%s6244_s10 + $0xa0] ss:$8 sps:$4 sm:$0xff]  }
 0x34f   : > { %3224 = vmatpush1.bf16.msra.mxu0 %v4719_v35 }
 0x350   : > { %3225 = vmatprep.subr.bf16.mxu0 %v4724_v38 }
 0x353   : > { %3226 = vmatpush1.bf16.msra.mxu0 %v4722_v31 }
 0x354   : > { %3227 = vmatprep.subr.bf16.mxu0 %v4727_v52 }
 0x357   : > { %3228 = vmatpush1.bf16.msra.mxu0 %v4725_v53 }
 0x358   : > { %3229 = vmatprep.subr.bf16.mxu0 %v4730_v54 }
 0x35b   : > { %3230 = vmatpush1.bf16.msra.mxu0 %v4728_v55 }
 0x35c   : > { %3231 = vmatprep.subr.bf16.mxu0 %v4733_v56  ;;  %v4758_v56 = vld [vmem:[%s6244_s10 + $0x70] ss:$8 sps:$4 sm:$0xff]  }
 0x35f   : > { %3232 = vmatpush1.bf16.msra.mxu0 %v4731_v57  ;;  %v4760_v57 = vld [vmem:[%s6244_s10 + $0x74] ss:$8 sps:$4 sm:$0xff]  }
 0x360   : > { %3233 = vmatprep.subr.bf16.mxu0 %v4736_v58  ;;  %v4763_v58 = vld [vmem:[%s6244_s10 + $0x64] ss:$8 sps:$4 sm:$0xff]   ;;  %3470 = vmatprep.subr.bf16.mxu1 %v4760_v57 }
 0x363   : > { %3234 = vmatpush2.bf16.msra.mxu0 %v4734_v59  ;;  %v4761_v59 = vld [vmem:[%s6244_s10 + $0x60] ss:$8 sps:$4 sm:$0xff]  }
 0x364   : > { %3235 = vmatprep.subr.bf16.mxu0 %v4739_v60  ;;  %v4766_v60 = vld [vmem:[%s6244_s10 + $0x54] ss:$8 sps:$4 sm:$0xff]  }
 0x367   : > { %3236 = vmatpush2.bf16.msra.mxu0 %v4737_v61  ;;  %v4764_v61 = vld [vmem:[%s6244_s10 + $0x50] ss:$8 sps:$4 sm:$0xff]  }
 0x368   : > { %3237 = vmatprep.subr.bf16.mxu0 %v4742_v62  ;;  %v4769_v62 = vld [vmem:[%s6244_s10 + $0x44] ss:$8 sps:$4 sm:$0xff]  }
 0x36b   : > { %3238 = vmatpush2.bf16.msra.mxu0 %v4740_v63  ;;  %v4767_v63 = vld [vmem:[%s6244_s10 + $0x40] ss:$8 sps:$4 sm:$0xff]  }
 0x36c   : > { %3239 = vmatprep.subr.bf16.mxu0 %v4745_v0  ;;  %v4772_v0 = vld [vmem:[%s6244_s10 + $0x34] ss:$8 sps:$4 sm:$0xff]  }
 0x36f   : > { %3240 = vmatpush2.bf16.msra.mxu0 %v4743_v1  ;;  %v4770_v1 = vld [vmem:[%s6244_s10 + $0x30] ss:$8 sps:$4 sm:$0xff]  }
 0x370   : > { %3241 = vmatprep.subr.bf16.mxu0 %v4748_v2  ;;  %v4775_v2 = vld [vmem:[%s6244_s10 + $0x24] ss:$8 sps:$4 sm:$0xff]  }
 0x373   : > { %3242 = vmatpush2.bf16.msra.mxu0 %v4746_v3  ;;  %v4773_v3 = vld [vmem:[%s6244_s10 + $0x20] ss:$8 sps:$4 sm:$0xff]  }
 0x374   : > { %3243 = vmatprep.subr.bf16.mxu0 %v4751_v4  ;;  %v4778_v4 = vld [vmem:[%s6244_s10 + $0x14] ss:$8 sps:$4 sm:$0xff]  }
 0x377   : > { %3244 = vmatpush2.bf16.msra.mxu0 %v4749_v5  ;;  %v4776_v5 = vld [vmem:[%s6244_s10 + $0x10] ss:$8 sps:$4 sm:$0xff]  }
 0x378   : > { %3245 = vmatprep.subr.bf16.mxu0 %v4754_v7  ;;  %v4779_v7 = vld [vmem:[%s6244_s10] ss:$8 sps:$4 sm:$0xff]  }
 0x37b   : > { %3246 = vmatpush2.bf16.msra.mxu0 %v4752_v8  ;;  %v4784_v8 = vld [vmem:[%s6244_s10 + $0xf4] ss:$8 sps:$4 sm:$0xff]  }
 0x37c   : > { %3247 = vmatprep.subr.bf16.mxu0 %v4757_v13  ;;  %v4785_v13 = vld [vmem:[%s6244_s10 + $0xe0] ss:$8 sps:$4 sm:$0xff]  }
 0x37f   : > { %3248 = vmatpush2.bf16.msra.mxu0 %v4755_v14  ;;  %v4790_v14 = vld [vmem:[%s6244_s10 + $0xd4] ss:$8 sps:$4 sm:$0xff]  }
 0x382   : > { %v2400_v19 = vpop.f32.mrf.mxu0 }
 0x383   : > { %v2401_v37 = vadd.f32 %v2400_v19, %v2358_v32  ;;  %v4794_v19 = vld [vmem:[%s6244_s10 + $0xb0] ss:$8 sps:$4 sm:$0xff]  }
 0x384   : > { %v2402_v24 = vpop.f32.mrf.mxu0  ;;  %v4806_v32 = vld [vmem:[%s6246_s12 + $0x78] sm:$0xff]  }
 0x385   : > { %v2403_v34 = vadd.f32 %v2402_v24, %v2360_v29  ;;  %v2443_v41 = vpop.f32.mrf.mxu1  ;;  %v4799_v24 = vld [vmem:[%s6244_s10 + $0xa4] ss:$8 sps:$4 sm:$0xff]   ;;  %4215 = vmatprep.subr.bf16.mxu0 %v4806_v32 }
 0x386   : > { %v2404_v26 = vpop.f32.mrf.mxu0  ;;  %v4805_v29 = vld [vmem:[%s6244_s10 + $0x84] ss:$8 sps:$4 sm:$0xff]  }
 0x387   : > { %v2405_v28 = vadd.f32 %v2404_v26, %v2362_v25  ;;  %v2445_v42 = vpop.f32.mrf.mxu1  ;;  %v4802_v25 = vld [vmem:[%s6244_s10 + $0x94] ss:$8 sps:$4 sm:$0xff]   ;;  %v4800_v26 = vld [vmem:[%s6244_s10 + $0x90] ss:$8 sps:$4 sm:$0xff]  }
 0x388   : > { %v2406_v27 = vpop.f32.mrf.mxu0 }
 0x389   : > { %v2407_v36 = vadd.f32 %v2406_v27, %v2364_v30  ;;  %v2539_v40 = vpack.c.bf16 %v2405_v28, %v2401_v37  ;;  %v2447_v43 = vpop.f32.mrf.mxu1  ;;  %v4803_v30 = vld [vmem:[%s6244_s10 + $0x80] ss:$8 sps:$4 sm:$0xff]   ;;  %v4807_v28 = vld [vmem:[%s6246_s12 + $0x38] sm:$0xff]   ;;  %v4808_v27 = vld [vmem:[%s6246_s12 + $0x70] sm:$0xff]  }
 0x38a   : > { %v4811_v37 = vld [vmem:[%s6246_s12 + $0x28] sm:$0xff]  }
 0x38b   : > { %v2540_v39 = vpack.c.bf16 %v2407_v36, %v2403_v34  ;;  %v2449_v9 = vpop.f32.mrf.mxu1  ;;  %v4809_v34 = vld [vmem:[%s6246_s12 + $0x30] sm:$0xff]   ;;  %v4810_v36 = vld [vmem:[%s6246_s12 + $0x68] sm:$0xff]  }
 0x38d   : > { %3206 = vmatprep.mubr.bf16.mxu1 %v2540_v39  ;;  %v4812_v39 = vld [vmem:[%s6246_s12 + $0x60] sm:$0xff]  }
 0x38e   : > { %3207 = vmatmul.mubr.bf16.vlgmr.msra.gmra.mxu1 %v2539_v40  ;;  %v4813_v40 = vld [vmem:[%s6246_s12 + $0x20] sm:$0xff]  }
 0x38f   : > { %3471 = vmatpush1.bf16.msra.mxu1 %v4758_v56 }
 0x390   : > { %3472 = vmatprep.subr.bf16.mxu1 %v4763_v58 }
 0x393   : > { %3473 = vmatpush1.bf16.msra.mxu1 %v4761_v59 }
 0x394   : > { %3474 = vmatprep.subr.bf16.mxu1 %v4766_v60 }
 0x397   : > { %3475 = vmatpush1.bf16.msra.mxu1 %v4764_v61 }
 0x398   : > { %3476 = vmatprep.subr.bf16.mxu1 %v4769_v62 }
 0x39b   : > { %3477 = vmatpush1.bf16.msra.mxu1 %v4767_v63 }
 0x39c   : > { %3478 = vmatprep.subr.bf16.mxu1 %v4772_v0 }
 0x39f   : > { %3479 = vmatpush1.bf16.msra.mxu1 %v4770_v1 }
 0x3a0   : > { %3480 = vmatprep.subr.bf16.mxu1 %v4775_v2 }
 0x3a3   : > { %3481 = vmatpush1.bf16.msra.mxu1 %v4773_v3 }
 0x3a4   : > { %3482 = vmatprep.subr.bf16.mxu1 %v4778_v4 }
 0x3a7   : > { %3483 = vmatpush1.bf16.msra.mxu1 %v4776_v5  ;;  %v4816_v5 = vld [vmem:[%s6246_s12 + $0x50] sm:$0xff]  }
 0x3a8   : > { %3484 = vmatprep.subr.bf16.mxu1 %v4781_v6  ;;  %v4817_v6 = vld [vmem:[%s6246_s12 + $0x10] sm:$0xff]  }
 0x3ab   : > { %3485 = vmatpush1.bf16.msra.mxu1 %v4779_v7  ;;  %v4818_v7 = vld [vmem:[%s6246_s12 + $0x48] sm:$0xff]  }
 0x3ac   : > { %3486 = vmatprep.subr.bf16.mxu1 %v4784_v8  ;;  %v4819_v8 = vld [vmem:[%s6246_s12 + $0x8] sm:$0xff]  }
 0x3af   : > { %3487 = vmatpush2.bf16.msra.mxu1 %v4782_v10  ;;  %v4820_v10 = vld [vmem:[%s6246_s12 + $0x40] sm:$0xff]  }
 0x3b0   : > { %3488 = vmatprep.subr.bf16.mxu1 %v4787_v12  ;;  %v4821_v12 = vld [vmem:[%s6246_s12] sm:$0xff]  }
 0x3b3   : > { %3489 = vmatpush2.bf16.msra.mxu1 %v4785_v13  ;;  %v3298_v13 = vld [vmem:[%s6245_s11] sm:$0x3] }
 0x3b4   : > { %3490 = vmatprep.subr.bf16.mxu1 %v4790_v14 }
 0x3b7   : > { %3491 = vmatpush2.bf16.msra.mxu1 %v4788_v15  ;;  %v3307_v15 = vrot.slane %v3298_v13, %v5156_v22 }
 0x3b8   : > { %3492 = vmatprep.subr.bf16.mxu1 %v4793_v16  ;;  %v3303_v16 = vrot.slane %v3298_v13, %v5159_v23 }
 0x3bb   : > { %3493 = vmatpush2.bf16.msra.mxu1 %v4791_v17 }
 0x3bc   : > { %3494 = vmatprep.subr.bf16.mxu1 %v4796_v18 }
 0x3bf   : > { %3495 = vmatpush2.bf16.msra.mxu1 %v4794_v19 }
 0x3c0   : > { %3496 = vmatprep.subr.bf16.mxu1 %v4799_v24 }
 0x3c2   : > { %v2486_v44 = vpop.f32.mrf.mxu0 }
 0x3c3   : > { %v2487_v50 = vadd.f32 %v2486_v44, %v2443_v41  ;;  %3497 = vmatpush2.bf16.msra.mxu1 %v4797_v20  ;;  %v4814_v41 = vld [vmem:[%s6246_s12 + $0x58] sm:$0xff]  }
 0x3c4   : > { %v2488_v45 = vpop.f32.mrf.mxu0  ;;  %3498 = vmatprep.subr.bf16.mxu1 %v4802_v25 }
 0x3c5   : > { %v2529_v46 = vpop.f32.mrf.mxu1  ;;  %v2489_v11 = vadd.f32 %v2488_v45, %v2445_v42  ;;  %v4815_v42 = vld [vmem:[%s6246_s12 + $0x18] sm:$0xff]  }
 0x3c6   : > { %v2490_v21 = vpop.f32.mrf.mxu0  ;;  %v2530_v53 = vadd.f32 %v2529_v46, %v2487_v50 }
 0x3c7   : > { %v2531_v48 = vpop.f32.mrf.mxu1  ;;  %v2491_v49 = vadd.f32 %v2490_v21, %v2447_v43  ;;  %3499 = vmatpush2.bf16.msra.mxu1 %v4800_v26  ;;  %v2639_v21 = vld [vmem:[%s6243_s9] sm:$0x3] }
 0x3c8   : > { %v2492_v47 = vpop.f32.mrf.mxu0  ;;  %v2532_v31 = vadd.f32 %v2531_v48, %v2489_v11  ;;  %3500 = vmatprep.subr.bf16.mxu1 %v4805_v29  ;;  %v2648_v48 = vrot.slane %v2639_v21, %v5156_v22 }
 0x3c9   : > { %v2533_v51 = vpop.f32.mrf.mxu1  ;;  %v2493_v33 = vadd.f32 %v2492_v47, %v2449_v9 }
 0x3ca   : > { %v2534_v35 = vadd.f32 %v2533_v51, %v2491_v49  ;;  %v2644_v49 = vrot.slane %v2639_v21, %v5159_v23  ;;  %v4161_v23 = vld [vmem:[%s6247_s13] ss:$0 sm:$0xff] }
 0x3cb   : > { %v2535_v38 = vpop.f32.mrf.mxu1  ;;  %3501 = vmatpush2.bf16.msra.mxu1 %v4803_v30 }
 0x3cc   : > { %v2536_v52 = vadd.f32 %v2535_v38, %v2493_v33  ;;  %v2541_v55 = vpack.c.bf16 %v2534_v35, %v2530_v53 }
 0x3ce   : > { %v2542_v54 = vpack.c.bf16 %v2536_v52, %v2532_v31 }
 0x3d0   : > { %3249 = vmatprep.mubr.bf16.mxu0 %v2542_v54 }
 0x3d1   : > { %3250 = vmatmul.mubr.bf16.vlgmr.msra.gmra.mxu0 %v2541_v55 }
 0x3d2   : > { %4216 = vmatpush3.bf16.msra.mxu0 %v4807_v28 }
 0x3d3   : > { %4217 = vmatprep.subr.bf16.mxu0 %v4808_v27 }
 0x3d6   : > { %4218 = vmatpush3.bf16.msra.mxu0 %v4809_v34 }
 0x3d7   : > { %4219 = vmatprep.subr.bf16.mxu0 %v4810_v36 }
 0x3da   : > { %4220 = vmatpush3.bf16.msra.mxu0 %v4811_v37 }
 0x3db   : > { %4221 = vmatprep.subr.bf16.mxu0 %v4812_v39 }
 0x3de   : > { %4222 = vmatpush3.bf16.msra.mxu0 %v4813_v40 }
 0x3df   : > { %4223 = vmatprep.subr.bf16.mxu0 %v4814_v41 }
 0x3e2   : > { %4224 = vmatpush3.bf16.msra.mxu0 %v4815_v42 }
 0x3e3   : > { %4225 = vmatprep.subr.bf16.mxu0 %v4816_v5 }
 0x3e6   : > { %4226 = vmatpush3.bf16.msra.mxu0 %v4817_v6 }
 0x3e7   : > { %4227 = vmatprep.subr.bf16.mxu0 %v4818_v7 }
 0x3ea   : > { %4228 = vmatpush3.bf16.msra.mxu0 %v4819_v8 }
 0x3eb   : > { %4229 = vmatprep.subr.bf16.mxu0 %v4820_v10 }
 0x3ee   : > { %4230 = vmatpush3.bf16.msra.mxu0 %v4821_v12 }
 0x402   : > { %v3165_v43 = vpop.f32.mrf.mxu0 }
 0x403   : > { %v3166_v35 = vadd.f32 %v3165_v43, %v2644_v49 }
 0x404   : > { %v3167_v44 = vpop.f32.mrf.mxu0 }
 0x405   : > { %v3168_v51 = vadd.f32 %v3167_v44, %v2648_v48 }
 0x406   : > { %v3169_v45 = vpop.f32.mrf.mxu0 }
 0x407   : > { %v3170_v33 = vadd.f32 %v3169_v45, %v2644_v49 }
 0x408   : > { %v3171_v11 = vpop.f32.mrf.mxu0 }
 0x409   : > { %v3172_v52 = vadd.f32 %v3171_v11, %v2648_v48 }
 0x44e   : > { %v3208_v9 = vpop.f32.mrf.mxu1 }
 0x44f   : > { %v3209_v55 = vadd.f32 %v3208_v9, %v3166_v35 }
 0x450   : > { %v3210_v46 = vpop.f32.mrf.mxu1 }
 0x451   : > { %v3211_v53 = vadd.f32 %v3210_v46, %v3168_v51 }
 0x452   : > { %v3212_v47 = vpop.f32.mrf.mxu1 }
 0x453   : > { %v3213_v54 = vadd.f32 %v3212_v47, %v3170_v33 }
 0x454   : > { %v3214_v38 = vpop.f32.mrf.mxu1 }
 0x455   : > { %v3215_v57 = vadd.f32 %v3214_v38, %v3172_v52 }
 0x491   : > { %v3251_v50 = vpop.f32.mrf.mxu0 }
 0x492   : > { %v3252_v60 = vadd.f32 %v3251_v50, %v3209_v55 }
 0x493   : > { %v3253_v31 = vpop.f32.mrf.mxu0 }
 0x494   : > { %v3254_v58 = vadd.f32 %v3253_v31, %v3211_v53  ;;  %v3260_v2 = vmax.f32 %v3252_v60, 0.0 }
 0x495   : > { %v3255_v56 = vpop.f32.mrf.mxu0 }
 0x496   : > { %v3256_v59 = vadd.f32 %v3255_v56, %v3213_v54  ;;  %v3261_v0 = vmax.f32 %v3254_v58, 0.0 }
 0x497   : > { %v3257_v61 = vpop.f32.mrf.mxu0 }
 0x498   : > { %v3258_v62 = vadd.f32 %v3257_v61, %v3215_v57  ;;  %v3262_v63 = vmax.f32 %v3256_v59, 0.0 }
 0x49a   : > { %v3263_v1 = vmax.f32 %v3258_v62, 0.0  ;;  %v3264_v4 = vpack.c.bf16 %v3262_v63, %v3260_v2 }
 0x49c   : > { %v3265_v3 = vpack.c.bf16 %v3263_v1, %v3261_v0 }
 0x49e   : > { %3502 = vmatprep.mubr.bf16.mxu1 %v3265_v3 }
 0x49f   : > { %3503 = vmatmul.mubr.bf16.vlgmr.msra.gmra.mxu1 %v3264_v4 }
 0x55f   : > { %v3504_v14 = vpop.f32.mrf.mxu1 }
 0x560   : > { %v3505_v24 = vadd.f32 %v3504_v14, %v3303_v16 }
 0x561   : > { %v3506_v17 = vpop.f32.mrf.mxu1 }
 0x562   : > { %v3507_v19 = vadd.f32 %v3506_v17, %v3307_v15  ;;  %v3513_v28 = vmax.f32 %v3505_v24, 0.0 }
 0x563   : > { %v3508_v18 = vpop.f32.mrf.mxu1 }
 0x564   : > { %v3509_v20 = vadd.f32 %v3508_v18, %v3303_v16  ;;  %v3514_v30 = vmax.f32 %v3507_v19, 0.0 }
 0x565   : > { %v3510_v25 = vpop.f32.mrf.mxu1 }
 0x566   : > { %v3511_v26 = vadd.f32 %v3510_v25, %v3307_v15  ;;  %v3515_v29 = vmax.f32 %v3509_v20, 0.0 }
 0x568   : > { %v3516_v32 = vmax.f32 %v3511_v26, 0.0  ;;  %v3517_v34 = vpack.c.bf16 %v3515_v29, %v3513_v28 }
 0x56a   : > { %v3518_v27 = vpack.c.bf16 %v3516_v32, %v3514_v30 }
 0x56c   : > { %3686 = vmatprep.mubr.bf16.mxu0 %v3518_v27 }
 0x56d   : > { %3687 = vmatmul.mubr.bf16.vlgmr.msra.gmra.mxu0 %v3517_v34 }
 0x62d   : > { %v4231_v36 = vpop.f32.mrf.mxu0 }
 0x62f   : > { %v4232_v22 = vpop.f32.mrf.mxu0 }
 0x630   : > { %v4233_v37 = vadd.f32 %v4232_v22, %v4231_v36 }
 0x631   : > { %v4234_v39 = vpop.f32.mrf.mxu0 }
 0x632   : > { %v3689_v41 = vadd.f32 %v4233_v37, %v4161_v23 }
 0x633   : > { %v4235_v40 = vpop.f32.mrf.mxu0 }
 0x634   : > { %v4236_v42 = vadd.f32 %v4235_v40, %v4234_v39  ;;  %v3695_v44 = vmax.f32 %v3689_v41, 0.0 }
 0x636   : > { %v3692_v43 = vadd.f32 %v4236_v42, %v4161_v23 }
 0x638   : > { %v3696_v9 = vmax.f32 %v3692_v43, 0.0 }
 0x63a   : > { %v4187_v45 = vpack.c.bf16 %v3696_v9, %v3695_v44 }
 0x63c   : > { %4188 = vst [vmem:[%s491_s25] sm:$0xff] %v4187_v45  }
 0x63d PF: > { %s24_s29 = sadd.s32 1, %s4828_s29  }
 0x63e   : > { %p21_p4 = scmp.ge.s32.totalorder %s24_s29, 4  }
 0x640   :  { %23 = sbr.rel (!%p21_p4) target bundleno = 1 (0x1), region = 109 }

// kernel: edge_cycle_forward.3
= control target key start
LH: loop header
LB: loop body
LE: loop exit
PB: predicated region body
PF: predicated region fallthrough
CT: control target
= control target key end

     0   :  { %s6050_s0 = inlined_call_operand.vmem [shape: bf16[64,128], index: 0, kind: input, shape index: {}]   ;;  %s6051_s1 = inlined_call_operand.hbm [shape: bf16[64,48], index: 1, kind: input, shape index: {}]   ;;  %s6052_s2 = inlined_call_operand.vmem [shape: bf16[48,128], index: 2, kind: input, shape index: {}]   ;;  %s6053_s3 = inlined_call_operand.vmem [shape: bf16[256,256], index: 3, kind: input, shape index: {}]   ;;  %s6054_s4 = inlined_call_operand.vmem [shape: f32[1,256], index: 4, kind: input, shape index: {}]   ;;  %s6055_s5 = inlined_call_operand.hbm [shape: bf16[256,128], index: 5, kind: input, shape index: {}]   ;;  %s6056_s6 = inlined_call_operand.vmem [shape: f32[1,128], index: 6, kind: input, shape index: {}]   ;;  %s6057_s7 = inlined_call_operand.hbm [shape: bf16[640,512], index: 7, kind: input, shape index: {}]   ;;  %s6058_s8 = inlined_call_operand.hbm [shape: bf16[768,256], index: 8, kind: input, shape index: {}]   ;;  %s6059_s9 = inlined_call_operand.vmem [shape: f32[1,256], index: 9, kind: input, shape index: {}]   ;;  %s6060_s10 = inlined_call_operand.hbm [shape: bf16[256,256], index: 10, kind: input, shape index: {}]   ;;  %s6061_s11 = inlined_call_operand.vmem [shape: f32[1,256], index: 11, kind: input, shape index: {}]   ;;  %s6062_s12 = inlined_call_operand.hbm [shape: bf16[256,128], index: 12, kind: input, shape index: {}]   ;;  %s6063_s13 = inlined_call_operand.vmem [shape: f32[1,128], index: 13, kind: input, shape index: {}]   ;;  %s6064_s14 = inlined_call_operand.vmem [shape: bf16[64,128], index: 14, kind: output, shape index: {}]  }
   0x1   :  { %6076 = sst [smem:[#allocation16_spill]] %s6055_s5 }
   0x2   :  { %6077 = sst [smem:[#allocation17_spill]] %s6057_s7 }
   0x3   :  { %6078 = sst [smem:[#allocation18_spill]] %s6058_s8 }
   0x4   :  { %6079 = sst [smem:[#allocation19_spill]] %s6060_s10 }
   0x5   :  { %6080 = sst [smem:[#allocation20_spill]] %s6062_s12 }
   0x6   :  { %6081 = sst [smem:[#allocation21_spill]] %s6063_s13 }
   0x7   :  { %6082 = sst [smem:[#allocation22_spill]] %s6064_s14 }
   0x8   :  { %19 = vsyncpa [#allocation3], 0 }
   0x9   :  { %21 = vsyncpa [#allocation3 + $0x1], 0 }
   0xa   :  { %22 = vsyncpa [#allocation5], 0 }
   0xb   :  { %23 = vsyncpa [#allocation8], 0 }
   0xc   :  { %24 = vsyncpa [#allocation11], 0  ;;  %s5401_s29 = smov 0   ;;  %s5403_s30 = smov 0  }
   0xd   :  { %s5405_s15 = smov 0   ;;  %s5407_s16 = smov 0  }
   0xe LB: > { %s5313_s17 = smov [#allocation4]   ;;  %s6065_s19 = sadd.s32 4294967295, %s5311_s16   ;;  %s5311_s16 = sphi %s5407_s16, %s6109_s16   ;;  %s5307_s15 = sphi %s5405_s15, %s6108_s15   ;;  %s5303_s30 = sphi %s5403_s30, %s6107_s30   ;;  %s5299_s29 = sphi %s5401_s29, %s6106_s29  }
   0xf   : > { %s386_s18 = sshll.u32 %s5313_s17, 4  ;;  %p4014_p0 = scmp.ge.s32.totalorder %s5311_s16, 1  ;;  %s387_s18 = int_to_ptr.vmem [resolvable:$true] %s386_s18 }
  0x10   : > { %p5425_p1 = scmp.eq.s32.totalorder %s6065_s19, 0  ;;  %p365_p2 = scmp.lt.s32.totalorder %s5311_s16, 3 }
  0x11   : > { %s5314_s22 = smov [#allocation7]   ;;  %s5315_s25 = smov [#allocation6]  }
  0x12   : > { %s6083_s20 = scalar_select %p5425_p1, 1, 0 }
  0x13   : > { %p5430_p3 = pnand %p4014_p0, %p365_p2  ;;  %s415_s23 = sshll.u32 %s5314_s22, 4  ;;  %s5442_s23 = int_to_ptr.vmem [resolvable:$true] %s415_s23 }
  0x14   : > { %s5444_s26 = sshll.u32 %s5315_s25, 4  ;;  %s5118_s28 = scalar_lea.vmem %s387_s18, 2048  ;;  %s403_s26 = int_to_ptr.vmem [resolvable:$true] %s5444_s26 }
  0x15   : > { %s6084_s21 = scalar_select %p5430_p3, 1, 0 }
  0x16   : > { %p4513_p4 = pneg %p5430_p3  ;;  %p5119_p7 = scmp.ne.s32.totalorder %s387_s18, %s5118_s28 }
  0x17   : > { %p5126_p10 = scmp.lt.s32.totalorder %s387_s18, %s387_s18  ;;  %p5127_p11 = scmp.lt.s32.totalorder %s5118_s28, %s5118_s28 }
  0x18   : > { %p5438_p5 = pnand %p4513_p4, %p5425_p1 }
  0x19   : > { %p5128_p12 = por %p5127_p11, %p5126_p10 }
  0x1a   : > { %p5448_p6 = pneg %p5438_p5 }
  0x1c   : > { %p5121_p8 = pnand %p5119_p7, %p5448_p6 }
  0x1e   : > { %p5122_p9 = pneg %p5121_p8 }
  0x20   : > { %p5129_p13 = pnand %p5128_p12, %p5122_p9 }
  0x22   : > { %5132 = shalt.err (!%p5129_p13)
}
  0x23   : > { %s6066_s17 = smov 64   ;;  %s6068_s22 = smov 4  }
  0x24   : > { %s6087_s5 = sld [smem:[#allocation16_spill]]  ;;  %s5144_s14 = scalar_lea.vmem %s5442_s23, 12288 }
  0x25   : > { %p5145_p0 = scmp.ne.s32.totalorder %s5442_s23, %s5144_s14  ;;  %p5152_p7 = scmp.lt.s32.totalorder %s5442_s23, %s5442_s23 }
  0x26   : > { %p5153_p8 = scmp.lt.s32.totalorder %s5144_s14, %s5144_s14 }
  0x27   : > { %p5147_p2 = pnand %p5145_p0, %p5448_p6 }
  0x28   : > { %p5154_p9 = por %p5153_p8, %p5152_p7 }
  0x29   : > { %p5148_p4 = pneg %p5147_p2 }
  0x2a   : > { %4516 = dma.hbm_to_vmem [thread:$0]  (!%p5438_p5), %s6087_s5, 2048, %s387_s18, [#allocation5], %s6066_s17, %s6066_s17, %s6068_s22  }
  0x2b   : > { %p5155_p10 = pnand %p5154_p9, %p5148_p4 }
  0x2d   : > { %5158 = shalt.err (!%p5155_p10)
}
  0x2e   : > { %s6070_s28 = smov 128   ;;  %s6071_s13 = smov 8  }
  0x2f   : > { %s6088_s8 = sld [smem:[#allocation18_spill]]  ;;  %s5170_s25 = scalar_lea.vmem %s403_s26, 20480 }
  0x30   : > { %p5171_p11 = scmp.ne.s32.totalorder %s403_s26, %s5170_s25  ;;  %p5178_p0 = scmp.lt.s32.totalorder %s403_s26, %s403_s26 }
  0x31   : > { %p5179_p2 = scmp.lt.s32.totalorder %s5170_s25, %s5170_s25 }
  0x32   : > { %p5173_p12 = pnand %p5171_p11, %p5448_p6 }
  0x33   : > { %p5180_p4 = por %p5179_p2, %p5178_p0 }
  0x34   : > { %p5174_p13 = pneg %p5173_p12 }
  0x35   : > { %4522 = dma.hbm_to_vmem [thread:$0]  (!%p5438_p5), %s6088_s8, 12288, %s5442_s23, [#allocation8], %s6070_s28, %s6070_s28, %s6071_s13  }
  0x36   : > { %p5181_p7 = pnand %p5180_p4, %p5174_p13 }
  0x38   : > { %5184 = shalt.err (!%p5181_p7)
}
  0x39   : > { %s5320_s14 = smov 256   ;;  %s5321_s17 = smov 16  }
  0x3a   : > { %s6089_s7 = sld [smem:[#allocation17_spill]]  ;;  %s5322_s23 = smov [#allocation9]  }
  0x3b   : > { %s431_s18 = sshll.u32 %s5322_s23, 4  ;;  %s5323_s19 = smov [#allocation10]   ;;  %s432_s18 = int_to_ptr.vmem [resolvable:$true] %s431_s18 }
  0x3c   : > { %s447_s28 = sshll.u32 %s5323_s19, 4  ;;  %s5196_s13 = scalar_lea.vmem %s432_s18, 4096  ;;  %s448_s28 = int_to_ptr.vmem [resolvable:$true] %s447_s28 }
  0x3d   : > { %p5197_p8 = scmp.ne.s32.totalorder %s432_s18, %s5196_s13  ;;  %p5204_p11 = scmp.lt.s32.totalorder %s432_s18, %s432_s18 }
  0x3e   : > { %p5205_p12 = scmp.lt.s32.totalorder %s5196_s13, %s5196_s13 }
  0x3f   : > { %p5199_p9 = pnand %p5197_p8, %p5448_p6 }
  0x40   : > { %4519 = dma.hbm_to_vmem [thread:$0]  (!%p5438_p5), %s6089_s7, 20480, %s403_s26, [#allocation5], %s5320_s14, %s5320_s14, %s5321_s17  }
  0x41   : > { %p5200_p10 = pneg %p5199_p9  ;;  %p5206_p13 = por %p5205_p12, %p5204_p11 }
  0x43   : > { %p5207_p0 = pnand %p5206_p13, %p5200_p10 }
  0x45   : > { %5210 = shalt.err (!%p5207_p0)
}
  0x46   : > { %s6090_s25 = smov 8   ;;  %s6091_s5 = smov 128  }
  0x47   : > { %s6092_s10 = sld [smem:[#allocation19_spill]]  ;;  %s5222_s22 = scalar_lea.vmem %s448_s28, 2048 }
  0x48   : > { %p5223_p2 = scmp.ne.s32.totalorder %s448_s28, %s5222_s22  ;;  %p5230_p8 = scmp.lt.s32.totalorder %s448_s28, %s448_s28 }
  0x49   : > { %p5231_p9 = scmp.lt.s32.totalorder %s5222_s22, %s5222_s22 }
  0x4a   : > { %p5225_p4 = pnand %p5223_p2, %p5448_p6 }
  0x4b   : > { %p5232_p10 = por %p5231_p9, %p5230_p8 }
  0x4c   : > { %p5226_p7 = pneg %p5225_p4 }
  0x4d   : > { %4525 = dma.hbm_to_vmem [thread:$0]  (!%p5438_p5), %s6092_s10, 4096, %s432_s18, [#allocation8], %s6091_s5, %s6091_s5, %s6090_s25  }
  0x4e   : > { %p5233_p11 = pnand %p5232_p10, %p5226_p7 }
  0x50   : > { %5236 = shalt.err (!%p5233_p11)
}
  0x51   : > { %s6093_s13 = smov 4   ;;  %s6094_s14 = smov 64  }
  0x52   : > { %s6095_s12 = sld [smem:[#allocation20_spill]]  ;;  %s5506_s24 = sadd.s32 1, %s5311_s16  }
  0x53   : > { %s60_s27 = ssub.s32 %s5311_s16, %s5506_s24  ;;  %s63_s18 = sadd.s32 1, %s5307_s15 }
  0x54   : > { %p61_p6 = scmp.eq.s32.totalorder %s60_s27, 0  ;;  %p70_p12 = scmp.ne.s32.totalorder %s5307_s15, %s5303_s30 }
  0x55   : > { %p71_p13 = scmp.eq.s32.totalorder %s5311_s16, 0  ;;  %p76_p0 = scmp.ne.s32.totalorder %s5303_s30, %s5299_s29 }
  0x56   : > { %s5517_s25 = scalar_select %p61_p6, %s5307_s15, %s63_s18  }
  0x57   : > { %p72_p2 = por %p71_p13, %p70_p12  ;;  %p5521_p4 = por %p5425_p1, %p76_p0 }
  0x58   : > { %4528 = dma.hbm_to_vmem [thread:$0]  (!%p5438_p5), %s6095_s12, 2048, %s448_s28, [#allocation11], %s6094_s14, %s6094_s14, %s6093_s13  }
  0x59   : > { %s6096_s5 = scalar_select %p5521_p4, 1, 0 }
  0x5a   : > { %p4538_p7 = scmp.lt.s32.totalorder %s5311_s16, 2  ;;  %s473_s26 = sand.u32 1, %s5307_s15  }
  0x5b   : > { %s4021_s28 = sshll.u32 %s473_s26, 4  ;;  %s4404_s17 = sshll.u32 %s5311_s16, 8 }
  0x5c   : > { %s5531_s19 = scalar_lea.hbm %s6051_s1, %s4404_s17  ;;  %s477_s29 = scalar_lea.vmem [#allocation2], %s4021_s28 }
  0x5d   : > { %s484_s27 = sshll.u32 %s477_s29, 4  ;;  %p5535_p5 = pnand %p4538_p7, %p72_p2  ;;  %s5533_s27 = int_to_ptr.vmem [resolvable:$true] %s484_s27 }
  0x5e   : > { %s5539_s7 = scalar_lea.sflag [#allocation3], %s473_s26  ;;  %s5237_s8 = scalar_lea.hbm %s5531_s19, 256 }
  0x5f   : > { %p5238_p8 = scmp.ne.s32.totalorder %s5531_s19, %s5237_s8  ;;  %p5239_p9 = pneg %p5535_p5 }
  0x60   : > { %s5242_s28 = scalar_lea.hbm %s6051_s1, 512  ;;  %p5243_p6 = scmp.lt.s32.totalorder %s5531_s19, %s6051_s1 }
  0x61   : > { %p5240_p10 = pnand %p5239_p9, %p5238_p8  ;;  %p5244_p12 = scmp.lt.s32.totalorder %s5242_s28, %s5237_s8 }
  0x63   : > { %p5241_p11 = pneg %p5240_p10  ;;  %p5245_p13 = por %p5244_p12, %p5243_p6 }
  0x65   : > { %p5246_p0 = pnand %p5245_p13, %p5241_p11 }
  0x67   : > { %5249 = shalt.err (!%p5246_p0)
}
  0x68   : > { %s5250_s26 = scalar_lea.vmem %s5533_s27, 256  ;;  %s5324_s10 = smov [#allocation2]  }
  0x69   : > { %p5251_p2 = scmp.ne.s32.totalorder %s5533_s27, %s5250_s26  ;;  %s5255_s12 = sshll.u32 %s5324_s10, 4  ;;  %s5256_s12 = int_to_ptr.vmem [resolvable:$false] %s5255_s12 }
  0x6a   : > { %s5257_s17 = scalar_lea.vmem %s5256_s12, 512  ;;  %p5258_p10 = scmp.lt.s32.totalorder %s5533_s27, %s5256_s12 }
  0x6b   : > { %p5253_p7 = pnand %p5251_p2, %p5239_p9  ;;  %p5259_p1 = scmp.lt.s32.totalorder %s5257_s17, %s5250_s26 }
  0x6d   : > { %p5254_p8 = pneg %p5253_p7  ;;  %p5260_p4 = por %p5259_p1, %p5258_p10 }
  0x6f   : > { %p5261_p3 = pnand %p5260_p4, %p5254_p8 }
  0x71   : > { %5264 = shalt.err (!%p5261_p3)
}
  0x72   : > { %4532 = dma.hbm_to_vmem [thread:$0]  (!%p5535_p5), %s5531_s19, 256, %s5533_s27, %s5539_s7, %s6094_s14, %s6094_s14, %s6093_s13  }
  0x73   : > { %p6098_p9 = scmp.ne.s32.totalorder %s6084_s21, 0 }
  0x74   : > { %s498_s8 = sand.u32 (!%p6098_p9), 1, %s5303_s30   ;;  %p6099_p1 = scmp.ne.s32.totalorder (!%p6098_p9), %s6096_s5, 0 }
  0x75   : > { %496 = sbr.rel (%p6098_p9) target bundleno = 1701 (0x6a5), region = 76  ;;  %s5566_s10 = sshll.u32 (!%p6098_p9), %s498_s8, 4 }
  0x76   : > { %s499_s12 = scalar_lea.sflag (!%p6098_p9), [#allocation3], %s498_s8  ;;  %s502_s22 = scalar_lea.vmem (!%p6098_p9), [#allocation2], %s5566_s10 }
  0x7a   : > { %5282 = dma.done.wait (%p6099_p1), %s499_s12, 256  }
  0x7b   : > { %5284 = vsyncadd (%p6099_p1), %s499_s12, 4294967040  ;;  %p6100_p3 = scmp.ne.s32.totalorder %s6083_s20, 0 }
  0x7d   : > { %5286 = dma.done.wait (%p6100_p3), [#allocation5], 22528  }
  0x7e   : > { %5288 = vsyncadd (%p6100_p3), [#allocation5], 4294944768 }
  0x7f   : > { %5290 = dma.done.wait (%p6100_p3), [#allocation8], 16384  }
  0x80   : > { %5292 = vsyncadd (%p6100_p3), [#allocation8], 4294950912 }
  0x81   : > { %5294 = dma.done.wait (%p6100_p3), [#allocation11], 2048  }
  0x82   : > { %5296 = vsyncadd (%p6100_p3), [#allocation11], 4294965248  ;;  %v4588_v0 = vld [vmem:[%s6052_s2 + $0x10] sm:$0xff]   ;;  %v4589_v1 = vld [vmem:[%s6052_s2 + $0x8] sm:$0xff]   ;;  %vm628_vm0 = vcmask 392192   ;;  %s6101_s26 = sadd.s32 4294967295, %s5311_s16  }
  0x83   : > { %4481 = vmatprep.subr.bf16.mxu0 %v4588_v0  ;;  %v4591_v2 = vld [vmem:[%s502_s22] sm:$0xff]   ;;  %v4592_v9 = vld [vmem:[%s502_s22 + $0x8] sm:$0xff]   ;;  %s4031_s17 = sshll.u32 %s6101_s26, 2  ;;  %s6104_s8 = sld [smem:[#allocation21_spill]] }
  0x84   : > { %4482 = vmatpush3.bf16.msra.mxu0 %v4588_v0  ;;  %v4590_v3 = vld [vmem:[%s6052_s2] sm:$0xff]   ;;  %4487 = vmatprep.mubr.msk.bf16.mxu0 %vm628_vm0, %v4591_v2  ;;  %v4593_v4 = vld [vmem:[%s6053_s3 + $0x74] ss:$8 sps:$4 sm:$0xff]   ;;  %v4595_v5 = vld [vmem:[%s6053_s3 + $0x70] ss:$8 sps:$4 sm:$0xff]   ;;  %p573_p4 = scmp.lt.s32.totalorder %s4031_s17, 7 }
  0x85   : > { %4483 = vmatprep.subr.bf16.mxu0 %v4589_v1  ;;  %902 = vmatprep.subr.bf16.mxu1 %v4593_v4  ;;  %v4596_v6 = vld [vmem:[%s6053_s3 + $0x64] ss:$8 sps:$4 sm:$0xff]   ;;  %v4598_v7 = vld [vmem:[%s6053_s3 + $0x60] ss:$8 sps:$4 sm:$0xff]   ;;  %v4599_v8 = vld [vmem:[%s6053_s3 + $0x54] ss:$8 sps:$4 sm:$0xff]  }
  0x86   : > { %903 = vmatpush1.bf16.msra.mxu1 %v4595_v5  ;;  %v4601_v10 = vld [vmem:[%s6053_s3 + $0x50] ss:$8 sps:$4 sm:$0xff]   ;;  %v4602_v11 = vld [vmem:[%s6053_s3 + $0x44] ss:$8 sps:$4 sm:$0xff]   ;;  %v4604_v12 = vld [vmem:[%s6053_s3 + $0x40] ss:$8 sps:$4 sm:$0xff]  }
  0x87   : > { %904 = vmatprep.subr.bf16.mxu1 %v4596_v6  ;;  %v4605_v13 = vld [vmem:[%s6053_s3 + $0x34] ss:$8 sps:$4 sm:$0xff]   ;;  %v4607_v14 = vld [vmem:[%s6053_s3 + $0x30] ss:$8 sps:$4 sm:$0xff]   ;;  %v4608_v15 = vld [vmem:[%s6053_s3 + $0x24] ss:$8 sps:$4 sm:$0xff]  }
  0x88   : > { %4484 = vmatpush3.bf16.msra.mxu0 %v4589_v1  ;;  %v4610_v16 = vld [vmem:[%s6053_s3 + $0x20] ss:$8 sps:$4 sm:$0xff]   ;;  %v4611_v17 = vld [vmem:[%s6053_s3 + $0x14] ss:$8 sps:$4 sm:$0xff]   ;;  %v4613_v18 = vld [vmem:[%s6053_s3 + $0x10] ss:$8 sps:$4 sm:$0xff]  }
  0x89   : > { %4485 = vmatprep.subr.bf16.mxu0 %v4590_v3  ;;  %v4614_v19 = vld [vmem:[%s6053_s3 + $0x4] ss:$8 sps:$4 sm:$0xff]   ;;  %v4616_v20 = vld [vmem:[%s6053_s3] ss:$8 sps:$4 sm:$0xff]   ;;  %v4617_v21 = vld [vmem:[%s6053_s3 + $0xf4] ss:$8 sps:$4 sm:$0xff]  }
  0x8a   : > { %905 = vmatpush1.bf16.msra.mxu1 %v4598_v7  ;;  %v4619_v22 = vld [vmem:[%s6053_s3 + $0xf0] ss:$8 sps:$4 sm:$0xff]   ;;  %v4620_v23 = vld [vmem:[%s6053_s3 + $0xe4] ss:$8 sps:$4 sm:$0xff]   ;;  %v4622_v24 = vld [vmem:[%s6053_s3 + $0xe0] ss:$8 sps:$4 sm:$0xff]  }
  0x8b   : > { %906 = vmatprep.subr.bf16.mxu1 %v4599_v8  ;;  %v4623_v25 = vld [vmem:[%s6053_s3 + $0xd4] ss:$8 sps:$4 sm:$0xff]   ;;  %v4625_v26 = vld [vmem:[%s6053_s3 + $0xd0] ss:$8 sps:$4 sm:$0xff]   ;;  %v4626_v27 = vld [vmem:[%s6053_s3 + $0xc4] ss:$8 sps:$4 sm:$0xff]  }
  0x8c   : > { %4486 = vmatpush3.bf16.msra.mxu0 %v4590_v3  ;;  %v4628_v28 = vld [vmem:[%s6053_s3 + $0xc0] ss:$8 sps:$4 sm:$0xff]   ;;  %v4629_v29 = vld [vmem:[%s6053_s3 + $0xb4] ss:$8 sps:$4 sm:$0xff]   ;;  %v4631_v30 = vld [vmem:[%s6053_s3 + $0xb0] ss:$8 sps:$4 sm:$0xff]  }
  0x8d   : > { %v4632_v31 = vld [vmem:[%s6053_s3 + $0xa4] ss:$8 sps:$4 sm:$0xff]   ;;  %v4634_v32 = vld [vmem:[%s6053_s3 + $0xa0] ss:$8 sps:$4 sm:$0xff]   ;;  %v4635_v33 = vld [vmem:[%s6053_s3 + $0x94] ss:$8 sps:$4 sm:$0xff]  }
  0x8e   : > { %907 = vmatpush1.bf16.msra.mxu1 %v4601_v10  ;;  %v4637_v34 = vld [vmem:[%s6053_s3 + $0x90] ss:$8 sps:$4 sm:$0xff]   ;;  %v4638_v35 = vld [vmem:[%s6053_s3 + $0x84] ss:$8 sps:$4 sm:$0xff]   ;;  %s6111_s17 = smov (!%p573_p4, %s4031_s17), 7  ;;  %s6105_s7 = sld [smem:[#allocation22_spill]] }
  0x8f   : > { %4488 = vmatmul.mubr.msk.bf16.vlgmr.msra.gmra.mxu0 %vm628_vm0, %v4592_v9  ;;  %908 = vmatprep.subr.bf16.mxu1 %v4602_v11  ;;  %v4640_v36 = vld [vmem:[%s6053_s3 + $0x80] ss:$8 sps:$4 sm:$0xff]   ;;  %s4032_s21 = sshll.u32 %s6111_s17, 2  ;;  %v4643_v37 = vld [vmem:[#allocation4 + $0x78] sm:$0xff]   ;;  %v4645_v39 = vld [vmem:[#allocation4 + $0x70] sm:$0xff]  }
  0x90   : > { %s5702_s14 = scalar_lea.vmem %s6050_s0, %s4032_s21  ;;  %v4644_v38 = vld [vmem:[#allocation4 + $0x38] sm:$0xff]   ;;  %4425 = vmatprep.subr.bf16.mxu0 %v4643_v37  ;;  %v4646_v40 = vld [vmem:[#allocation4 + $0x30] sm:$0xff]   ;;  %v4647_v41 = vld [vmem:[#allocation4 + $0x68] sm:$0xff]  }
  0x91   : > { %4426 = vmatpush3.bf16.msra.mxu0 %v4644_v38  ;;  %v4648_v42 = vld [vmem:[#allocation4 + $0x28] sm:$0xff]   ;;  %v4649_v43 = vld [vmem:[#allocation4 + $0x60] sm:$0xff]   ;;  %v4651_v45 = vld [vmem:[#allocation4 + $0x58] sm:$0xff]  }
  0x92   : > { %909 = vmatpush1.bf16.msra.mxu1 %v4604_v12  ;;  %4427 = vmatprep.subr.bf16.mxu0 %v4645_v39  ;;  %v4650_v44 = vld [vmem:[#allocation4 + $0x20] sm:$0xff]   ;;  %v4652_v46 = vld [vmem:[#allocation4 + $0x18] sm:$0xff]   ;;  %v4642_v54 = vld [vmem:[%s5702_s14 + $0x8] sm:$0xff]  }
  0x93   : > { %910 = vmatprep.subr.bf16.mxu1 %v4605_v13  ;;  %v4641_v51 = vld [vmem:[%s5702_s14] sm:$0xff]   ;;  %v4653_v55 = vld [vmem:[#allocation4 + $0x50] sm:$0xff]   ;;  %v4655_v57 = vld [vmem:[#allocation4 + $0x48] sm:$0xff]  }
  0x94   : > { %v4654_v56 = vld [vmem:[#allocation4 + $0x10] sm:$0xff]   ;;  %v4656_v58 = vld [vmem:[#allocation4 + $0x8] sm:$0xff]   ;;  %v4657_v59 = vld [vmem:[#allocation4 + $0x40] sm:$0xff]   ;;  %s583_s16 = scalar_lea.vmem %s6105_s7, %s4032_s21 }
  0x95   : > { %4428 = vmatpush3.bf16.msra.mxu0 %v4646_v40  ;;  %v4658_v60 = vld [vmem:[#allocation4] sm:$0xff]  }
  0x96   : > { %911 = vmatpush1.bf16.msra.mxu1 %v4607_v14  ;;  %4429 = vmatprep.subr.bf16.mxu0 %v4647_v41  ;;  %v4661_v61 = vld [vmem:[#allocation6 + $0xe4] ss:$16 sps:$4 sm:$0xff]   ;;  %v4662_v62 = vld [vmem:[#allocation6 + $0x2e0] ss:$16 sps:$4 sm:$0xff]  }
  0x97   : > { %912 = vmatprep.subr.bf16.mxu1 %v4608_v15  ;;  %v4664_v63 = vld [vmem:[#allocation6 + $0x2e4] ss:$16 sps:$4 sm:$0xff]   ;;  %v4668_v1 = vld [vmem:[#allocation6 + $0x2c0] ss:$16 sps:$4 sm:$0xff]  }
  0x98   : > { %v4670_v0 = vld [vmem:[#allocation6 + $0x2c4] ss:$16 sps:$4 sm:$0xff]   ;;  %v4674_v3 = vld [vmem:[#allocation6 + $0x2a0] ss:$16 sps:$4 sm:$0xff]  }
  0x99   : > { %4430 = vmatpush3.bf16.msra.mxu0 %v4648_v42  ;;  %v4676_v2 = vld [vmem:[#allocation6 + $0x2a4] ss:$16 sps:$4 sm:$0xff]   ;;  %v4680_v5 = vld [vmem:[#allocation6 + $0x280] ss:$16 sps:$4 sm:$0xff]  }
  0x9a   : > { %913 = vmatpush1.bf16.msra.mxu1 %v4610_v16  ;;  %4431 = vmatprep.subr.bf16.mxu0 %v4649_v43  ;;  %v4682_v4 = vld [vmem:[#allocation6 + $0x284] ss:$16 sps:$4 sm:$0xff]   ;;  %v4686_v7 = vld [vmem:[#allocation6 + $0x260] ss:$16 sps:$4 sm:$0xff]  }
  0x9b   : > { %914 = vmatprep.subr.bf16.mxu1 %v4611_v17  ;;  %v4688_v6 = vld [vmem:[#allocation6 + $0x264] ss:$16 sps:$4 sm:$0xff]   ;;  %v4692_v9 = vld [vmem:[#allocation6 + $0x240] ss:$16 sps:$4 sm:$0xff]  }
  0x9c   : > { %v4694_v8 = vld [vmem:[#allocation6 + $0x244] ss:$16 sps:$4 sm:$0xff]   ;;  %v4698_v11 = vld [vmem:[#allocation6 + $0x220] ss:$16 sps:$4 sm:$0xff]  }
  0x9d   : > { %4432 = vmatpush3.bf16.msra.mxu0 %v4650_v44  ;;  %v4700_v10 = vld [vmem:[#allocation6 + $0x224] ss:$16 sps:$4 sm:$0xff]   ;;  %v4704_v13 = vld [vmem:[#allocation6 + $0x200] ss:$16 sps:$4 sm:$0xff]  }
  0x9e   : > { %915 = vmatpush1.bf16.msra.mxu1 %v4613_v18  ;;  %4433 = vmatprep.subr.bf16.mxu0 %v4651_v45  ;;  %v4706_v12 = vld [vmem:[#allocation6 + $0x204] ss:$16 sps:$4 sm:$0xff]   ;;  %v4710_v15 = vld [vmem:[#allocation6 + $0x3e0] ss:$16 sps:$4 sm:$0xff]   ;;  %v732_v18 = vlaneseq }
  0x9f   : > { %916 = vmatprep.subr.bf16.mxu1 %v4614_v19  ;;  %v4712_v14 = vld [vmem:[#allocation6 + $0x3e4] ss:$16 sps:$4 sm:$0xff]   ;;  %v4716_v17 = vld [vmem:[#allocation6 + $0x3c0] ss:$16 sps:$4 sm:$0xff]  }
  0xa0   : > { %v4718_v16 = vld [vmem:[#allocation6 + $0x3c4] ss:$16 sps:$4 sm:$0xff]   ;;  %v5706_v19 = vshrl.u32 %v732_v18, 7  ;;  %v4659_v40 = vld [vmem:[#allocation6 + $0xe0] ss:$16 sps:$4 sm:$0xff]  }
  0xa1   : > { %4434 = vmatpush3.bf16.msra.mxu0 %v4652_v46  ;;  %v4667_v43 = vld [vmem:[#allocation6 + $0xc4] ss:$16 sps:$4 sm:$0xff]   ;;  %v4731_v18 = vld [vmem:[#allocation6 + $0x160] ss:$16 sps:$4 sm:$0xff]  }
  0xa2   : > { %917 = vmatpush1.bf16.msra.mxu1 %v4616_v20  ;;  %4435 = vmatprep.subr.bf16.mxu0 %v4653_v55  ;;  %v5709_v20 = vsub.s32 1, %v5706_v19  ;;  %vm1212_vm1 = vcmp.lt.s32.totalorder %v5706_v19, 7  ;;  %vm1221_vm2 = vcmp.lt.s32.totalorder %v5706_v19, 4  ;;  %vm1246_vm3 = vcmp.lt.s32.totalorder %v5706_v19, 6 }
  0xa3   : > { %918 = vmatprep.subr.bf16.mxu1 %v4617_v21  ;;  %v5712_v21 = vsub.s32 0, %v5706_v19  ;;  %vm1255_vm4 = vcmp.lt.s32.totalorder %v5706_v19, 3  ;;  %vm1280_vm5 = vcmp.lt.s32.totalorder %v5706_v19, 5  ;;  %vm1289_vm6 = vcmp.lt.s32.totalorder %v5706_v19, 2 }
  0xa4   : > { %vm1314_vm10 = vcmp.lt.s32.totalorder %v5706_v19, 1 }
  0xa5   : > { %4436 = vmatpush3.bf16.msra.mxu0 %v4654_v56  ;;  %v4671_v56 = vld [vmem:[#allocation6 + $0xa0] ss:$16 sps:$4 sm:$0xff]  }
  0xa6   : > { %919 = vmatpush2.bf16.msra.mxu1 %v4619_v22  ;;  %4437 = vmatprep.subr.bf16.mxu0 %v4655_v57  ;;  %v730_v22 = vld [vmem:[%s6054_s4] sm:$0x3] }
  0xa7   : > { %920 = vmatprep.subr.bf16.mxu1 %v4620_v23 }
  0xa9   : > { %4438 = vmatpush3.bf16.msra.mxu0 %v4656_v58  ;;  %v4679_v58 = vld [vmem:[#allocation6 + $0x84] ss:$16 sps:$4 sm:$0xff]  }
  0xaa   : > { %921 = vmatpush2.bf16.msra.mxu1 %v4622_v24  ;;  %4439 = vmatprep.subr.bf16.mxu0 %v4657_v59  ;;  %v739_v24 = vrot.slane %v730_v22, %v5709_v20  ;;  %v4677_v59 = vld [vmem:[#allocation6 + $0x80] ss:$16 sps:$4 sm:$0xff]  }
  0xab   : > { %922 = vmatprep.subr.bf16.mxu1 %v4623_v25  ;;  %v735_v25 = vrot.slane %v730_v22, %v5712_v21  ;;  %v4734_v22 = vld [vmem:[#allocation6 + $0x360] ss:$16 sps:$4 sm:$0xff]  }
  0xad   : > { %4440 = vmatpush3.bf16.msra.mxu0 %v4658_v60  ;;  %v4685_v60 = vld [vmem:[#allocation6 + $0x64] ss:$16 sps:$4 sm:$0xff]  }
  0xae   : > { %923 = vmatpush2.bf16.msra.mxu1 %v4625_v26  ;;  %2321 = vmatprep.subr.bf16.mxu0 %v4661_v61  ;;  %v4683_v61 = vld [vmem:[#allocation6 + $0x60] ss:$16 sps:$4 sm:$0xff]  }
  0xaf   : > { %924 = vmatprep.subr.bf16.mxu1 %v4626_v27 }
  0xb2   : > { %925 = vmatpush2.bf16.msra.mxu1 %v4628_v28 }
  0xb3   : > { %926 = vmatprep.subr.bf16.mxu1 %v4629_v29 }
  0xb6   : > { %927 = vmatpush2.bf16.msra.mxu1 %v4631_v30 }
  0xb7   : > { %928 = vmatprep.subr.bf16.mxu1 %v4632_v31 }
  0xba   : > { %929 = vmatpush2.bf16.msra.mxu1 %v4634_v32 }
  0xbb   : > { %930 = vmatprep.subr.bf16.mxu1 %v4635_v33 }
  0xbe   : > { %931 = vmatpush2.bf16.msra.mxu1 %v4637_v34 }
  0xbf   : > { %932 = vmatprep.subr.bf16.mxu1 %v4638_v35 }
  0xc2   : > { %933 = vmatpush2.bf16.msra.mxu1 %v4640_v36 }
  0xc3   : > { %2374 = vmatprep.subr.bf16.mxu1 %v4664_v63  ;;  %v4689_v63 = vld [vmem:[#allocation6 + $0x40] ss:$16 sps:$4 sm:$0xff]  }
 0x14f   : > { %v4489_v47 = vpop.f32.mrf.mxu0 }
 0x151   : > { %v669_v48 = vpop.f32.mrf.mxu0 }
 0x153   : > { %v4490_v49 = vpop.f32.mrf.mxu0 }
 0x154   : > { %v685_v53 = vpack.c.bf16 %v4490_v49, %v4489_v47  ;;  %v4665_v49 = vld [vmem:[#allocation6 + $0xc0] ss:$16 sps:$4 sm:$0xff]  }
 0x155   : > { %v672_v50 = vpop.f32.mrf.mxu0 }
 0x156   : > { %v684_v52 = vpack.c.bf16 %v672_v50, %v669_v48 }
 0x158   : > { %934 = vmatprep.mubr.bf16.mxu1 %v684_v52 }
 0x159   : > { %935 = vmatmul.mubr.bf16.vlgmr.msra.gmra.mxu1 %v4641_v51  ;;  %v4673_v51 = vld [vmem:[#allocation6 + $0xa4] ss:$16 sps:$4 sm:$0xff]  }
 0x15a   : > { %944 = vmatprep.mubr.bf16.mxu1 %v685_v53  ;;  %2375 = vmatpush1.bf16.msra.mxu1 %v4662_v62  ;;  %v4691_v62 = vld [vmem:[#allocation6 + $0x44] ss:$16 sps:$4 sm:$0xff]  }
 0x15b   : > { %2376 = vmatprep.subr.bf16.mxu1 %v4670_v0  ;;  %v4697_v0 = vld [vmem:[#allocation6 + $0x24] ss:$16 sps:$4 sm:$0xff]  }
 0x15e   : > { %2377 = vmatpush1.bf16.msra.mxu1 %v4668_v1  ;;  %v4695_v1 = vld [vmem:[#allocation6 + $0x20] ss:$16 sps:$4 sm:$0xff]  }
 0x15f   : > { %2378 = vmatprep.subr.bf16.mxu1 %v4676_v2  ;;  %v4703_v2 = vld [vmem:[#allocation6 + $0x4] ss:$16 sps:$4 sm:$0xff]  }
 0x161   : > { %945 = vmatmul.mubr.bf16.gmra.mxu1 %v4642_v54 }
 0x162   : > { %2379 = vmatpush1.bf16.msra.mxu1 %v4674_v3  ;;  %v4701_v3 = vld [vmem:[#allocation6] ss:$16 sps:$4 sm:$0xff]  }
 0x163   : > { %2380 = vmatprep.subr.bf16.mxu1 %v4682_v4  ;;  %v4709_v4 = vld [vmem:[#allocation6 + $0x1e4] ss:$16 sps:$4 sm:$0xff]  }
 0x166   : > { %2381 = vmatpush1.bf16.msra.mxu1 %v4680_v5  ;;  %v4707_v5 = vld [vmem:[#allocation6 + $0x1e0] ss:$16 sps:$4 sm:$0xff]  }
 0x167   : > { %2382 = vmatprep.subr.bf16.mxu1 %v4688_v6  ;;  %v4715_v6 = vld [vmem:[#allocation6 + $0x1c4] ss:$16 sps:$4 sm:$0xff]  }
 0x16a   : > { %2383 = vmatpush1.bf16.msra.mxu1 %v4686_v7  ;;  %v4713_v7 = vld [vmem:[#allocation6 + $0x1c0] ss:$16 sps:$4 sm:$0xff]  }
 0x16b   : > { %2384 = vmatprep.subr.bf16.mxu1 %v4694_v8  ;;  %v4721_v8 = vld [vmem:[#allocation6 + $0x1a4] ss:$16 sps:$4 sm:$0xff]  }
 0x16e   : > { %2385 = vmatpush1.bf16.msra.mxu1 %v4692_v9  ;;  %v4724_v9 = vld [vmem:[#allocation6 + $0x3a4] ss:$16 sps:$4 sm:$0xff]  }
 0x16f   : > { %2386 = vmatprep.subr.bf16.mxu1 %v4700_v10  ;;  %v4719_v10 = vld [vmem:[#allocation6 + $0x1a0] ss:$16 sps:$4 sm:$0xff]  }
 0x172   : > { %2387 = vmatpush1.bf16.msra.mxu1 %v4698_v11  ;;  %v4722_v11 = vld [vmem:[#allocation6 + $0x3a0] ss:$16 sps:$4 sm:$0xff]  }
 0x173   : > { %2388 = vmatprep.subr.bf16.mxu1 %v4706_v12  ;;  %v4727_v12 = vld [vmem:[#allocation6 + $0x184] ss:$16 sps:$4 sm:$0xff]  }
 0x176   : > { %2389 = vmatpush1.bf16.msra.mxu1 %v4704_v13  ;;  %v4730_v13 = vld [vmem:[#allocation6 + $0x384] ss:$16 sps:$4 sm:$0xff]  }
 0x177   : > { %2390 = vmatprep.subr.bf16.mxu1 %v4712_v14  ;;  %v4725_v14 = vld [vmem:[#allocation6 + $0x180] ss:$16 sps:$4 sm:$0xff]  }
 0x17a   : > { %2391 = vmatpush2.bf16.msra.mxu1 %v4710_v15  ;;  %v4728_v15 = vld [vmem:[#allocation6 + $0x380] ss:$16 sps:$4 sm:$0xff]  }
 0x17b   : > { %2392 = vmatprep.subr.bf16.mxu1 %v4718_v16  ;;  %v4733_v16 = vld [vmem:[#allocation6 + $0x164] ss:$16 sps:$4 sm:$0xff]  }
 0x17e   : > { %2393 = vmatpush2.bf16.msra.mxu1 %v4716_v17  ;;  %v4736_v17 = vld [vmem:[#allocation6 + $0x364] ss:$16 sps:$4 sm:$0xff]  }
 0x17f   : > { %2394 = vmatprep.subr.bf16.mxu1 %v4724_v9 }
 0x182   : > { %2395 = vmatpush2.bf16.msra.mxu1 %v4722_v11 }
 0x183   : > { %2396 = vmatprep.subr.bf16.mxu1 %v4730_v13 }
 0x186   : > { %2397 = vmatpush2.bf16.msra.mxu1 %v4728_v15 }
 0x187   : > { %2398 = vmatprep.subr.bf16.mxu1 %v4736_v17 }
 0x18a   : > { %2399 = vmatpush2.bf16.msra.mxu1 %v4734_v22 }
 0x219   : > { %v936_v23 = vpop.f32.mrf.mxu1 }
 0x21a   : > { %v937_v30 = vadd.f32 %v936_v23, %v735_v25  ;;  %v4739_v23 = vld [vmem:[#allocation6 + $0x144] ss:$16 sps:$4 sm:$0xff]  }
 0x21b   : > { %v938_v26 = vpop.f32.mrf.mxu1 }
 0x21c   : > { %v939_v28 = vadd.f32 %v938_v26, %v739_v24  ;;  %v955_v37 = vmax.f32 %v937_v30, 0.0  ;;  %v4740_v26 = vld [vmem:[#allocation6 + $0x340] ss:$16 sps:$4 sm:$0xff]  }
 0x21d   : > { %v940_v27 = vpop.f32.mrf.mxu1  ;;  %v4746_v30 = vld [vmem:[#allocation6 + $0x320] ss:$16 sps:$4 sm:$0xff]  }
 0x21e   : > { %v941_v29 = vadd.f32 %v940_v27, %v735_v25  ;;  %v956_v35 = vmax.f32 %v939_v28, 0.0  ;;  %v4745_v27 = vld [vmem:[#allocation6 + $0x124] ss:$16 sps:$4 sm:$0xff]  }
 0x21f   : > { %v942_v31 = vpop.f32.mrf.mxu1  ;;  %v4748_v28 = vld [vmem:[#allocation6 + $0x324] ss:$16 sps:$4 sm:$0xff]  }
 0x220   : > { %v943_v32 = vadd.f32 %v942_v31, %v739_v24  ;;  %v957_v33 = vmax.f32 %v941_v29, 0.0  ;;  %v4743_v29 = vld [vmem:[#allocation6 + $0x120] ss:$16 sps:$4 sm:$0xff]   ;;  %v4751_v31 = vld [vmem:[#allocation6 + $0x104] ss:$16 sps:$4 sm:$0xff]  }
 0x221   : > { %v946_v34 = vpop.f32.mrf.mxu1 }
 0x222   : > { %v958_v36 = vmax.f32 %v943_v32, 0.0  ;;  %v963_v41 = vpack.c.bf16 %v957_v33, %v955_v37  ;;  %v947_v46 = vadd.f32 %v946_v34, %v735_v25  ;;  %v4749_v32 = vld [vmem:[#allocation6 + $0x100] ss:$16 sps:$4 sm:$0xff]   ;;  %v4754_v34 = vld [vmem:[#allocation6 + $0x304] ss:$16 sps:$4 sm:$0xff]  }
 0x223   : > { %v948_v38 = vpop.f32.mrf.mxu1  ;;  %v4752_v33 = vld [vmem:[#allocation6 + $0x300] ss:$16 sps:$4 sm:$0xff]  }
 0x224   : > { %v964_v39 = vpack.c.bf16 %v958_v36, %v956_v35  ;;  %v949_v44 = vadd.f32 %v948_v38, %v739_v24  ;;  %v959_v54 = vmax.f32 %v947_v46, 0.0  ;;  %v4757_v35 = vld [vmem:[#allocation6 + $0x4e4] ss:$16 sps:$4 sm:$0xff]   ;;  %v4760_v36 = vld [vmem:[#allocation6 + $0xec] ss:$16 sps:$4 sm:$0xff]   ;;  %v1158_v46 = vadd.s32 16, %v5706_v19 }
 0x225   : > { %v950_v42 = vpop.f32.mrf.mxu1  ;;  %v4076_v38 = vld [vmem:[%s6056_s6] ss:$0 sm:$0xff] }
 0x226   : > { %v951_v45 = vadd.f32 %v950_v42, %v735_v25  ;;  %1134 = vmatprep.mubr.bf16.mxu0 %v964_v39  ;;  %v960_v52 = vmax.f32 %v949_v44, 0.0  ;;  %v4737_v25 = vld [vmem:[#allocation6 + $0x140] ss:$16 sps:$4 sm:$0xff]  }
 0x227   : > { %v952_v47 = vpop.f32.mrf.mxu1  ;;  %1135 = vmatmul.mubr.bf16.vlgmr.msra.gmra.mxu0 %v963_v41 }
 0x228   : > { %v953_v48 = vadd.f32 %v952_v47, %v739_v24  ;;  %2322 = vmatpush1.bf16.msra.mxu0 %v4659_v40  ;;  %v961_v50 = vmax.f32 %v951_v45, 0.0  ;;  %v4742_v24 = vld [vmem:[#allocation6 + $0x344] ss:$16 sps:$4 sm:$0xff]   ;;  %v1157_v40 = vadd.s32 8, %v5706_v19 }
 0x229   : > { %2323 = vmatprep.subr.bf16.mxu0 %v4667_v43  ;;  %2400 = vmatprep.subr.bf16.mxu1 %v4742_v24 }
 0x22a   : > { %v962_v53 = vmax.f32 %v953_v48, 0.0  ;;  %v965_v57 = vpack.c.bf16 %v961_v50, %v959_v54  ;;  %2401 = vmatpush2.bf16.msra.mxu1 %v4740_v26  ;;  %v5723_v45 = vand.u32 7, %v1157_v40  ;;  %v5741_v54 = vand.u32 7, %v1158_v46 }
 0x22b   : > { %2402 = vmatprep.subr.bf16.mxu1 %v4748_v28 }
 0x22c   : > { %v966_v55 = vpack.c.bf16 %v962_v53, %v960_v52  ;;  %2324 = vmatpush1.bf16.msra.mxu0 %v4665_v49  ;;  %v1159_v49 = vadd.s32 24, %v5706_v19  ;;  %v5734_v52 = vand.u32 7, %v5706_v19  ;;  %vm1227_vm7 = vcmp.ge.s32.totalorder %v5723_v45, 4 }
 0x22d   : > { %2325 = vmatprep.subr.bf16.mxu0 %v4673_v51  ;;  %vm1261_vm8 = vcmp.ge.s32.totalorder %v5723_v45, 3  ;;  %vm1295_vm9 = vcmp.ge.s32.totalorder %v5723_v45, 2  ;;  %vm1228_vm14 = vcmp.ge.s32.totalorder %v5741_v54, 4 }
 0x22e   : > { %1142 = vmatprep.mubr.bf16.mxu0 %v966_v55  ;;  %2403 = vmatpush2.bf16.msra.mxu1 %v4746_v30  ;;  %vm1226_vm11 = vcmp.ge.s32.totalorder %v5734_v52, 4  ;;  %vm1260_vm12 = vcmp.ge.s32.totalorder %v5734_v52, 3  ;;  %vm1294_vm13 = vcmp.ge.s32.totalorder %v5734_v52, 2 }
 0x22f   : > { %1143 = vmatmul.mubr.bf16.gmra.mxu0 %v965_v57  ;;  %2404 = vmatprep.subr.bf16.mxu1 %v4754_v34 }
 0x230   : > { %2326 = vmatpush1.bf16.msra.mxu0 %v4671_v56 }
 0x231   : > { %2327 = vmatprep.subr.bf16.mxu0 %v4679_v58  ;;  %v5747_v58 = vand.u32 7, %v1159_v49 }
 0x232   : > { %2405 = vmatpush2.bf16.msra.mxu1 %v4752_v33 }
 0x233   : > { %2480 = vmatprep.subr.bf16.mxu1 %v4760_v36  ;;  %vm1229_vm0 = vcmp.ge.s32.totalorder %v5747_v58, 4  ;;  %vm1297_vm15 = vcmp.ge.s32.totalorder %v5747_v58, 2 }
 0x234   : > { %2328 = vmatpush1.bf16.msra.mxu0 %v4677_v59 }
 0x235   : > { %2329 = vmatprep.subr.bf16.mxu0 %v4685_v60 }
 0x238   : > { %2330 = vmatpush1.bf16.msra.mxu0 %v4683_v61 }
 0x239   : > { %2331 = vmatprep.subr.bf16.mxu0 %v4691_v62 }
 0x23c   : > { %2332 = vmatpush1.bf16.msra.mxu0 %v4689_v63 }
 0x23d   : > { %2333 = vmatprep.subr.bf16.mxu0 %v4697_v0 }
 0x240   : > { %2334 = vmatpush1.bf16.msra.mxu0 %v4695_v1 }
 0x241   : > { %2335 = vmatprep.subr.bf16.mxu0 %v4703_v2 }
 0x244   : > { %2336 = vmatpush1.bf16.msra.mxu0 %v4701_v3 }
 0x245   : > { %2337 = vmatprep.subr.bf16.mxu0 %v4709_v4 }
 0x248   : > { %2338 = vmatpush2.bf16.msra.mxu0 %v4707_v5 }
 0x249   : > { %2339 = vmatprep.subr.bf16.mxu0 %v4715_v6 }
 0x24c   : > { %2340 = vmatpush2.bf16.msra.mxu0 %v4713_v7 }
 0x24d   : > { %2341 = vmatprep.subr.bf16.mxu0 %v4721_v8 }
 0x250   : > { %2342 = vmatpush2.bf16.msra.mxu0 %v4719_v10 }
 0x251   : > { %2343 = vmatprep.subr.bf16.mxu0 %v4727_v12 }
 0x254   : > { %2344 = vmatpush2.bf16.msra.mxu0 %v4725_v14 }
 0x255   : > { %2345 = vmatprep.subr.bf16.mxu0 %v4733_v16 }
 0x258   : > { %2346 = vmatpush2.bf16.msra.mxu0 %v4731_v18 }
 0x259   : > { %2347 = vmatprep.subr.bf16.mxu0 %v4739_v23 }
 0x25c   : > { %2348 = vmatpush2.bf16.msra.mxu0 %v4737_v25 }
 0x25d   : > { %2349 = vmatprep.subr.bf16.mxu0 %v4745_v27 }
 0x260   : > { %2350 = vmatpush2.bf16.msra.mxu0 %v4743_v29 }
 0x261   : > { %2351 = vmatprep.subr.bf16.mxu0 %v4751_v31 }
 0x264   : > { %2352 = vmatpush2.bf16.msra.mxu0 %v4749_v32 }
 0x265   : > { %2427 = vmatprep.subr.bf16.mxu0 %v4757_v35 }
 0x2e7   : > { %v4441_v37 = vpop.f32.mrf.mxu0 }
 0x2e9   : > { %v4442_v39 = vpop.f32.mrf.mxu0 }
 0x2ea   : > { %v4443_v41 = vadd.f32 %v4442_v39, %v4441_v37 }
 0x2eb   : > { %v4444_v42 = vpop.f32.mrf.mxu0 }
 0x2ec   : > { %v1137_v43 = vadd.f32 %v4443_v41, %v4076_v38 }
 0x2ed   : > { %v4445_v44 = vpop.f32.mrf.mxu0 }
 0x2ee   : > { %v5726_v47 = vmax.f32 %v1137_v43, 0.0  ;;  %v4446_v48 = vadd.f32 %v4445_v44, %v4444_v42 }
 0x2ef   : > { %v4447_v50 = vpop.f32.mrf.mxu0 }
 0x2f0   : > { %v1140_v51 = vadd.f32 %v4446_v48, %v4076_v38  ;;  %v1208_v57 = vrot.slane %v5726_v47, 1  ;;  %v1217_v60 = vrot.slane %v5726_v47, 4  ;;  %v1242_v61 = vrot.slane %v5726_v47, 2 }
 0x2f1   : > { %v4448_v53 = vpop.f32.mrf.mxu0  ;;  %v1251_v62 = vrot.slane %v5726_v47, 5  ;;  %v1276_v63 = vrot.slane %v5726_v47, 3  ;;  %v1285_v7 = vrot.slane %v5726_v47, 6  ;;  %v1310_v11 = vrot.slane %v5726_v47, 7 }
 0x2f2   : > { %v5743_v55 = vmax.f32 %v1140_v51, 0.0  ;;  %v4449_v56 = vadd.f32 %v4448_v53, %v4447_v50 }
 0x2f3   : > { %v4450_v59 = vpop.f32.mrf.mxu0 }
 0x2f4   : > { %v1145_v0 = vadd.f32 %v4449_v56, %v4076_v38  ;;  %v1209_v1 = vrot.slane %v5743_v55, 1  ;;  %v1218_v2 = vrot.slane %v5743_v55, 4  ;;  %v1243_v3 = vrot.slane %v5743_v55, 2 }
 0x2f5   : > { %v4451_v4 = vpop.f32.mrf.mxu0  ;;  %v1252_v5 = vrot.slane %v5743_v55, 5  ;;  %v1277_v6 = vrot.slane %v5743_v55, 3  ;;  %v1286_v8 = vrot.slane %v5743_v55, 6  ;;  %v5768_v12 = vpack.c.bf16 %v5743_v55, %v5726_v47 }
 0x2f6   : > { %v5763_v9 = vmax.f32 %v1145_v0, 0.0  ;;  %v4452_v10 = vadd.f32 %v4451_v4, %v4450_v59  ;;  %v1215_v13 = vsel %vm1212_vm1, %v1208_v57, %v1209_v1  ;;  %v5776_v14 = vsel %vm1221_vm2, %v1217_v60, %v1218_v2  ;;  %v4758_v4 = vld [vmem:[#allocation6 + $0xe8] ss:$16 sps:$4 sm:$0xff]  }
 0x2f7   : > { %v1249_v15 = vsel %vm1246_vm3, %v1242_v61, %v1243_v3  ;;  %v1258_v16 = vsel %vm1255_vm4, %v1251_v62, %v1252_v5  ;;  %v1283_v24 = vsel %vm1280_vm5, %v1276_v63, %v1277_v6  ;;  %v1292_v25 = vsel %vm1289_vm6, %v1285_v7, %v1286_v8 }
 0x2f8   : > { %v1148_v17 = vadd.f32 %v4452_v10, %v4076_v38  ;;  %v1210_v18 = vrot.slane %v5763_v9, 1  ;;  %v1244_v22 = vrot.slane %v5763_v9, 2  ;;  %v1278_v23 = vrot.slane %v5763_v9, 3 }
 0x2f9   : > { %v1219_v26 = vrot.slane %v5763_v9, 4  ;;  %v1311_v27 = vrot.slane %v5743_v55, 7  ;;  %v1287_v35 = vrot.slane %v5763_v9, 6 }
 0x2fa   : > { %v5803_v28 = vmax.f32 %v1148_v17, 0.0  ;;  %v1214_v29 = vsel %vm1212_vm1, %v1209_v1, %v1210_v18  ;;  %v1248_v30 = vsel %vm1246_vm3, %v1243_v3, %v1244_v22  ;;  %v1282_v31 = vsel %vm1280_vm5, %v1277_v6, %v1278_v23  ;;  %v4755_v1 = vld [vmem:[#allocation6 + $0x4e0] ss:$16 sps:$4 sm:$0xff]   ;;  %v4766_v17 = vld [vmem:[#allocation6 + $0xcc] ss:$16 sps:$4 sm:$0xff]  }
 0x2fb   : > { %v1239_v32 = vsel %vm1227_vm7, %v5776_v14, %v1214_v29  ;;  %v1273_v33 = vsel %vm1261_vm8, %v1258_v16, %v1248_v30  ;;  %v1307_v34 = vsel %vm1295_vm9, %v1292_v25, %v1282_v31  ;;  %vm1296_vm7 = vcmp.ge.s32.totalorder %v5741_v54, 2  ;;  %v4763_v16 = vld [vmem:[#allocation6 + $0x4c4] ss:$16 sps:$4 sm:$0xff]   ;;  %v4761_v30 = vld [vmem:[#allocation6 + $0x4c0] ss:$16 sps:$4 sm:$0xff]  }
 0x2fc   : > { %v1220_v36 = vrot.slane %v5803_v28, 4  ;;  %v1336_v37 = vadd.f32 %v1239_v32, %v5743_v55  ;;  %v1254_v38 = vrot.slane %v5803_v28, 5  ;;  %v1288_v39 = vrot.slane %v5803_v28, 6  ;;  %v4784_v55 = vld [vmem:[#allocation6 + $0x6c] ss:$16 sps:$4 sm:$0xff]  }
 0x2fd   : > { %v1313_v40 = vrot.slane %v5803_v28, 7  ;;  %v1211_v41 = vrot.slane %v5803_v28, 1  ;;  %v1223_v42 = vsel %vm1221_vm2, %v1218_v2, %v1219_v26  ;;  %v1317_v43 = vsel %vm1314_vm10, %v1310_v11, %v1311_v27 }
 0x2fe   : > { %v5839_v44 = vsel %vm1221_vm2, %v1220_v36, %v1217_v60  ;;  %v1259_v46 = vsel %vm1255_vm4, %v1254_v38, %v1251_v62  ;;  %v1293_v48 = vsel %vm1289_vm6, %v1288_v39, %v1285_v7  ;;  %v1340_v49 = vadd.f32 %v1336_v37, %v1273_v33 }
 0x2ff   : > { %vm1262_vm8 = vcmp.ge.s32.totalorder %v5741_v54, 3  ;;  %v1238_v50 = vsel %vm1226_vm11, %v5839_v44, %v1215_v13  ;;  %v1272_v51 = vsel %vm1260_vm12, %v1259_v46, %v1249_v15  ;;  %v1306_v53 = vsel %vm1294_vm13, %v1293_v48, %v1283_v24  ;;  %v4767_v46 = vld [vmem:[#allocation6 + $0x4a0] ss:$16 sps:$4 sm:$0xff]  }
 0x300   : > { %v1279_v56 = vrot.slane %v5803_v28, 3  ;;  %v1335_v59 = vadd.f32 %v1238_v50, %v5726_v47  ;;  %v5857_v60 = vpack.c.bf16 %v1239_v32, %v1238_v50  ;;  %v1318_v62 = vsel %vm1314_vm10, %v1313_v40, %v1310_v11 }
 0x301   : > { %v1344_v0 = vadd.f32 %v1340_v49, %v1307_v34  ;;  %v5863_v2 = vpack.c.bf16 %v1273_v33, %v1272_v51  ;;  %v5865_v3 = vpack.c.bf16 %v1307_v34, %v1306_v53  ;;  %v1213_v6 = vsel %vm1212_vm1, %v1210_v18, %v1211_v41  ;;  %v4764_v34 = vld [vmem:[#allocation6 + $0xc8] ss:$16 sps:$4 sm:$0xff]  }
 0x302   : > { %v1216_v7 = vsel %vm1212_vm1, %v1211_v41, %v1208_v57  ;;  %2353 = vmatprep.mubr.bf16.mxu0 %v5857_v60  ;;  %v1339_v10 = vadd.f32 %v1335_v59, %v1272_v51  ;;  %v5876_v11 = vsel %vm1221_vm2, %v1219_v26, %v1220_v36  ;;  %v1240_v13 = vsel %vm1228_vm14, %v1223_v42, %v1213_v6  ;;  %v4769_v36 = vld [vmem:[#allocation6 + $0x4a4] ss:$16 sps:$4 sm:$0xff]  }
 0x303   : > { %vm6102_vm9 = vcmp.ge.s32.totalorder %v5723_v45, 1  ;;  %2406 = vmatprep.mubr.bf16.mxu1 %v5865_v3  ;;  %2354 = vmatmul.mubr.bf16.vlgmr.msra.gmra.mxu0 %v5768_v12  ;;  %v1241_v57 = vsel %vm1229_vm0, %v5876_v11, %v1216_v7  ;;  %v1337_v18 = vadd.f32 %v1240_v13, %v5763_v9  ;;  %v1245_v25 = vrot.slane %v5803_v28, 2  ;;  %v4779_v7 = vld [vmem:[#allocation6 + $0x460] ss:$16 sps:$4 sm:$0xff]  }
 0x304   : > { %v5882_v15 = vsel %vm6102_vm9, %v1317_v43, %v1223_v42  ;;  %vm6103_vm1 = vcmp.ge.s32.totalorder %v5734_v52, 1  ;;  %v1343_v26 = vadd.f32 %v1339_v10, %v1306_v53  ;;  %2407 = vmatmul.mubr.bf16.vlgmr.msra.gmra.mxu1 %v5863_v2  ;;  %2428 = vmatpush1.bf16.msra.mxu0 %v4755_v1  ;;  %v1338_v29 = vadd.f32 %v1241_v57, %v5803_v28  ;;  %v4772_v42 = vld [vmem:[#allocation6 + $0xac] ss:$16 sps:$4 sm:$0xff]   ;;  %v4775_v53 = vld [vmem:[#allocation6 + $0x484] ss:$16 sps:$4 sm:$0xff]  }
 0x305   : > { %v5891_v24 = vadd.f32 %v1344_v0, %v5882_v15  ;;  %v5897_v45 = vsel %vm6103_vm1, %v1318_v62, %v5776_v14  ;;  %v1253_v31 = vrot.slane %v5763_v9, 5  ;;  %2481 = vmatpush1.bf16.msra.mxu1 %v4758_v4  ;;  %v5902_v32 = vpack.c.bf16 %v1241_v57, %v1240_v13  ;;  %2429 = vmatprep.subr.bf16.mxu0 %v4763_v16  ;;  %v4781_v1 = vld [vmem:[#allocation6 + $0x464] ss:$16 sps:$4 sm:$0xff]   ;;  %v4785_v13 = vld [vmem:[#allocation6 + $0x440] ss:$16 sps:$4 sm:$0xff]  }
 0x306   : > { %v1281_v33 = vsel %vm1280_vm5, %v1278_v23, %v1279_v56  ;;  %v1284_v52 = vsel %vm1280_vm5, %v1279_v56, %v1276_v63  ;;  %v1290_v14 = vsel %vm1289_vm6, %v1287_v35, %v1288_v39  ;;  %v5915_v37 = vadd.f32 %v1343_v26, %v5897_v45  ;;  %2482 = vmatprep.subr.bf16.mxu1 %v4766_v17  ;;  %v4778_v56 = vld [vmem:[#allocation6 + $0x8c] ss:$16 sps:$4 sm:$0xff]   ;;  %v4787_v10 = vld [vmem:[#allocation6 + $0x444] ss:$16 sps:$4 sm:$0xff]   ;;  %v4788_v16 = vld [vmem:[#allocation6 + $0x48] ss:$16 sps:$4 sm:$0xff]  }
 0x307   : > { %v1291_v41 = vsel %vm1289_vm6, %v1286_v8, %v1287_v35  ;;  %v1309_v23 = vsel %vm1297_vm15, %v1290_v14, %v1284_v52  ;;  %vm1263_vm2 = vcmp.ge.s32.totalorder %v5747_v58, 3  ;;  %2363 = vmatprep.mubr.bf16.mxu0 %v5902_v32  ;;  %v1247_v39 = vsel %vm1246_vm3, %v1244_v22, %v1245_v25  ;;  %v4793_v17 = vld [vmem:[#allocation6 + $0x424] ss:$16 sps:$4 sm:$0xff]   ;;  %v4796_v57 = vld [vmem:[#allocation6 + $0x2c] ss:$16 sps:$4 sm:$0xff]  }
 0x308   : > { %v1308_v63 = vsel %vm1296_vm7, %v1291_v41, %v1281_v33  ;;  %v1250_v8 = vsel %vm1246_vm3, %v1245_v25, %v1242_v61  ;;  %v1312_v35 = vrot.slane %v5763_v9, 7  ;;  %2430 = vmatpush1.bf16.msra.mxu0 %v4761_v30  ;;  %v5940_v48 = vpack.c.bf16 %v5803_v28, %v5763_v9  ;;  %v4770_v61 = vld [vmem:[#allocation6 + $0xa8] ss:$16 sps:$4 sm:$0xff]   ;;  %v4799_v26 = vld [vmem:[#allocation6 + $0x404] ss:$16 sps:$4 sm:$0xff]  }
 0x309   : > { %v5936_v43 = vpack.c.bf16 %v1309_v23, %v1308_v63  ;;  %v1256_v22 = vsel %vm1255_vm4, %v1253_v31, %v1254_v38  ;;  %v1257_v47 = vsel %vm1255_vm4, %v1252_v5, %v1253_v31  ;;  %2483 = vmatpush1.bf16.msra.mxu1 %v4764_v34  ;;  %2431 = vmatprep.subr.bf16.mxu0 %v4769_v36  ;;  %vm1321_vm3 = vcmp.ge.s32.totalorder %v5741_v54, 1  ;;  %v4794_v25 = vld [vmem:[#allocation6 + $0x28] ss:$16 sps:$4 sm:$0xff]   ;;  %v4797_v30 = vld [vmem:[#allocation6 + $0x400] ss:$16 sps:$4 sm:$0xff]  }
 0x30a   : > { %v1274_v49 = vsel %vm1262_vm8, %v1257_v47, %v1247_v39  ;;  %v1275_v9 = vsel %vm1263_vm2, %v1256_v22, %v1250_v8  ;;  %v1315_v50 = vsel %vm1314_vm10, %v1312_v35, %v1313_v40  ;;  %2484 = vmatprep.subr.bf16.mxu1 %v4772_v42  ;;  %vm1322_vm4 = vcmp.ge.s32.totalorder %v5747_v58, 1  ;;  %v4773_v40 = vld [vmem:[#allocation6 + $0x480] ss:$16 sps:$4 sm:$0xff]   ;;  %v4776_v58 = vld [vmem:[#allocation6 + $0x88] ss:$16 sps:$4 sm:$0xff]  }
 0x30b   : > { %2416 = vmatprep.mubr.bf16.mxu1 %v5936_v43  ;;  %v1341_v5 = vadd.f32 %v1337_v18, %v1274_v49  ;;  %v1342_v38 = vadd.f32 %v1338_v29, %v1275_v9  ;;  %v5960_v51 = vpack.c.bf16 %v1275_v9, %v1274_v49  ;;  %2364 = vmatmul.mubr.bf16.gmra.mxu0 %v5940_v48  ;;  %v4791_v18 = vld [vmem:[#allocation6 + $0x420] ss:$16 sps:$4 sm:$0xff]   ;;  %v4802_v29 = vld [vmem:[#allocation6 + $0xc] ss:$16 sps:$4 sm:$0xff]   ;;  %v4800_v31 = vld [vmem:[#allocation6 + $0x8] ss:$16 sps:$4 sm:$0xff]  }
 0x30c   : > { %v2639_v28 = vpack.c.bf16 %v5891_v24, %v5915_v37  ;;  %2432 = vmatpush1.bf16.msra.mxu0 %v4767_v46  ;;  %v1316_v59 = vsel %vm1314_vm10, %v1311_v27, %v1312_v35  ;;  %v5978_v6 = vsel %vm1322_vm4, %v1315_v50, %v5839_v44  ;;  %v4782_v44 = vld [vmem:[#allocation6 + $0x68] ss:$16 sps:$4 sm:$0xff]   ;;  %v4808_v33 = vld [vmem:[#allocation6 + $0x2ec] ss:$16 sps:$4 sm:$0xff]   ;;  %v5991_v34 = vpack.c.bf16 %v5882_v15, %v5897_v45 }
 0x30d   : > { %2417 = vmatmul.mubr.bf16.gmra.mxu1 %v5960_v51  ;;  %v1345_v62 = vadd.f32 %v1341_v5, %v1308_v63  ;;  %v1346_v0 = vadd.f32 %v1342_v38, %v1309_v23  ;;  %v5975_v4 = vsel %vm1321_vm3, %v1316_v59, %v5876_v11  ;;  %2433 = vmatprep.subr.bf16.mxu0 %v4775_v53  ;;  %v4790_v11 = vld [vmem:[#allocation6 + $0x4c] ss:$16 sps:$4 sm:$0xff]   ;;  %v4806_v14 = vld [vmem:[#allocation6 + $0x2e8] ss:$16 sps:$4 sm:$0xff]  }
 0x30e   : > { %2485 = vmatpush1.bf16.msra.mxu1 %v4770_v61  ;;  %2512 = vmatprep.mubr.bf16.mxu1 %v5857_v60  ;;  %v5325_v60 = vmov 0   ;;  %v4805_v52 = vld [vmem:[#allocation6 + $0x1ec] ss:$16 sps:$4 sm:$0xff]   ;;  %v4803_v36 = vld [vmem:[#allocation6 + $0x1e8] ss:$16 sps:$4 sm:$0xff]   ;;  %v5997_v45 = vpack.c.bf16 %v5978_v6, %v5975_v4 }
 0x30f   : > { %2486 = vmatprep.subr.bf16.mxu1 %v4778_v56  ;;  %v5981_v19 = vadd.f32 %v1345_v62, %v5975_v4  ;;  %v5984_v27 = vadd.f32 %v1346_v0, %v5978_v6  ;;  %2459 = vmatprep.mubr.bf16.mxu0 %v5325_v60  ;;  %v4814_v41 = vld [vmem:[#allocation6 + $0x2cc] ss:$16 sps:$4 sm:$0xff]   ;;  %v4812_v42 = vld [vmem:[#allocation6 + $0x2c8] ss:$16 sps:$4 sm:$0xff]  }
 0x310   : > { %2434 = vmatpush1.bf16.msra.mxu0 %v4773_v40  ;;  %v4811_v23 = vld [vmem:[#allocation6 + $0x1cc] ss:$16 sps:$4 sm:$0xff]   ;;  %v4809_v63 = vld [vmem:[#allocation6 + $0x1c8] ss:$16 sps:$4 sm:$0xff]  }
 0x311   : > { %v2640_v54 = vpack.c.bf16 %v5984_v27, %v5981_v19  ;;  %2435 = vmatprep.subr.bf16.mxu0 %v4781_v1  ;;  %v4820_v39 = vld [vmem:[#allocation6 + $0x2ac] ss:$16 sps:$4 sm:$0xff]   ;;  %v4818_v15 = vld [vmem:[#allocation6 + $0x2a8] ss:$16 sps:$4 sm:$0xff]  }
 0x312   : > { %2487 = vmatpush1.bf16.msra.mxu1 %v4776_v58  ;;  %v4817_v8 = vld [vmem:[#allocation6 + $0x1ac] ss:$16 sps:$4 sm:$0xff]   ;;  %v4815_v35 = vld [vmem:[#allocation6 + $0x1a8] ss:$16 sps:$4 sm:$0xff]  }
 0x313   : > { %2488 = vmatprep.subr.bf16.mxu1 %v4784_v55  ;;  %v4826_v46 = vld [vmem:[#allocation6 + $0x28c] ss:$16 sps:$4 sm:$0xff]   ;;  %v4824_v47 = vld [vmem:[#allocation6 + $0x288] ss:$16 sps:$4 sm:$0xff]  }
 0x314   : > { %2436 = vmatpush1.bf16.msra.mxu0 %v4779_v7  ;;  %v4823_v22 = vld [vmem:[#allocation6 + $0x18c] ss:$16 sps:$4 sm:$0xff]   ;;  %v4821_v61 = vld [vmem:[#allocation6 + $0x188] ss:$16 sps:$4 sm:$0xff]  }
 0x315   : > { %2437 = vmatprep.subr.bf16.mxu0 %v4787_v10  ;;  %v4832_v49 = vld [vmem:[#allocation6 + $0x26c] ss:$16 sps:$4 sm:$0xff]   ;;  %v4830_v50 = vld [vmem:[#allocation6 + $0x268] ss:$16 sps:$4 sm:$0xff]  }
 0x316   : > { %2489 = vmatpush1.bf16.msra.mxu1 %v4782_v44  ;;  %v4829_v9 = vld [vmem:[#allocation6 + $0x16c] ss:$16 sps:$4 sm:$0xff]   ;;  %v4827_v5 = vld [vmem:[#allocation6 + $0x168] ss:$16 sps:$4 sm:$0xff]  }
 0x317   : > { %2490 = vmatprep.subr.bf16.mxu1 %v4790_v11  ;;  %v4838_v38 = vld [vmem:[#allocation6 + $0x24c] ss:$16 sps:$4 sm:$0xff]   ;;  %v4836_v56 = vld [vmem:[#allocation6 + $0x248] ss:$16 sps:$4 sm:$0xff]  }
 0x318   : > { %2438 = vmatpush1.bf16.msra.mxu0 %v4785_v13  ;;  %v4835_v53 = vld [vmem:[#allocation6 + $0x14c] ss:$16 sps:$4 sm:$0xff]   ;;  %v4833_v40 = vld [vmem:[#allocation6 + $0x148] ss:$16 sps:$4 sm:$0xff]  }
 0x319   : > { %2439 = vmatprep.subr.bf16.mxu0 %v4793_v17  ;;  %v4841_v59 = vld [vmem:[#allocation6 + $0x12c] ss:$16 sps:$4 sm:$0xff]   ;;  %v4842_v62 = vld [vmem:[#allocation6 + $0x228] ss:$16 sps:$4 sm:$0xff]  }
 0x31a   : > { %2491 = vmatpush1.bf16.msra.mxu1 %v4788_v16  ;;  %v4839_v0 = vld [vmem:[#allocation6 + $0x128] ss:$16 sps:$4 sm:$0xff]   ;;  %v4850_v58 = vld [vmem:[#allocation6 + $0x20c] ss:$16 sps:$4 sm:$0xff]  }
 0x31b   : > { %2492 = vmatprep.subr.bf16.mxu1 %v4796_v57  ;;  %v4847_v1 = vld [vmem:[#allocation6 + $0x10c] ss:$16 sps:$4 sm:$0xff]   ;;  %v4848_v4 = vld [vmem:[#allocation6 + $0x208] ss:$16 sps:$4 sm:$0xff]  }
 0x31c   : > { %2440 = vmatpush1.bf16.msra.mxu0 %v4791_v18  ;;  %v4845_v6 = vld [vmem:[#allocation6 + $0x108] ss:$16 sps:$4 sm:$0xff]   ;;  %v4853_v55 = vld [vmem:[#allocation6 + $0x3ec] ss:$16 sps:$4 sm:$0xff]  }
 0x31d   : > { %2441 = vmatprep.subr.bf16.mxu0 %v4799_v26  ;;  %v4856_v7 = vld [vmem:[#allocation6 + $0x4ec] ss:$16 sps:$4 sm:$0xff]   ;;  %v4851_v44 = vld [vmem:[#allocation6 + $0x3e8] ss:$16 sps:$4 sm:$0xff]  }
 0x31e   : > { %2493 = vmatpush1.bf16.msra.mxu1 %v4794_v25  ;;  %v4854_v10 = vld [vmem:[#allocation6 + $0x4e8] ss:$16 sps:$4 sm:$0xff]   ;;  %v4859_v11 = vld [vmem:[#allocation6 + $0x3cc] ss:$16 sps:$4 sm:$0xff]  }
 0x31f   : > { %2494 = vmatprep.subr.bf16.mxu1 %v4802_v29  ;;  %v4862_v13 = vld [vmem:[#allocation6 + $0x4cc] ss:$16 sps:$4 sm:$0xff]   ;;  %v4857_v16 = vld [vmem:[#allocation6 + $0x3c8] ss:$16 sps:$4 sm:$0xff]  }
 0x320   : > { %2442 = vmatpush1.bf16.msra.mxu0 %v4797_v30  ;;  %v4860_v17 = vld [vmem:[#allocation6 + $0x4c8] ss:$16 sps:$4 sm:$0xff]   ;;  %v4865_v57 = vld [vmem:[#allocation6 + $0x3ac] ss:$16 sps:$4 sm:$0xff]  }
 0x321   : > { %2533 = vmatprep.subr.bf16.mxu0 %v4808_v33  ;;  %v4868_v18 = vld [vmem:[#allocation6 + $0x4ac] ss:$16 sps:$4 sm:$0xff]   ;;  %v4863_v25 = vld [vmem:[#allocation6 + $0x3a8] ss:$16 sps:$4 sm:$0xff]  }
 0x322   : > { %2495 = vmatpush1.bf16.msra.mxu1 %v4800_v31  ;;  %v4866_v26 = vld [vmem:[#allocation6 + $0x4a8] ss:$16 sps:$4 sm:$0xff]   ;;  %v4871_v29 = vld [vmem:[#allocation6 + $0x38c] ss:$16 sps:$4 sm:$0xff]  }
 0x323   : > { %2496 = vmatprep.subr.bf16.mxu1 %v4805_v52  ;;  %2460 = vmatmul.mubr.bf16.vlgmr.msra.gmra.mxu0 %v5991_v34  ;;  %v4874_v30 = vld [vmem:[#allocation6 + $0x48c] ss:$16 sps:$4 sm:$0xff]   ;;  %v4869_v31 = vld [vmem:[#allocation6 + $0x388] ss:$16 sps:$4 sm:$0xff]  }
 0x324   : > { %2534 = vmatpush1.bf16.msra.mxu0 %v4806_v14  ;;  %2469 = vmatprep.mubr.bf16.mxu0 %v5325_v60  ;;  %v4877_v33 = vld [vmem:[#allocation6 + $0x36c] ss:$16 sps:$4 sm:$0xff]   ;;  %v4875_v14 = vld [vmem:[#allocation6 + $0x368] ss:$16 sps:$4 sm:$0xff]  }
 0x325   : > { %2535 = vmatprep.subr.bf16.mxu0 %v4814_v41  ;;  %v4880_v52 = vld [vmem:[#allocation6 + $0x46c] ss:$16 sps:$4 sm:$0xff]   ;;  %v5007_v24 = vld [vmem:[#allocation7 + $0x230] ss:$8 sps:$4 sm:$0xff]  }
 0x326   : > { %2497 = vmatpush2.bf16.msra.mxu1 %v4803_v36  ;;  %v4878_v36 = vld [vmem:[#allocation6 + $0x468] ss:$16 sps:$4 sm:$0xff]   ;;  %v4883_v41 = vld [vmem:[#allocation6 + $0x34c] ss:$16 sps:$4 sm:$0xff]  }
 0x327   : > { %2498 = vmatprep.subr.bf16.mxu1 %v4811_v23  ;;  %v4886_v23 = vld [vmem:[#allocation6 + $0x44c] ss:$16 sps:$4 sm:$0xff]   ;;  %v5019_v27 = vld [vmem:[#allocation7 + $0x2f0] ss:$8 sps:$4 sm:$0xff]  }
 0x328   : > { %2536 = vmatpush1.bf16.msra.mxu0 %v4812_v42  ;;  %v4881_v42 = vld [vmem:[#allocation6 + $0x348] ss:$16 sps:$4 sm:$0xff]   ;;  %v5012_v37 = vld [vmem:[#allocation7 + $0x224] ss:$8 sps:$4 sm:$0xff]   ;;  %v5021_v19 = vld [vmem:[#allocation7 + $0x2f4] ss:$8 sps:$4 sm:$0xff]  }
 0x329   : > { %2537 = vmatprep.subr.bf16.mxu0 %v4820_v39  ;;  %v4889_v39 = vld [vmem:[#allocation6 + $0x32c] ss:$16 sps:$4 sm:$0xff]  }
 0x32a   : > { %2499 = vmatpush2.bf16.msra.mxu1 %v4809_v63  ;;  %v4884_v63 = vld [vmem:[#allocation6 + $0x448] ss:$16 sps:$4 sm:$0xff]  }
 0x32b   : > { %2500 = vmatprep.subr.bf16.mxu1 %v4817_v8  ;;  %2470 = vmatmul.mubr.bf16.gmra.mxu0 %v5997_v45  ;;  %v4892_v8 = vld [vmem:[#allocation6 + $0x42c] ss:$16 sps:$4 sm:$0xff]  }
 0x32c   : > { %2538 = vmatpush1.bf16.msra.mxu0 %v4818_v15  ;;  %2565 = vmatprep.mubr.bf16.mxu0 %v5865_v3  ;;  %v4844_v3 = vld [vmem:[#allocation6 + $0x22c] ss:$16 sps:$4 sm:$0xff]   ;;  %v4887_v15 = vld [vmem:[#allocation6 + $0x328] ss:$16 sps:$4 sm:$0xff]  }
 0x32d   : > { %2539 = vmatprep.subr.bf16.mxu0 %v4826_v46  ;;  %v4895_v46 = vld [vmem:[#allocation6 + $0x30c] ss:$16 sps:$4 sm:$0xff]  }
 0x32e   : > { %2501 = vmatpush2.bf16.msra.mxu1 %v4815_v35  ;;  %v4890_v35 = vld [vmem:[#allocation6 + $0x428] ss:$16 sps:$4 sm:$0xff]  }
 0x32f   : > { %2502 = vmatprep.subr.bf16.mxu1 %v4823_v22  ;;  %v4898_v22 = vld [vmem:[#allocation6 + $0x40c] ss:$16 sps:$4 sm:$0xff]  }
 0x330   : > { %2540 = vmatpush1.bf16.msra.mxu0 %v4824_v47  ;;  %v4893_v47 = vld [vmem:[#allocation6 + $0x308] ss:$16 sps:$4 sm:$0xff]  }
 0x331   : > { %2541 = vmatprep.subr.bf16.mxu0 %v4832_v49  ;;  %v4901_v49 = vld [vmem:[#allocation7 + $0x74] ss:$8 sps:$4 sm:$0xff]  }
 0x332   : > { %2503 = vmatpush2.bf16.msra.mxu1 %v4821_v61  ;;  %v4896_v61 = vld [vmem:[#allocation6 + $0x408] ss:$16 sps:$4 sm:$0xff]  }
 0x333   : > { %2504 = vmatprep.subr.bf16.mxu1 %v4829_v9  ;;  %v4949_v9 = vld [vmem:[#allocation7 + $0x174] ss:$8 sps:$4 sm:$0xff]  }
 0x334   : > { %2542 = vmatpush1.bf16.msra.mxu0 %v4830_v50  ;;  %v4899_v50 = vld [vmem:[#allocation7 + $0x70] ss:$8 sps:$4 sm:$0xff]  }
 0x335   : > { %2543 = vmatprep.subr.bf16.mxu0 %v4838_v38  ;;  %v4947_v38 = vld [vmem:[#allocation7 + $0x170] ss:$8 sps:$4 sm:$0xff]  }
 0x336   : > { %2505 = vmatpush2.bf16.msra.mxu1 %v4827_v5  ;;  %v4904_v5 = vld [vmem:[#allocation7 + $0x64] ss:$8 sps:$4 sm:$0xff]  }
 0x337   : > { %2506 = vmatprep.subr.bf16.mxu1 %v4835_v53  ;;  %v4952_v53 = vld [vmem:[#allocation7 + $0x164] ss:$8 sps:$4 sm:$0xff]  }
 0x338   : > { %2544 = vmatpush1.bf16.msra.mxu0 %v4836_v56  ;;  %v4902_v56 = vld [vmem:[#allocation7 + $0x60] ss:$8 sps:$4 sm:$0xff]  }
 0x339   : > { %2545 = vmatprep.subr.bf16.mxu0 %v4844_v3  ;;  %v4950_v3 = vld [vmem:[#allocation7 + $0x160] ss:$8 sps:$4 sm:$0xff]  }
 0x33a   : > { %2507 = vmatpush2.bf16.msra.mxu1 %v4833_v40  ;;  %v4907_v40 = vld [vmem:[#allocation7 + $0x54] ss:$8 sps:$4 sm:$0xff]  }
 0x33b   : > { %2508 = vmatprep.subr.bf16.mxu1 %v4841_v59  ;;  %v4955_v59 = vld [vmem:[#allocation7 + $0x154] ss:$8 sps:$4 sm:$0xff]  }
 0x33c   : > { %2546 = vmatpush1.bf16.msra.mxu0 %v4842_v62  ;;  %v4905_v62 = vld [vmem:[#allocation7 + $0x50] ss:$8 sps:$4 sm:$0xff]  }
 0x33d   : > { %2547 = vmatprep.subr.bf16.mxu0 %v4850_v58  ;;  %v4956_v58 = vld [vmem:[#allocation7 + $0x140] ss:$8 sps:$4 sm:$0xff]  }
 0x33e   : > { %2509 = vmatpush2.bf16.msra.mxu1 %v4839_v0  ;;  %v4910_v0 = vld [vmem:[#allocation7 + $0x44] ss:$8 sps:$4 sm:$0xff]  }
 0x33f   : > { %2510 = vmatprep.subr.bf16.mxu1 %v4847_v1  ;;  %v4961_v1 = vld [vmem:[#allocation7 + $0x134] ss:$8 sps:$4 sm:$0xff]  }
 0x340   : > { %2548 = vmatpush1.bf16.msra.mxu0 %v4848_v4  ;;  %v4911_v4 = vld [vmem:[#allocation7 + $0x30] ss:$8 sps:$4 sm:$0xff]  }
 0x341   : > { %2549 = vmatprep.subr.bf16.mxu0 %v4853_v55  ;;  %v4964_v55 = vld [vmem:[#allocation7 + $0x124] ss:$8 sps:$4 sm:$0xff]  }
 0x342   : > { %2511 = vmatpush2.bf16.msra.mxu1 %v4845_v6  ;;  %v4916_v6 = vld [vmem:[#allocation7 + $0x24] ss:$8 sps:$4 sm:$0xff]  }
 0x343   : > { %2586 = vmatprep.subr.bf16.mxu1 %v4856_v7  ;;  %v4962_v7 = vld [vmem:[#allocation7 + $0x120] ss:$8 sps:$4 sm:$0xff]  }
 0x344   : > { %2550 = vmatpush2.bf16.msra.mxu0 %v4851_v44  ;;  %v4967_v44 = vld [vmem:[#allocation7 + $0x114] ss:$8 sps:$4 sm:$0xff]  }
 0x345   : > { %2513 = vmatmul.mubr.bf16.vlgmr.msra.gmra.mxu1 %v5768_v12  ;;  %2551 = vmatprep.subr.bf16.mxu0 %v4859_v11  ;;  %v4922_v11 = vld [vmem:[#allocation7 + $0x4] ss:$8 sps:$4 sm:$0xff]  }
 0x346   : > { %2522 = vmatprep.mubr.bf16.mxu1 %v5902_v32  ;;  %2587 = vmatpush1.bf16.msra.mxu1 %v4854_v10  ;;  %v4872_v32 = vld [vmem:[#allocation6 + $0x488] ss:$16 sps:$4 sm:$0xff]  }
 0x347   : > { %2588 = vmatprep.subr.bf16.mxu1 %v4862_v13  ;;  %v4917_v10 = vld [vmem:[#allocation7 + $0x10] ss:$8 sps:$4 sm:$0xff]  }
 0x348   : > { %2552 = vmatpush2.bf16.msra.mxu0 %v4857_v16  ;;  %v4965_v13 = vld [vmem:[#allocation7 + $0x110] ss:$8 sps:$4 sm:$0xff]   ;;  %v4970_v16 = vld [vmem:[#allocation7 + $0x104] ss:$8 sps:$4 sm:$0xff]  }
 0x349   : > { %2553 = vmatprep.subr.bf16.mxu0 %v4865_v57  ;;  %v4925_v57 = vld [vmem:[#allocation7 + $0xf4] ss:$8 sps:$4 sm:$0xff]  }
 0x34a   : > { %2589 = vmatpush1.bf16.msra.mxu1 %v4860_v17  ;;  %v4920_v17 = vld [vmem:[#allocation7] ss:$8 sps:$4 sm:$0xff]  }
 0x34b   : > { %2590 = vmatprep.subr.bf16.mxu1 %v4868_v18  ;;  %v4968_v18 = vld [vmem:[#allocation7 + $0x100] ss:$8 sps:$4 sm:$0xff]  }
 0x34c   : > { %2554 = vmatpush2.bf16.msra.mxu0 %v4863_v25  ;;  %v4973_v25 = vld [vmem:[#allocation7 + $0x1f4] ss:$8 sps:$4 sm:$0xff]  }
 0x34d   : > { %2523 = vmatmul.mubr.bf16.gmra.mxu1 %v5940_v48  ;;  %2555 = vmatprep.subr.bf16.mxu0 %v4871_v29  ;;  %v4928_v29 = vld [vmem:[#allocation7 + $0xe4] ss:$8 sps:$4 sm:$0xff]  }
 0x34e   : > { %2591 = vmatpush1.bf16.msra.mxu1 %v4866_v26  ;;  %2618 = vmatprep.mubr.bf16.mxu1 %v5325_v60  ;;  %v4923_v26 = vld [vmem:[#allocation7 + $0xf0] ss:$8 sps:$4 sm:$0xff]  }
 0x34f   : > { %2592 = vmatprep.subr.bf16.mxu1 %v4874_v30  ;;  %v4971_v30 = vld [vmem:[#allocation7 + $0x1f0] ss:$8 sps:$4 sm:$0xff]  }
 0x350   : > { %2556 = vmatpush2.bf16.msra.mxu0 %v4869_v31  ;;  %v4976_v31 = vld [vmem:[#allocation7 + $0x1e4] ss:$8 sps:$4 sm:$0xff]  }
 0x351   : > { %2557 = vmatprep.subr.bf16.mxu0 %v4877_v33  ;;  %v4931_v33 = vld [vmem:[#allocation7 + $0xd4] ss:$8 sps:$4 sm:$0xff]  }
 0x352   : > { %2593 = vmatpush1.bf16.msra.mxu1 %v4872_v32  ;;  %v4926_v32 = vld [vmem:[#allocation7 + $0xe0] ss:$8 sps:$4 sm:$0xff]  }
 0x353   : > { %2594 = vmatprep.subr.bf16.mxu1 %v4880_v52  ;;  %v4974_v52 = vld [vmem:[#allocation7 + $0x1e0] ss:$8 sps:$4 sm:$0xff]  }
 0x354   : > { %2558 = vmatpush2.bf16.msra.mxu0 %v4875_v14  ;;  %v4979_v14 = vld [vmem:[#allocation7 + $0x1d4] ss:$8 sps:$4 sm:$0xff]  }
 0x355   : > { %2559 = vmatprep.subr.bf16.mxu0 %v4883_v41  ;;  %v4934_v41 = vld [vmem:[#allocation7 + $0xc4] ss:$8 sps:$4 sm:$0xff]  }
 0x356   : > { %2595 = vmatpush1.bf16.msra.mxu1 %v4878_v36  ;;  %v4929_v36 = vld [vmem:[#allocation7 + $0xd0] ss:$8 sps:$4 sm:$0xff]  }
 0x357   : > { %2596 = vmatprep.subr.bf16.mxu1 %v4886_v23  ;;  %v4977_v23 = vld [vmem:[#allocation7 + $0x1d0] ss:$8 sps:$4 sm:$0xff]  }
 0x358   : > { %2560 = vmatpush2.bf16.msra.mxu0 %v4881_v42  ;;  %v4982_v42 = vld [vmem:[#allocation7 + $0x1c4] ss:$8 sps:$4 sm:$0xff]  }
 0x359   : > { %2561 = vmatprep.subr.bf16.mxu0 %v4889_v39  ;;  %v4937_v39 = vld [vmem:[#allocation7 + $0xb4] ss:$8 sps:$4 sm:$0xff]  }
 0x35a   : > { %2597 = vmatpush1.bf16.msra.mxu1 %v4884_v63  ;;  %v4932_v63 = vld [vmem:[#allocation7 + $0xc0] ss:$8 sps:$4 sm:$0xff]  }
 0x35b   : > { %2598 = vmatprep.subr.bf16.mxu1 %v4892_v8  ;;  %v4980_v8 = vld [vmem:[#allocation7 + $0x1c0] ss:$8 sps:$4 sm:$0xff]  }
 0x35c   : > { %2562 = vmatpush2.bf16.msra.mxu0 %v4887_v15  ;;  %v4985_v15 = vld [vmem:[#allocation7 + $0x1b4] ss:$8 sps:$4 sm:$0xff]  }
 0x35d   : > { %2563 = vmatprep.subr.bf16.mxu0 %v4895_v46  ;;  %v4940_v46 = vld [vmem:[#allocation7 + $0xa4] ss:$8 sps:$4 sm:$0xff]  }
 0x35e   : > { %2599 = vmatpush1.bf16.msra.mxu1 %v4890_v35  ;;  %v4935_v35 = vld [vmem:[#allocation7 + $0xb0] ss:$8 sps:$4 sm:$0xff]  }
 0x35f   : > { %2600 = vmatprep.subr.bf16.mxu1 %v4898_v22  ;;  %v4983_v22 = vld [vmem:[#allocation7 + $0x1b0] ss:$8 sps:$4 sm:$0xff]  }
 0x360   : > { %2564 = vmatpush2.bf16.msra.mxu0 %v4893_v47  ;;  %v4988_v47 = vld [vmem:[#allocation7 + $0x1a4] ss:$8 sps:$4 sm:$0xff]  }
 0x361   : > { %3237 = vmatprep.subr.bf16.mxu0 %v4901_v49  ;;  %v4943_v49 = vld [vmem:[#allocation7 + $0x94] ss:$8 sps:$4 sm:$0xff]  }
 0x362   : > { %2601 = vmatpush1.bf16.msra.mxu1 %v4896_v61  ;;  %v4938_v61 = vld [vmem:[#allocation7 + $0xa0] ss:$8 sps:$4 sm:$0xff]  }
 0x363   : > { %3290 = vmatprep.subr.bf16.mxu1 %v4949_v9  ;;  %2566 = vmatmul.mubr.bf16.vlgmr.msra.gmra.mxu0 %v5863_v2  ;;  %v4953_v2 = vld [vmem:[#allocation7 + $0x150] ss:$8 sps:$4 sm:$0xff]   ;;  %v4986_v9 = vld [vmem:[#allocation7 + $0x1a0] ss:$8 sps:$4 sm:$0xff]  }
 0x364   : > { %2575 = vmatprep.mubr.bf16.mxu0 %v5936_v43  ;;  %3238 = vmatpush1.bf16.msra.mxu0 %v4899_v50  ;;  %v4958_v43 = vld [vmem:[#allocation7 + $0x144] ss:$8 sps:$4 sm:$0xff]   ;;  %v4991_v50 = vld [vmem:[#allocation7 + $0x194] ss:$8 sps:$4 sm:$0xff]  }
 0x365   : > { %2619 = vmatmul.mubr.bf16.vlgmr.msra.gmra.mxu1 %v5991_v34  ;;  %3239 = vmatprep.subr.bf16.mxu0 %v4904_v5  ;;  %v4913_v34 = vld [vmem:[#allocation7 + $0x34] ss:$8 sps:$4 sm:$0xff]   ;;  %v4941_v5 = vld [vmem:[#allocation7 + $0x90] ss:$8 sps:$4 sm:$0xff]  }
 0x366   : > { %2628 = vmatprep.mubr.bf16.mxu1 %v5325_v60  ;;  %3291 = vmatpush1.bf16.msra.mxu1 %v4947_v38  ;;  %v4908_v60 = vld [vmem:[#allocation7 + $0x40] ss:$8 sps:$4 sm:$0xff]   ;;  %v4946_v38 = vld [vmem:[#allocation7 + $0x84] ss:$8 sps:$4 sm:$0xff]  }
 0x367   : > { %3292 = vmatprep.subr.bf16.mxu1 %v4952_v53  ;;  %v4989_v53 = vld [vmem:[#allocation7 + $0x190] ss:$8 sps:$4 sm:$0xff]  }
 0x368   : > { %3240 = vmatpush1.bf16.msra.mxu0 %v4902_v56  ;;  %v4994_v56 = vld [vmem:[#allocation7 + $0x184] ss:$8 sps:$4 sm:$0xff]  }
 0x369   : > { %3241 = vmatprep.subr.bf16.mxu0 %v4907_v40  ;;  %v4944_v40 = vld [vmem:[#allocation7 + $0x80] ss:$8 sps:$4 sm:$0xff]  }
 0x36a   : > { %3293 = vmatpush1.bf16.msra.mxu1 %v4950_v3  ;;  %v4992_v3 = vld [vmem:[#allocation7 + $0x180] ss:$8 sps:$4 sm:$0xff]  }
 0x36b   : > { %2576 = vmatmul.mubr.bf16.gmra.mxu0 %v5960_v51  ;;  %3294 = vmatprep.subr.bf16.mxu1 %v4955_v59  ;;  %v4959_v51 = vld [vmem:[#allocation7 + $0x130] ss:$8 sps:$4 sm:$0xff]   ;;  %v4997_v59 = vld [vmem:[#allocation7 + $0x274] ss:$8 sps:$4 sm:$0xff]  }
 0x36c   : > { %3269 = vmatprep.mubr.bf16.mxu0 %v5768_v12  ;;  %3242 = vmatpush1.bf16.msra.mxu0 %v4905_v62  ;;  %v4919_v12 = vld [vmem:[#allocation7 + $0x14] ss:$8 sps:$4 sm:$0xff]   ;;  %v4995_v62 = vld [vmem:[#allocation7 + $0x270] ss:$8 sps:$4 sm:$0xff]  }
 0x36d   : > { %2629 = vmatmul.mubr.bf16.gmra.mxu1 %v5997_v45  ;;  %3243 = vmatprep.subr.bf16.mxu0 %v4910_v0  ;;  %v4914_v45 = vld [vmem:[#allocation7 + $0x20] ss:$8 sps:$4 sm:$0xff]   ;;  %v5000_v0 = vld [vmem:[#allocation7 + $0x264] ss:$8 sps:$4 sm:$0xff]  }
 0x36e   : > { %3295 = vmatpush1.bf16.msra.mxu1 %v4953_v2  ;;  %v4998_v2 = vld [vmem:[#allocation7 + $0x260] ss:$8 sps:$4 sm:$0xff]  }
 0x36f   : > { %3296 = vmatprep.subr.bf16.mxu1 %v4958_v43  ;;  %v5003_v43 = vld [vmem:[#allocation7 + $0x254] ss:$8 sps:$4 sm:$0xff]  }
 0x370   : > { %3244 = vmatpush1.bf16.msra.mxu0 %v4908_v60  ;;  %v5001_v60 = vld [vmem:[#allocation7 + $0x250] ss:$8 sps:$4 sm:$0xff]  }
 0x371   : > { %3245 = vmatprep.subr.bf16.mxu0 %v4913_v34  ;;  %v5006_v34 = vld [vmem:[#allocation7 + $0x244] ss:$8 sps:$4 sm:$0xff]  }
 0x372   : > { %3297 = vmatpush1.bf16.msra.mxu1 %v4956_v58  ;;  %v5004_v58 = vld [vmem:[#allocation7 + $0x240] ss:$8 sps:$4 sm:$0xff]  }
 0x373   : > { %3298 = vmatprep.subr.bf16.mxu1 %v4961_v1  ;;  %v5009_v1 = vld [vmem:[#allocation7 + $0x234] ss:$8 sps:$4 sm:$0xff]  }
 0x374   : > { %3246 = vmatpush1.bf16.msra.mxu0 %v4911_v4  ;;  %v5013_v4 = vld [vmem:[#allocation7 + $0x210] ss:$8 sps:$4 sm:$0xff]  }
 0x375   : > { %3247 = vmatprep.subr.bf16.mxu0 %v4916_v6  ;;  %v5018_v6 = vld [vmem:[#allocation7 + $0x204] ss:$8 sps:$4 sm:$0xff]  }
 0x376   : > { %3299 = vmatpush1.bf16.msra.mxu1 %v4959_v51  ;;  %v5016_v51 = vld [vmem:[#allocation7 + $0x200] ss:$8 sps:$4 sm:$0xff]  }
 0x377   : > { %3300 = vmatprep.subr.bf16.mxu1 %v4964_v55 }
 0x378   : > { %3248 = vmatpush1.bf16.msra.mxu0 %v4914_v45  ;;  %v5022_v45 = vld [vmem:[#allocation7 + $0x2e0] ss:$8 sps:$4 sm:$0xff]  }
 0x379   : > { %3249 = vmatprep.subr.bf16.mxu0 %v4919_v12  ;;  %v5027_v12 = vld [vmem:[#allocation7 + $0x2d4] ss:$8 sps:$4 sm:$0xff]  }
 0x37a   : > { %3301 = vmatpush1.bf16.msra.mxu1 %v4962_v7 }
 0x37b   : > { %3302 = vmatprep.subr.bf16.mxu1 %v4967_v44  ;;  %v5025_v44 = vld [vmem:[#allocation7 + $0x2d0] ss:$8 sps:$4 sm:$0xff]  }
 0x37c   : > { %3250 = vmatpush1.bf16.msra.mxu0 %v4917_v10  ;;  %v5030_v10 = vld [vmem:[#allocation7 + $0x2c4] ss:$8 sps:$4 sm:$0xff]  }
 0x37d   : > { %3251 = vmatprep.subr.bf16.mxu0 %v4922_v11 }
 0x37e   : > { %3303 = vmatpush1.bf16.msra.mxu1 %v4965_v13  ;;  %v5028_v13 = vld [vmem:[#allocation7 + $0x2c0] ss:$8 sps:$4 sm:$0xff]  }
 0x37f   : > { %3304 = vmatprep.subr.bf16.mxu1 %v4970_v16  ;;  %v5033_v16 = vld [vmem:[#allocation7 + $0x2b4] ss:$8 sps:$4 sm:$0xff]  }
 0x380   : > { %3252 = vmatpush1.bf16.msra.mxu0 %v4920_v17 }
 0x381   : > { %3253 = vmatprep.subr.bf16.mxu0 %v4925_v57 }
 0x382   : > { %3305 = vmatpush1.bf16.msra.mxu1 %v4968_v18  ;;  %v5031_v18 = vld [vmem:[#allocation7 + $0x2b0] ss:$8 sps:$4 sm:$0xff]  }
 0x383   : > { %3306 = vmatprep.subr.bf16.mxu1 %v4973_v25  ;;  %v5036_v25 = vld [vmem:[#allocation7 + $0x2a4] ss:$8 sps:$4 sm:$0xff]  }
 0x384   : > { %3254 = vmatpush2.bf16.msra.mxu0 %v4923_v26 }
 0x385   : > { %3255 = vmatprep.subr.bf16.mxu0 %v4928_v29 }
 0x386   : > { %3307 = vmatpush2.bf16.msra.mxu1 %v4971_v30  ;;  %v5034_v30 = vld [vmem:[#allocation7 + $0x2a0] ss:$8 sps:$4 sm:$0xff]  }
 0x387   : > { %3308 = vmatprep.subr.bf16.mxu1 %v4976_v31  ;;  %v5039_v31 = vld [vmem:[#allocation7 + $0x294] ss:$8 sps:$4 sm:$0xff]  }
 0x388   : > { %3256 = vmatpush2.bf16.msra.mxu0 %v4926_v32 }
 0x389   : > { %3257 = vmatprep.subr.bf16.mxu0 %v4931_v33 }
 0x38a   : > { %3309 = vmatpush2.bf16.msra.mxu1 %v4974_v52  ;;  %v5037_v52 = vld [vmem:[#allocation7 + $0x290] ss:$8 sps:$4 sm:$0xff]  }
 0x38b   : > { %3310 = vmatprep.subr.bf16.mxu1 %v4979_v14  ;;  %v5042_v14 = vld [vmem:[#allocation7 + $0x284] ss:$8 sps:$4 sm:$0xff]  }
 0x38c   : > { %3258 = vmatpush2.bf16.msra.mxu0 %v4929_v36 }
 0x38d   : > { %3259 = vmatprep.subr.bf16.mxu0 %v4934_v41 }
 0x38e   : > { %3311 = vmatpush2.bf16.msra.mxu1 %v4977_v23  ;;  %v5040_v23 = vld [vmem:[#allocation7 + $0x280] ss:$8 sps:$4 sm:$0xff]  }
 0x38f   : > { %3312 = vmatprep.subr.bf16.mxu1 %v4982_v42 }
 0x390   : > { %3260 = vmatpush2.bf16.msra.mxu0 %v4932_v63 }
 0x391   : > { %3261 = vmatprep.subr.bf16.mxu0 %v4937_v39 }
 0x392   : > { %3313 = vmatpush2.bf16.msra.mxu1 %v4980_v8 }
 0x393   : > { %3314 = vmatprep.subr.bf16.mxu1 %v4985_v15 }
 0x394   : > { %3262 = vmatpush2.bf16.msra.mxu0 %v4935_v35 }
 0x395   : > { %3263 = vmatprep.subr.bf16.mxu0 %v4940_v46 }
 0x396   : > { %3315 = vmatpush2.bf16.msra.mxu1 %v4983_v22 }
 0x397   : > { %3316 = vmatprep.subr.bf16.mxu1 %v4988_v47 }
 0x398   : > { %3264 = vmatpush2.bf16.msra.mxu0 %v4938_v61 }
 0x399   : > { %3265 = vmatprep.subr.bf16.mxu0 %v4943_v49 }
 0x39a   : > { %3317 = vmatpush2.bf16.msra.mxu1 %v4986_v9 }
 0x39b   : > { %3318 = vmatprep.subr.bf16.mxu1 %v4991_v50 }
 0x39c   : > { %3266 = vmatpush2.bf16.msra.mxu0 %v4941_v5 }
 0x39d   : > { %3267 = vmatprep.subr.bf16.mxu0 %v4946_v38 }
 0x39e   : > { %3319 = vmatpush2.bf16.msra.mxu1 %v4989_v53 }
 0x39f   : > { %3320 = vmatprep.subr.bf16.mxu1 %v4994_v56 }
 0x3a0   : > { %3268 = vmatpush2.bf16.msra.mxu0 %v4944_v40 }
 0x3a1   : > { %3343 = vmatprep.subr.bf16.mxu0 %v4997_v59 }
 0x3a2   : > { %3321 = vmatpush2.bf16.msra.mxu1 %v4992_v3 }
 0x3a3   : > { %3270 = vmatmul.mubr.bf16.vlgmr.msra.gmra.mxu0 %v2639_v28  ;;  %v5015_v28 = vld [vmem:[#allocation7 + $0x214] ss:$8 sps:$4 sm:$0xff]  }
 0x3a4   : > { %3279 = vmatprep.mubr.bf16.mxu0 %v5940_v48  ;;  %3344 = vmatpush1.bf16.msra.mxu0 %v4995_v62  ;;  %v5010_v48 = vld [vmem:[#allocation7 + $0x220] ss:$8 sps:$4 sm:$0xff]  }
 0x3a5   : > { %3345 = vmatprep.subr.bf16.mxu0 %v5000_v0 }
 0x3a8   : > { %3346 = vmatpush1.bf16.msra.mxu0 %v4998_v2 }
 0x3a9   : > { %3347 = vmatprep.subr.bf16.mxu0 %v5003_v43 }
 0x3ab   : > { %3280 = vmatmul.mubr.bf16.gmra.mxu0 %v2640_v54  ;;  %v5024_v54 = vld [vmem:[#allocation7 + $0x2e4] ss:$8 sps:$4 sm:$0xff]  }
 0x3ac   : > { %3348 = vmatpush1.bf16.msra.mxu0 %v5001_v60 }
 0x3ad   : > { %3349 = vmatprep.subr.bf16.mxu0 %v5006_v34 }
 0x3b0   : > { %3350 = vmatpush1.bf16.msra.mxu0 %v5004_v58 }
 0x3b1   : > { %3351 = vmatprep.subr.bf16.mxu0 %v5009_v1 }
 0x3b4   : > { %3352 = vmatpush1.bf16.msra.mxu0 %v5007_v24 }
 0x3b5   : > { %3353 = vmatprep.subr.bf16.mxu0 %v5012_v37 }
 0x3b8   : > { %3354 = vmatpush1.bf16.msra.mxu0 %v5010_v48 }
 0x3b9   : > { %3355 = vmatprep.subr.bf16.mxu0 %v5015_v28 }
 0x3bc   : > { %3356 = vmatpush1.bf16.msra.mxu0 %v5013_v4 }
 0x3bd   : > { %3357 = vmatprep.subr.bf16.mxu0 %v5018_v6 }
 0x3c0   : > { %3358 = vmatpush1.bf16.msra.mxu0 %v5016_v51 }
 0x3c1   : > { %3359 = vmatprep.subr.bf16.mxu0 %v5021_v19 }
 0x3c3   : > { %v2355_v55 = vpop.f32.mrf.mxu0 }
 0x3c4   : > { %3360 = vmatpush2.bf16.msra.mxu0 %v5019_v27  ;;  %v2408_v17 = vpop.f32.mrf.mxu1 }
 0x3c5   : > { %3361 = vmatprep.subr.bf16.mxu0 %v5024_v54  ;;  %v2357_v7 = vpop.f32.mrf.mxu0  ;;  %v2409_v61 = vadd.f32 %v2408_v17, %v2355_v55 }
 0x3c6   : > { %v2410_v26 = vpop.f32.mrf.mxu1 }
 0x3c7   : > { %v2359_v11 = vpop.f32.mrf.mxu0  ;;  %v2411_v22 = vadd.f32 %v2410_v26, %v2357_v7 }
 0x3c8   : > { %3362 = vmatpush2.bf16.msra.mxu0 %v5022_v45  ;;  %v2412_v32 = vpop.f32.mrf.mxu1 }
 0x3c9   : > { %3363 = vmatprep.subr.bf16.mxu0 %v5027_v12  ;;  %v2361_v57 = vpop.f32.mrf.mxu0  ;;  %v2413_v35 = vadd.f32 %v2412_v32, %v2359_v11 }
 0x3ca   : > { %v2414_v36 = vpop.f32.mrf.mxu1 }
 0x3cb   : > { %v2365_v29 = vpop.f32.mrf.mxu0  ;;  %v2415_v47 = vadd.f32 %v2414_v36, %v2361_v57 }
 0x3cc   : > { %3364 = vmatpush2.bf16.msra.mxu0 %v5025_v44 }
 0x3cd   : > { %3365 = vmatprep.subr.bf16.mxu0 %v5030_v10  ;;  %v2367_v33 = vpop.f32.mrf.mxu0  ;;  %v2418_v42 = vpop.f32.mrf.mxu1 }
 0x3ce   : > { %v2419_v34 = vadd.f32 %v2418_v42, %v2365_v29 }
 0x3cf   : > { %v2369_v41 = vpop.f32.mrf.mxu0  ;;  %v2420_v8 = vpop.f32.mrf.mxu1 }
 0x3d0   : > { %3366 = vmatpush2.bf16.msra.mxu0 %v5028_v13  ;;  %v2421_v43 = vadd.f32 %v2420_v8, %v2367_v33 }
 0x3d1   : > { %3367 = vmatprep.subr.bf16.mxu0 %v5033_v16  ;;  %v2371_v63 = vpop.f32.mrf.mxu0  ;;  %v2422_v49 = vpop.f32.mrf.mxu1 }
 0x3d2   : > { %v2423_v0 = vadd.f32 %v2422_v49, %v2369_v41 }
 0x3d3   : > { %v2424_v3 = vpop.f32.mrf.mxu1 }
 0x3d4   : > { %3368 = vmatpush2.bf16.msra.mxu0 %v5031_v18  ;;  %v2425_v60 = vadd.f32 %v2424_v3, %v2371_v63  ;;  %v5046_v3 = vld [vmem:[#allocation9 + $0x60] ss:$8 sps:$4 sm:$0xff]  }
 0x3d5   : > { %3369 = vmatprep.subr.bf16.mxu0 %v5036_v25 }
 0x3d8   : > { %3370 = vmatpush2.bf16.msra.mxu0 %v5034_v30 }
 0x3d9   : > { %3371 = vmatprep.subr.bf16.mxu0 %v5039_v31 }
 0x3dc   : > { %3372 = vmatpush2.bf16.msra.mxu0 %v5037_v52 }
 0x3dd   : > { %3373 = vmatprep.subr.bf16.mxu0 %v5042_v14 }
 0x3e0   : > { %3374 = vmatpush2.bf16.msra.mxu0 %v5040_v23 }
 0x3e3   : > { %v2461_v39 = vpop.f32.mrf.mxu0 }
 0x3e4   : > { %v2462_v53 = vadd.f32 %v2461_v39, %v2409_v61 }
 0x3e5   : > { %v2463_v15 = vpop.f32.mrf.mxu0 }
 0x3e6   : > { %v2464_v5 = vadd.f32 %v2463_v15, %v2411_v22 }
 0x3e7   : > { %v2465_v46 = vpop.f32.mrf.mxu0 }
 0x3e8   : > { %v2466_v9 = vadd.f32 %v2465_v46, %v2413_v35 }
 0x3e9   : > { %v2467_v50 = vpop.f32.mrf.mxu0 }
 0x3ea   : > { %v2468_v38 = vadd.f32 %v2467_v50, %v2415_v47  ;;  %v2641_v59 = vpack.c.bf16 %v2466_v9, %v2462_v53  ;;  %v5043_v53 = vld [vmem:[#allocation9 + $0x70] ss:$8 sps:$4 sm:$0xff]  }
 0x3eb   : > { %v2471_v56 = vpop.f32.mrf.mxu0 }
 0x3ec   : > { %v2642_v40 = vpack.c.bf16 %v2468_v38, %v2464_v5  ;;  %v2472_v48 = vadd.f32 %v2471_v56, %v2419_v34  ;;  %v5045_v56 = vld [vmem:[#allocation9 + $0x74] ss:$8 sps:$4 sm:$0xff]   ;;  %v5060_v34 = vld [vmem:[#allocation9 + $0x24] ss:$8 sps:$4 sm:$0xff]  }
 0x3ed   : > { %v2473_v62 = vpop.f32.mrf.mxu0  ;;  %3612 = vmatprep.subr.bf16.mxu1 %v5045_v56 }
 0x3ee   : > { %3322 = vmatprep.mubr.bf16.mxu1 %v2642_v40  ;;  %v2474_v24 = vadd.f32 %v2473_v62, %v2421_v43  ;;  %v5048_v40 = vld [vmem:[#allocation9 + $0x64] ss:$8 sps:$4 sm:$0xff]   ;;  %v5049_v62 = vld [vmem:[#allocation9 + $0x50] ss:$8 sps:$4 sm:$0xff]   ;;  %v5057_v43 = vld [vmem:[#allocation9 + $0x34] ss:$8 sps:$4 sm:$0xff]  }
 0x3ef   : > { %v2475_v2 = vpop.f32.mrf.mxu0  ;;  %3323 = vmatmul.mubr.bf16.vlgmr.msra.gmra.mxu1 %v2641_v59  ;;  %v5051_v59 = vld [vmem:[#allocation9 + $0x54] ss:$8 sps:$4 sm:$0xff]  }
 0x3f0   : > { %v2476_v58 = vadd.f32 %v2475_v2, %v2423_v0  ;;  %3613 = vmatpush1.bf16.msra.mxu1 %v5043_v53  ;;  %v5054_v0 = vld [vmem:[#allocation9 + $0x44] ss:$8 sps:$4 sm:$0xff]   ;;  %v5052_v2 = vld [vmem:[#allocation9 + $0x40] ss:$8 sps:$4 sm:$0xff]  }
 0x3f1   : > { %v2477_v1 = vpop.f32.mrf.mxu0  ;;  %3614 = vmatprep.subr.bf16.mxu1 %v5048_v40 }
 0x3f2   : > { %v2478_v37 = vadd.f32 %v2477_v1, %v2425_v60  ;;  %v2645_v4 = vpack.c.bf16 %v2476_v58, %v2472_v48  ;;  %v5055_v60 = vld [vmem:[#allocation9 + $0x30] ss:$8 sps:$4 sm:$0xff]   ;;  %v5058_v58 = vld [vmem:[#allocation9 + $0x20] ss:$8 sps:$4 sm:$0xff]   ;;  %v5063_v1 = vld [vmem:[#allocation9 + $0x14] ss:$8 sps:$4 sm:$0xff]  }
 0x3f3   : > { %v5064_v48 = vld [vmem:[#allocation9] ss:$8 sps:$4 sm:$0xff]  }
 0x3f4   : > { %v2646_v28 = vpack.c.bf16 %v2478_v37, %v2474_v24  ;;  %3615 = vmatpush1.bf16.msra.mxu1 %v5046_v3  ;;  %v5061_v24 = vld [vmem:[#allocation9 + $0x10] ss:$8 sps:$4 sm:$0xff]   ;;  %v5066_v37 = vld [vmem:[#allocation9 + $0x4] ss:$8 sps:$4 sm:$0xff]  }
 0x3f5   : > { %3616 = vmatprep.subr.bf16.mxu1 %v5051_v59 }
 0x3f6   : > { %3332 = vmatprep.mubr.bf16.mxu1 %v2646_v28  ;;  %v5069_v28 = vld [vmem:[#allocation9 + $0xf4] ss:$8 sps:$4 sm:$0xff]  }
 0x3f7   : > { %3333 = vmatmul.mubr.bf16.gmra.mxu1 %v2645_v4  ;;  %v5067_v4 = vld [vmem:[#allocation9 + $0xf0] ss:$8 sps:$4 sm:$0xff]  }
 0x3f8   : > { %3617 = vmatpush1.bf16.msra.mxu1 %v5049_v62 }
 0x3f9   : > { %3618 = vmatprep.subr.bf16.mxu1 %v5054_v0 }
 0x3fc   : > { %3619 = vmatpush1.bf16.msra.mxu1 %v5052_v2 }
 0x3fd   : > { %3620 = vmatprep.subr.bf16.mxu1 %v5057_v43 }
 0x400   : > { %3621 = vmatpush1.bf16.msra.mxu1 %v5055_v60 }
 0x401   : > { %3622 = vmatprep.subr.bf16.mxu1 %v5060_v34 }
 0x404   : > { %3623 = vmatpush1.bf16.msra.mxu1 %v5058_v58 }
 0x405   : > { %v2514_v6 = vpop.f32.mrf.mxu1  ;;  %3624 = vmatprep.subr.bf16.mxu1 %v5063_v1 }
 0x407   : > { %v2516_v51 = vpop.f32.mrf.mxu1 }
 0x408   : > { %3625 = vmatpush1.bf16.msra.mxu1 %v5061_v24 }
 0x409   : > { %v2518_v19 = vpop.f32.mrf.mxu1  ;;  %3626 = vmatprep.subr.bf16.mxu1 %v5066_v37 }
 0x40b   : > { %v2520_v27 = vpop.f32.mrf.mxu1 }
 0x40c   : > { %3627 = vmatpush1.bf16.msra.mxu1 %v5064_v48 }
 0x40d   : > { %v2524_v54 = vpop.f32.mrf.mxu1  ;;  %3628 = vmatprep.subr.bf16.mxu1 %v5069_v28 }
 0x40f   : > { %v2526_v55 = vpop.f32.mrf.mxu1 }
 0x410   : > { %3629 = vmatpush2.bf16.msra.mxu1 %v5067_v4 }
 0x411   : > { %v2528_v45 = vpop.f32.mrf.mxu1 }
 0x413   : > { %v2530_v12 = vpop.f32.mrf.mxu1 }
 0x423   : > { %v2567_v7 = vpop.f32.mrf.mxu0 }
 0x424   : > { %v2568_v18 = vadd.f32 %v2567_v7, %v2514_v6  ;;  %v5072_v6 = vld [vmem:[#allocation9 + $0xe4] ss:$8 sps:$4 sm:$0xff]   ;;  %v5082_v7 = vld [vmem:[#allocation9 + $0xa0] ss:$8 sps:$4 sm:$0xff]  }
 0x425   : > { %v2620_v44 = vpop.f32.mrf.mxu1  ;;  %v2569_v10 = vpop.f32.mrf.mxu0  ;;  %3630 = vmatprep.subr.bf16.mxu1 %v5072_v6 }
 0x426   : > { %v2570_v16 = vadd.f32 %v2569_v10, %v2516_v51  ;;  %v2621_v14 = vadd.f32 %v2620_v44, %v2568_v18  ;;  %v5070_v51 = vld [vmem:[#allocation9 + $0xe0] ss:$8 sps:$4 sm:$0xff]   ;;  %v5084_v44 = vld [vmem:[#allocation9 + $0xa4] ss:$8 sps:$4 sm:$0xff]   ;;  %v5085_v10 = vld [vmem:[#allocation9 + $0x90] ss:$8 sps:$4 sm:$0xff]  }
 0x427   : > { %v2622_v11 = vpop.f32.mrf.mxu1  ;;  %v2571_v13 = vpop.f32.mrf.mxu0  ;;  %3631 = vmatpush2.bf16.msra.mxu1 %v5070_v51  ;;  %v5093_v18 = vld [vmem:[#allocation10 + $0x70] sm:$0xff]  }
 0x428   : > { %v2572_v17 = vadd.f32 %v2571_v13, %v2518_v19  ;;  %v2623_v32 = vadd.f32 %v2622_v11, %v2570_v16  ;;  %v5075_v19 = vld [vmem:[#allocation9 + $0xd4] ss:$8 sps:$4 sm:$0xff]   ;;  %v5090_v13 = vld [vmem:[#allocation9 + $0x84] ss:$8 sps:$4 sm:$0xff]   ;;  %v5088_v16 = vld [vmem:[#allocation9 + $0x80] ss:$8 sps:$4 sm:$0xff]  }
 0x429   : > { %v2624_v57 = vpop.f32.mrf.mxu1  ;;  %v2573_v25 = vpop.f32.mrf.mxu0  ;;  %3632 = vmatprep.subr.bf16.mxu1 %v5075_v19  ;;  %v5087_v11 = vld [vmem:[#allocation9 + $0x94] ss:$8 sps:$4 sm:$0xff]  }
 0x42a   : > { %v2574_v26 = vadd.f32 %v2573_v25, %v2520_v27  ;;  %v2625_v30 = vadd.f32 %v2624_v57, %v2572_v17  ;;  %v5073_v27 = vld [vmem:[#allocation9 + $0xd0] ss:$8 sps:$4 sm:$0xff]  }
 0x42b   : > { %v2626_v29 = vpop.f32.mrf.mxu1  ;;  %v2577_v31 = vpop.f32.mrf.mxu0  ;;  %3633 = vmatpush2.bf16.msra.mxu1 %v5073_v27  ;;  %v5091_v17 = vld [vmem:[#allocation10 + $0x78] sm:$0xff]   ;;  %v5094_v25 = vld [vmem:[#allocation10 + $0x30] sm:$0xff]  }
 0x42c   : > { %v2627_v33 = vadd.f32 %v2626_v29, %v2574_v26  ;;  %v2643_v42 = vpack.c.bf16 %v2625_v30, %v2621_v14  ;;  %v2578_v35 = vadd.f32 %v2577_v31, %v2524_v54  ;;  %v5078_v54 = vld [vmem:[#allocation9 + $0xc4] ss:$8 sps:$4 sm:$0xff]   ;;  %v5092_v57 = vld [vmem:[#allocation10 + $0x38] sm:$0xff]   ;;  %4453 = vmatprep.subr.bf16.mxu0 %v5091_v17 }
 0x42d   : > { %v2630_v52 = vpop.f32.mrf.mxu1  ;;  %v2579_v36 = vpop.f32.mrf.mxu0  ;;  %3634 = vmatprep.subr.bf16.mxu1 %v5078_v54  ;;  %v5095_v26 = vld [vmem:[#allocation10 + $0x68] sm:$0xff]   ;;  %v5097_v30 = vld [vmem:[#allocation10 + $0x60] sm:$0xff]  }
 0x42e   : > { %v2644_v41 = vpack.c.bf16 %v2627_v33, %v2623_v32  ;;  %v2580_v39 = vadd.f32 %v2579_v36, %v2526_v55  ;;  %v2631_v50 = vadd.f32 %v2630_v52, %v2578_v35  ;;  %v5076_v55 = vld [vmem:[#allocation9 + $0xc0] ss:$8 sps:$4 sm:$0xff]   ;;  %v5099_v32 = vld [vmem:[#allocation10 + $0x58] sm:$0xff]  }
 0x42f   : > { %v2632_v23 = vpop.f32.mrf.mxu1  ;;  %v2581_v63 = vpop.f32.mrf.mxu0  ;;  %3635 = vmatpush2.bf16.msra.mxu1 %v5076_v55  ;;  %v5096_v29 = vld [vmem:[#allocation10 + $0x28] sm:$0xff]   ;;  %v5098_v31 = vld [vmem:[#allocation10 + $0x20] sm:$0xff]   ;;  %v5100_v33 = vld [vmem:[#allocation10 + $0x18] sm:$0xff]  }
 0x430   : > { %v2582_v8 = vadd.f32 %v2581_v63, %v2528_v45  ;;  %3375 = vmatprep.mubr.bf16.mxu0 %v2644_v41  ;;  %v2633_v49 = vadd.f32 %v2632_v23, %v2580_v39  ;;  %v5081_v45 = vld [vmem:[#allocation9 + $0xb4] ss:$8 sps:$4 sm:$0xff]  }
 0x431   : > { %v2634_v15 = vpop.f32.mrf.mxu1  ;;  %v2583_v46 = vpop.f32.mrf.mxu0  ;;  %3376 = vmatmul.mubr.bf16.vlgmr.msra.gmra.mxu0 %v2643_v42  ;;  %3636 = vmatprep.subr.bf16.mxu1 %v5081_v45 }
 0x432   : > { %v2584_v22 = vadd.f32 %v2583_v46, %v2530_v12  ;;  %v2635_v47 = vadd.f32 %v2634_v15, %v2582_v8  ;;  %v5079_v12 = vld [vmem:[#allocation9 + $0xb0] ss:$8 sps:$4 sm:$0xff]   ;;  %4454 = vmatpush3.bf16.msra.mxu0 %v5092_v57  ;;  %v2745_v46 = vld [vmem:[%s6059_s9] sm:$0x3] }
 0x433   : > { %v2636_v61 = vpop.f32.mrf.mxu1  ;;  %3637 = vmatpush2.bf16.msra.mxu1 %v5079_v12  ;;  %4455 = vmatprep.subr.bf16.mxu0 %v5093_v18 }
 0x434   : > { %v2637_v9 = vadd.f32 %v2636_v61, %v2584_v22  ;;  %v2647_v38 = vpack.c.bf16 %v2635_v47, %v2631_v50  ;;  %3638 = vmatprep.subr.bf16.mxu1 %v5084_v44  ;;  %v2754_v22 = vrot.slane %v2745_v46, %v5709_v20  ;;  %v2750_v47 = vrot.slane %v2745_v46, %v5712_v21 }
 0x436   : > { %v2648_v5 = vpack.c.bf16 %v2637_v9, %v2633_v49  ;;  %4456 = vmatpush3.bf16.msra.mxu0 %v5094_v25 }
 0x437   : > { %3639 = vmatpush2.bf16.msra.mxu1 %v5082_v7  ;;  %4457 = vmatprep.subr.bf16.mxu0 %v5095_v26 }
 0x438   : > { %3385 = vmatprep.mubr.bf16.mxu0 %v2648_v5  ;;  %3640 = vmatprep.subr.bf16.mxu1 %v5087_v11 }
 0x439   : > { %3386 = vmatmul.mubr.bf16.gmra.mxu0 %v2647_v38 }
 0x43a   : > { %4458 = vmatpush3.bf16.msra.mxu0 %v5096_v29 }
 0x43b   : > { %3641 = vmatpush2.bf16.msra.mxu1 %v5085_v10  ;;  %4459 = vmatprep.subr.bf16.mxu0 %v5097_v30 }
 0x43c   : > { %3642 = vmatprep.subr.bf16.mxu1 %v5090_v13 }
 0x43e   : > { %4460 = vmatpush3.bf16.msra.mxu0 %v5098_v31 }
 0x43f   : > { %3643 = vmatpush2.bf16.msra.mxu1 %v5088_v16  ;;  %4461 = vmatprep.subr.bf16.mxu0 %v5099_v32 }
 0x442   : > { %4462 = vmatpush3.bf16.msra.mxu0 %v5100_v33 }
 0x463   : > { %v3271_v52 = vpop.f32.mrf.mxu0 }
 0x464   : > { %v3272_v38 = vadd.f32 %v3271_v52, %v2750_v47 }
 0x465   : > { %v3273_v14 = vpop.f32.mrf.mxu0 }
 0x466   : > { %v3274_v50 = vadd.f32 %v3273_v14, %v2754_v22  ;;  %v5101_v14 = vld [vmem:[#allocation10 + $0x50] sm:$0xff]  }
 0x467   : > { %v3275_v36 = vpop.f32.mrf.mxu0  ;;  %4463 = vmatprep.subr.bf16.mxu0 %v5101_v14 }
 0x468   : > { %v3276_v5 = vadd.f32 %v3275_v36, %v2750_v47  ;;  %v5102_v36 = vld [vmem:[#allocation10 + $0x10] sm:$0xff]  }
 0x469   : > { %v3277_v41 = vpop.f32.mrf.mxu0  ;;  %4464 = vmatpush3.bf16.msra.mxu0 %v5102_v36 }
 0x46a   : > { %v3278_v40 = vadd.f32 %v3277_v41, %v2754_v22  ;;  %v5103_v41 = vld [vmem:[#allocation10 + $0x48] sm:$0xff]  }
 0x46b   : > { %v3281_v42 = vpop.f32.mrf.mxu0  ;;  %4465 = vmatprep.subr.bf16.mxu0 %v5103_v41 }
 0x46c   : > { %v3282_v19 = vadd.f32 %v3281_v42, %v2750_v47  ;;  %v5105_v42 = vld [vmem:[#allocation10 + $0x40] sm:$0xff]  }
 0x46d   : > { %v3283_v39 = vpop.f32.mrf.mxu0 }
 0x46e   : > { %v3284_v28 = vadd.f32 %v3283_v39, %v2754_v22  ;;  %v3440_v39 = vld [vmem:[%s6061_s11] sm:$0x3] }
 0x46f   : > { %v3285_v15 = vpop.f32.mrf.mxu0 }
 0x470   : > { %v3286_v4 = vadd.f32 %v3285_v15, %v2750_v47  ;;  %v3449_v15 = vrot.slane %v3440_v39, %v5709_v20 }
 0x471   : > { %v3287_v61 = vpop.f32.mrf.mxu0 }
 0x472   : > { %v3288_v45 = vadd.f32 %v3287_v61, %v2754_v22 }
 0x4af   : > { %v3324_v23 = vpop.f32.mrf.mxu1 }
 0x4b0   : > { %v3325_v62 = vadd.f32 %v3324_v23, %v3272_v38  ;;  %v5104_v23 = vld [vmem:[#allocation10 + $0x8] sm:$0xff]  }
 0x4b1   : > { %v3326_v63 = vpop.f32.mrf.mxu1  ;;  %4466 = vmatpush3.bf16.msra.mxu0 %v5104_v23 }
 0x4b2   : > { %v3327_v3 = vadd.f32 %v3326_v63, %v3274_v50  ;;  %v5106_v63 = vld [vmem:[#allocation10] sm:$0xff]   ;;  %4467 = vmatprep.subr.bf16.mxu0 %v5105_v42 }
 0x4b3   : > { %v3328_v8 = vpop.f32.mrf.mxu1 }
 0x4b4   : > { %v3329_v59 = vadd.f32 %v3328_v8, %v3276_v5 }
 0x4b5   : > { %v3330_v35 = vpop.f32.mrf.mxu1  ;;  %4468 = vmatpush3.bf16.msra.mxu0 %v5106_v63 }
 0x4b6   : > { %v3331_v2 = vadd.f32 %v3330_v35, %v3278_v40  ;;  %v3445_v35 = vrot.slane %v3440_v39, %v5712_v21 }
 0x4b7   : > { %v3334_v49 = vpop.f32.mrf.mxu1 }
 0x4b8   : > { %v3335_v10 = vadd.f32 %v3334_v49, %v3282_v19 }
 0x4b9   : > { %v3336_v53 = vpop.f32.mrf.mxu1 }
 0x4ba   : > { %v3337_v12 = vadd.f32 %v3336_v53, %v3284_v28 }
 0x4bb   : > { %v3338_v34 = vpop.f32.mrf.mxu1 }
 0x4bc   : > { %v3339_v7 = vadd.f32 %v3338_v34, %v3286_v4 }
 0x4bd   : > { %v3340_v27 = vpop.f32.mrf.mxu1 }
 0x4be   : > { %v3341_v16 = vadd.f32 %v3340_v27, %v3288_v45 }
 0x4f1   : > { %v3377_v9 = vpop.f32.mrf.mxu0 }
 0x4f2   : > { %v3378_v58 = vadd.f32 %v3377_v9, %v3325_v62 }
 0x4f3   : > { %v3379_v56 = vpop.f32.mrf.mxu0 }
 0x4f4   : > { %v3380_v43 = vadd.f32 %v3379_v56, %v3327_v3  ;;  %v3396_v54 = vmax.f32 %v3378_v58, 0.0 }
 0x4f5   : > { %v3381_v0 = vpop.f32.mrf.mxu0 }
 0x4f6   : > { %v3382_v60 = vadd.f32 %v3381_v0, %v3329_v59  ;;  %v3397_v6 = vmax.f32 %v3380_v43, 0.0 }
 0x4f7   : > { %v3383_v1 = vpop.f32.mrf.mxu0 }
 0x4f8   : > { %v3384_v24 = vadd.f32 %v3383_v1, %v3331_v2  ;;  %v3398_v37 = vmax.f32 %v3382_v60, 0.0 }
 0x4f9   : > { %v3387_v48 = vpop.f32.mrf.mxu0 }
 0x4fa   : > { %v3399_v51 = vmax.f32 %v3384_v24, 0.0  ;;  %v3404_v11 = vpack.c.bf16 %v3398_v37, %v3396_v54  ;;  %v3388_v18 = vadd.f32 %v3387_v48, %v3335_v10 }
 0x4fb   : > { %v3389_v55 = vpop.f32.mrf.mxu0 }
 0x4fc   : > { %v3405_v44 = vpack.c.bf16 %v3399_v51, %v3397_v6  ;;  %v3390_v17 = vadd.f32 %v3389_v55, %v3337_v12  ;;  %v3400_v32 = vmax.f32 %v3388_v18, 0.0  ;;  %v4381_v51 = vld [vmem:[%s6104_s8] ss:$0 sm:$0xff] }
 0x4fd   : > { %v3391_v13 = vpop.f32.mrf.mxu0 }
 0x4fe   : > { %v3392_v57 = vadd.f32 %v3391_v13, %v3339_v7  ;;  %3644 = vmatprep.mubr.bf16.mxu1 %v3405_v44  ;;  %v3401_v30 = vmax.f32 %v3390_v17, 0.0 }
 0x4ff   : > { %v3393_v25 = vpop.f32.mrf.mxu0  ;;  %3645 = vmatmul.mubr.bf16.vlgmr.msra.gmra.mxu1 %v3404_v11 }
 0x500   : > { %v3394_v26 = vadd.f32 %v3393_v25, %v3341_v16  ;;  %v3402_v29 = vmax.f32 %v3392_v57, 0.0 }
 0x502   : > { %v3403_v31 = vmax.f32 %v3394_v26, 0.0  ;;  %v3406_v52 = vpack.c.bf16 %v3402_v29, %v3400_v32 }
 0x504   : > { %v3407_v33 = vpack.c.bf16 %v3403_v31, %v3401_v30 }
 0x506   : > { %3654 = vmatprep.mubr.bf16.mxu1 %v3407_v33 }
 0x507   : > { %3655 = vmatmul.mubr.bf16.gmra.mxu1 %v3406_v52 }
 0x5bf   : > { %v3646_v8 = vpop.f32.mrf.mxu1 }
 0x5c0   : > { %v3647_v49 = vadd.f32 %v3646_v8, %v3445_v35 }
 0x5c1   : > { %v3648_v46 = vpop.f32.mrf.mxu1 }
 0x5c2   : > { %v3649_v47 = vadd.f32 %v3648_v46, %v3449_v15  ;;  %v3665_v40 = vmax.f32 %v3647_v49, 0.0 }
 0x5c3   : > { %v3650_v22 = vpop.f32.mrf.mxu1 }
 0x5c4   : > { %v3651_v61 = vadd.f32 %v3650_v22, %v3445_v35  ;;  %v3666_v53 = vmax.f32 %v3649_v47, 0.0 }
 0x5c5   : > { %v3652_v9 = vpop.f32.mrf.mxu1 }
 0x5c6   : > { %v3653_v50 = vadd.f32 %v3652_v9, %v3449_v15  ;;  %v3667_v5 = vmax.f32 %v3651_v61, 0.0 }
 0x5c7   : > { %v3656_v38 = vpop.f32.mrf.mxu1 }
 0x5c8   : > { %v3668_v56 = vmax.f32 %v3653_v50, 0.0  ;;  %v3673_v62 = vpack.c.bf16 %v3667_v5, %v3665_v40  ;;  %v3657_v21 = vadd.f32 %v3656_v38, %v3445_v35 }
 0x5c9   : > { %v3658_v3 = vpop.f32.mrf.mxu1 }
 0x5ca   : > { %v3674_v59 = vpack.c.bf16 %v3668_v56, %v3666_v53  ;;  %v3659_v2 = vadd.f32 %v3658_v3, %v3449_v15  ;;  %v3669_v24 = vmax.f32 %v3657_v21, 0.0 }
 0x5cb   : > { %v3660_v0 = vpop.f32.mrf.mxu1 }
 0x5cc   : > { %v3661_v20 = vadd.f32 %v3660_v0, %v3445_v35  ;;  %3844 = vmatprep.mubr.bf16.mxu0 %v3674_v59  ;;  %v3670_v58 = vmax.f32 %v3659_v2, 0.0 }
 0x5cd   : > { %v3662_v43 = vpop.f32.mrf.mxu1  ;;  %3845 = vmatmul.mubr.bf16.vlgmr.msra.gmra.mxu0 %v3673_v62 }
 0x5ce   : > { %v3663_v60 = vadd.f32 %v3662_v43, %v3449_v15  ;;  %v3671_v34 = vmax.f32 %v3661_v20, 0.0 }
 0x5d0   : > { %v3672_v1 = vmax.f32 %v3663_v60, 0.0  ;;  %v3675_v48 = vpack.c.bf16 %v3671_v34, %v3669_v24 }
 0x5d2   : > { %v3676_v37 = vpack.c.bf16 %v3672_v1, %v3670_v58 }
 0x5d4   : > { %3852 = vmatprep.mubr.bf16.mxu0 %v3676_v37 }
 0x5d5   : > { %3853 = vmatmul.mubr.bf16.gmra.mxu0 %v3675_v48 }
 0x68d   : > { %v4469_v28 = vpop.f32.mrf.mxu0 }
 0x68f   : > { %v4470_v4 = vpop.f32.mrf.mxu0 }
 0x690   : > { %v4471_v6 = vadd.f32 %v4470_v4, %v4469_v28 }
 0x691   : > { %v4472_v19 = vpop.f32.mrf.mxu0 }
 0x692   : > { %v3847_v54 = vadd.f32 %v4471_v6, %v4381_v51 }
 0x693   : > { %v4473_v27 = vpop.f32.mrf.mxu0 }
 0x694   : > { %v4474_v55 = vadd.f32 %v4473_v27, %v4472_v19  ;;  %v3861_v44 = vmax.f32 %v3847_v54, 0.0 }
 0x695   : > { %v4475_v45 = vpop.f32.mrf.mxu0 }
 0x696   : > { %v3850_v12 = vadd.f32 %v4474_v55, %v4381_v51 }
 0x697   : > { %v4476_v7 = vpop.f32.mrf.mxu0 }
 0x698   : > { %v3862_v10 = vmax.f32 %v3850_v12, 0.0  ;;  %v4477_v11 = vadd.f32 %v4476_v7, %v4475_v45 }
 0x699   : > { %v4478_v13 = vpop.f32.mrf.mxu0 }
 0x69a   : > { %v4412_v16 = vpack.c.bf16 %v3862_v10, %v3861_v44  ;;  %v3855_v57 = vadd.f32 %v4477_v11, %v4381_v51 }
 0x69b   : > { %v4479_v17 = vpop.f32.mrf.mxu0 }
 0x69c   : > { %4413 = vst [vmem:[%s583_s16] sm:$0xff] %v4412_v16   ;;  %v4480_v18 = vadd.f32 %v4479_v17, %v4478_v13  ;;  %v3863_v26 = vmax.f32 %v3855_v57, 0.0 }
 0x69e   : > { %v3858_v25 = vadd.f32 %v4480_v18, %v4381_v51 }
 0x6a0   : > { %v3864_v29 = vmax.f32 %v3858_v25, 0.0 }
 0x6a2   : > { %v4417_v30 = vpack.c.bf16 %v3864_v29, %v3863_v26 }
 0x6a4   : > { %4419 = vst [vmem:[%s583_s16 + $0x8] sm:$0xff] %v4417_v30  }
 0x6a5 PF: > { %p27_p5 = scmp.ge.s32.totalorder %s5506_s24, 4   ;;  %s6106_s29 = smov %s5303_s30 }
 0x6a6   : > { %s6107_s30 = smov %s5307_s15  ;;  %s6108_s15 = smov %s5517_s25 }
 0x6a7   : > { %s6109_s16 = smov %s5506_s24  ;;  %29 = sbr.rel (!%p27_p5) target bundleno = 14 (0xe), region = 139 }
 0x6ac   :  { %3907 = vsyncpa [#allocation3], 1 }
 0x6ad   :  { %3909 = vsyncpa [#allocation3 + $0x1], 1 }
 0x6ae   :  { %3910 = vsyncpa [#allocation5], 1 }
 0x6af   :  { %3911 = vsyncpa [#allocation8], 1 }
 0x6b0   :  { %3912 = vsyncpa [#allocation11], 1 }

</bundles_post_ra>
